<compile_context>
chip_gen: v7x
topology: tpu7x:2x2x1
jax: 0.10.0
libtpu: 0.0.40
codegen_flags: <defaults>
</compile_context>

<pallas_src>
import jax
import jax.numpy as jnp
from jax import lax
from jax.experimental import pallas as pl
from jax.experimental.pallas import tpu as pltpu

INPUT_DIM = 2
HIDDEN_DIM = 8
N_ITERS = 3


def _gnn_kernel(x_ref, rrow_ref, rcol_ref,
                w_in_ref, b_in_ref,
                we1_cH_ref, we1_cX_ref, we1_rH_ref, we1_rX_ref, be1_ref,
                we2t_ref, be2_ref,
                wn1_miH_ref, wn1_miX_ref, wn1_moH_ref, wn1_moX_ref,
                wn1_mH_ref, wn1_mX_ref, bn1_ref,
                wn2_ref, bn2_ref,
                out_ref):
    f32 = jnp.float32
    X = x_ref[...]                                    # [N, input_dim] f32
    # bf16 in HBM/VMEM (exact 0/1), f32 in vregs so selection is exact.
    Rrow = rrow_ref[...].astype(f32)                  # [E_pad, N] one-hot of edge_index[0]
    Rcol = rcol_ref[...].astype(f32)                  # [E_pad, N] one-hot of edge_index[1]

    we2t = we2t_ref[...]                              # [1, hidden]  (we2 transposed)
    be2 = be2_ref[...]                                # [1, 1]

    def mm(a, b):
        return jnp.dot(a, b, preferred_element_type=f32)

    def scatter(R, v):
        # R^T @ v without materializing the transpose: contract over E axis.
        return lax.dot_general(R, v, (((0,), (0,)), ((), ())),
                               preferred_element_type=f32)

    # ---- input network: Linear(input_dim, hidden) + Tanh ----
    H = jnp.tanh(mm(X, w_in_ref[...]) + b_in_ref[...])        # [N, hidden]

    # ---- loop-invariant pieces (X never changes) ----
    X_row = mm(Rrow, X)                                        # [E_pad, input_dim]  X[row]
    X_col = mm(Rcol, X)                                        # [E_pad, input_dim]  X[col]
    # X + bias part of edge-net layer-1 preactivation
    edge_const = mm(X_col, we1_cX_ref[...]) + mm(X_row, we1_rX_ref[...]) + be1_ref[...]
    # X + bias part of node-net layer-1 preactivation
    node_constX = mm(X, wn1_mX_ref[...]) + bn1_ref[...]

    def edge_hidden(H_row, H_col):
        # tanh of edge-net layer 1; split-weight matmuls replace lane-axis concat.
        return jnp.tanh(mm(H_col, we1_cH_ref[...]) + mm(H_row, we1_rH_ref[...])
                        + edge_const)                          # [E_pad, hidden]

    def edge_scores(h):
        # [hidden -> 1] projection as VPU multiply + reduce (no 1-column MXU pass).
        return jax.nn.sigmoid(jnp.sum(h * we2t, axis=-1, keepdims=True) + be2)   # [E_pad, 1]

    # ---- message passing iterations (unrolled at trace time) ----
    for _ in range(N_ITERS):
        H_row = mm(Rrow, H)                                    # [E_pad, hidden]  H[row]
        H_col = mm(Rcol, H)                                    # [E_pad, hidden]  H[col]
        e = edge_scores(edge_hidden(H_row, H_col))             # [E_pad, 1] edge_attr

        # scatter_add(e * m[row], col) / scatter_add(e * m[col], row),
        # with the H / X halves kept separate (no concat).  Padded edges have
        # all-zero incidence rows, so they contribute nothing here.
        miH = scatter(Rcol, e * H_row)                         # [N, hidden]
        miX = scatter(Rcol, e * X_row)                         # [N, input_dim]
        moH = scatter(Rrow, e * H_col)                         # [N, hidden]
        moX = scatter(Rrow, e * X_col)                         # [N, input_dim]

        pre = (mm(miH, wn1_miH_ref[...]) + mm(miX, wn1_miX_ref[...])
               + mm(moH, wn1_moH_ref[...]) + mm(moX, wn1_moX_ref[...])
               + mm(H, wn1_mH_ref[...]) + node_constX)
        Hn = jnp.tanh(pre)                                     # node net layer 1
        H = jnp.tanh(mm(Hn, wn2_ref[...]) + bn2_ref[...])      # node net layer 2
        # new m = [H, X]: carried implicitly as (H, X)

    # ---- final edge classification, lane-dense (1, E_pad) output ----
    H_row = mm(Rrow, H)
    H_col = mm(Rcol, H)
    h = edge_hidden(H_row, H_col)                              # [E_pad, hidden]
    logits = lax.dot_general(we2t, h, (((1,), (1,)), ((), ())),
                             preferred_element_type=f32) + be2  # [1, E_pad]
    out_ref[...] = jax.nn.sigmoid(logits)


def gnn_segment_classifier(x, edge_index, params):
    """x: [N, input_dim] f32; edge_index: [2, E] int32; returns [E] edge scores."""
    N = x.shape[0]
    E = edge_index.shape[1]
    h, d_in = HIDDEN_DIM, INPUT_DIM
    D = h + d_in

    row, col = edge_index[0], edge_index[1]

    # Pad the edge axis to a multiple of 128: lane-dense, unmasked final store
    # and (8,128)-friendly E-major tiles.  Padded edges use index -1 -> one_hot
    # yields all-zero incidence rows, so they never touch the node update; their
    # (meaningless) scores are sliced off below.
    E_pad = ((E + 127) // 128) * 128
    if E_pad != E:
        pad = jnp.full((E_pad - E,), -1, jnp.int32)
        row = jnp.concatenate([row, pad])
        col = jnp.concatenate([col, pad])

    # bf16 incidence matrices: exact 0/1 values, half the DMA / VMEM of f32.
    # Note: any index outside [0, N) yields an all-zero row (edge silently dropped).
    Rrow = jax.nn.one_hot(row, N, dtype=jnp.bfloat16)          # [E_pad, N]
    Rcol = jax.nn.one_hot(col, N, dtype=jnp.bfloat16)          # [E_pad, N]

    # Host-side weight splits (match concat layouts of the reference):
    #   B = [m[col], m[row]] = [H_col, X_col, H_row, X_row]
    we1 = params["we1"]
    we1_cH, we1_cX = we1[0:h], we1[h:D]
    we1_rH, we1_rX = we1[D:D + h], we1[D + h:2 * D]
    #   M = [mi, mo, m] = [miH, miX, moH, moX, H, X]
    wn1 = params["wn1"]
    wn1_miH, wn1_miX = wn1[0:h], wn1[h:D]
    wn1_moH, wn1_moX = wn1[D:D + h], wn1[D + h:2 * D]
    wn1_mH, wn1_mX = wn1[2 * D:2 * D + h], wn1[2 * D + h:3 * D]
    we2t = params["we2"].T                                     # [1, hidden]

    inputs = (x, Rrow, Rcol,
              params["w_in"], params["b_in"],
              we1_cH, we1_cX, we1_rH, we1_rX, params["be1"],
              we2t, params["be2"],
              wn1_miH, wn1_miX, wn1_moH, wn1_moX, wn1_mH, wn1_mX, params["bn1"],
              params["wn2"], params["bn2"])

    # Explicit VMEM budget: actual buffers + headroom, capped below v7x's 64 MiB.
    in_bytes = sum(int(a.size) * jnp.dtype(a.dtype).itemsize for a in inputs)
    out_bytes = E_pad * 4
    vmem_limit = int(min(48 << 20, max(32 << 20, 4 * (in_bytes + out_bytes) + (4 << 20))))

    vmem = pl.BlockSpec(memory_space=pltpu.MemorySpace.VMEM)
    out = pl.pallas_call(
        _gnn_kernel,
        out_shape=jax.ShapeDtypeStruct((1, E_pad), jnp.float32),  # lane-dense scores
        in_specs=[vmem] * len(inputs),
        out_specs=vmem,
        compiler_params=pltpu.CompilerParams(vmem_limit_bytes=vmem_limit),
    )(*inputs)
    return out[0, :E]                                          # [E]


def init_params(key):
    """Deterministic init matching torch.nn.Linear default (U(-1/sqrt(fan_in), ...))."""
    d_in, h = INPUT_DIM, HIDDEN_DIM
    D = d_in + h

    def lin(k, fan_in, fan_out):
        k1, k2 = jax.random.split(k)
        bound = fan_in ** -0.5
        w = jax.random.uniform(k1, (fan_in, fan_out), jnp.float32, -bound, bound)
        b = jax.random.uniform(k2, (1, fan_out), jnp.float32, -bound, bound)
        return w, b

    keys = jax.random.split(key, 5)
    w_in, b_in = lin(keys[0], d_in, h)       # input_network
    we1, be1 = lin(keys[1], 2 * D, h)        # edge net layer 1
    we2, be2 = lin(keys[2], h, 1)            # edge net layer 2
    wn1, bn1 = lin(keys[3], 3 * D, h)        # node net layer 1
    wn2, bn2 = lin(keys[4], h, h)            # node net layer 2
    return dict(w_in=w_in, b_in=b_in, we1=we1, be1=be1, we2=we2, be2=be2,
                wn1=wn1, bn1=bn1, wn2=wn2, bn2=bn2)


def _reference(x, edge_index, params):
    """Pure-JAX reference of the PyTorch forward (scatter via .at[].add)."""
    row, col = edge_index[0], edge_index[1]
    H = jnp.tanh(x @ params["w_in"] + params["b_in"])
    m = jnp.concatenate([H, x], axis=-1)

    def edge_net(m):
        B = jnp.concatenate([m[col], m[row]], axis=-1)
        h = jnp.tanh(B @ params["we1"] + params["be1"])
        return jax.nn.sigmoid(h @ params["we2"] + params["be2"])

    for _ in range(N_ITERS):
        e = edge_net(m)
        mi = jnp.zeros_like(m).at[col].add(e * m[row])
        mo = jnp.zeros_like(m).at[row].add(e * m[col])
        M = jnp.concatenate([mi, mo, m], axis=-1)
        Hn = jnp.tanh(M @ params["wn1"] + params["bn1"])
        Hn = jnp.tanh(Hn @ params["wn2"] + params["bn2"])
        m = jnp.concatenate([Hn, x], axis=-1)
    return edge_net(m)[:, 0]


if __name__ == "__main__":
    key = jax.random.PRNGKey(0)
    k_x, k_e, k_p = jax.random.split(key, 3)

    N_NODES, N_EDGES = 16, 32
    x = jax.random.normal(k_x, (N_NODES, INPUT_DIM), jnp.float32)
    edge_index = jax.random.randint(k_e, (2, N_EDGES), 0, N_NODES, jnp.int32)
    params = init_params(k_p)

    out = gnn_segment_classifier(x, edge_index, params)
    out = jax.block_until_ready(out)

    ref = _reference(x, edge_index, params)
    assert out.shape == (N_EDGES,)
    assert jnp.allclose(out, ref, atol=1e-5, rtol=1e-5), "mismatch vs JAX reference"

    print("KERNEL_OK")
</pallas_src>

<mosaic_0001>
module attributes {stable_mosaic.version = 11 : i64} {
  func.func @_gnn_kernel(%arg0: memref<16x2xf32, #tpu.memory_space<vmem>>, %arg1: memref<128x16xbf16, #tpu.memory_space<vmem>>, %arg2: memref<128x16xbf16, #tpu.memory_space<vmem>>, %arg3: memref<2x8xf32, #tpu.memory_space<vmem>>, %arg4: memref<1x8xf32, #tpu.memory_space<vmem>>, %arg5: memref<8x8xf32, #tpu.memory_space<vmem>>, %arg6: memref<2x8xf32, #tpu.memory_space<vmem>>, %arg7: memref<8x8xf32, #tpu.memory_space<vmem>>, %arg8: memref<2x8xf32, #tpu.memory_space<vmem>>, %arg9: memref<1x8xf32, #tpu.memory_space<vmem>>, %arg10: memref<1x8xf32, #tpu.memory_space<vmem>>, %arg11: memref<1x1xf32, #tpu.memory_space<vmem>>, %arg12: memref<8x8xf32, #tpu.memory_space<vmem>>, %arg13: memref<2x8xf32, #tpu.memory_space<vmem>>, %arg14: memref<8x8xf32, #tpu.memory_space<vmem>>, %arg15: memref<2x8xf32, #tpu.memory_space<vmem>>, %arg16: memref<8x8xf32, #tpu.memory_space<vmem>>, %arg17: memref<2x8xf32, #tpu.memory_space<vmem>>, %arg18: memref<1x8xf32, #tpu.memory_space<vmem>>, %arg19: memref<8x8xf32, #tpu.memory_space<vmem>>, %arg20: memref<1x8xf32, #tpu.memory_space<vmem>>, %arg21: memref<1x128xf32, #tpu.memory_space<vmem>>) attributes {dimension_semantics = [], scalar_prefetch = 0 : i64, scratch_operands = 0 : i64, tpu.core_type = #tpu.core_type<tc>} {
    %c0 = arith.constant 0 : index
    %c0_0 = arith.constant 0 : index
    %0 = vector.load %arg0[%c0, %c0_0] : memref<16x2xf32, #tpu.memory_space<vmem>>, vector<16x2xf32>
    %c0_1 = arith.constant 0 : index
    %c0_2 = arith.constant 0 : index
    %1 = vector.load %arg1[%c0_1, %c0_2] : memref<128x16xbf16, #tpu.memory_space<vmem>>, vector<128x16xbf16>
    %2 = arith.extf %1 : vector<128x16xbf16> to vector<128x16xf32>
    %c0_3 = arith.constant 0 : index
    %c0_4 = arith.constant 0 : index
    %3 = vector.load %arg2[%c0_3, %c0_4] : memref<128x16xbf16, #tpu.memory_space<vmem>>, vector<128x16xbf16>
    %4 = arith.extf %3 : vector<128x16xbf16> to vector<128x16xf32>
    %c0_5 = arith.constant 0 : index
    %c0_6 = arith.constant 0 : index
    %5 = vector.load %arg10[%c0_5, %c0_6] : memref<1x8xf32, #tpu.memory_space<vmem>>, vector<1x8xf32>
    %c0_7 = arith.constant 0 : index
    %c0_8 = arith.constant 0 : index
    %6 = vector.load %arg11[%c0_7, %c0_8] : memref<1x1xf32, #tpu.memory_space<vmem>>, vector<1x1xf32>
    %c0_9 = arith.constant 0 : index
    %c0_10 = arith.constant 0 : index
    %7 = vector.load %arg3[%c0_9, %c0_10] : memref<2x8xf32, #tpu.memory_space<vmem>>, vector<2x8xf32>
    %cst = arith.constant dense<0.000000e+00> : vector<16x8xf32>
    %8 = tpu.matmul %0, %7, %cst {dimension_numbers = #tpu.dot_dimension_numbers<[1], [0], [0], [1], [0, 0, 1, 1], [], []>} : vector<16x2xf32>, vector<2x8xf32>, vector<16x8xf32> -> vector<16x8xf32>
    %c0_11 = arith.constant 0 : index
    %c0_12 = arith.constant 0 : index
    %9 = vector.load %arg4[%c0_11, %c0_12] : memref<1x8xf32, #tpu.memory_space<vmem>>, vector<1x8xf32>
    %10 = vector.broadcast %9 : vector<1x8xf32> to vector<16x8xf32>
    %11 = arith.addf %8, %10 : vector<16x8xf32>
    %12 = math.tanh %11 : vector<16x8xf32>
    %cst_13 = arith.constant dense<0.000000e+00> : vector<128x2xf32>
    %13 = tpu.matmul %2, %0, %cst_13 {dimension_numbers = #tpu.dot_dimension_numbers<[1], [0], [0], [1], [0, 0, 1, 1], [], []>} : vector<128x16xf32>, vector<16x2xf32>, vector<128x2xf32> -> vector<128x2xf32>
    %cst_14 = arith.constant dense<0.000000e+00> : vector<128x2xf32>
    %14 = tpu.matmul %4, %0, %cst_14 {dimension_numbers = #tpu.dot_dimension_numbers<[1], [0], [0], [1], [0, 0, 1, 1], [], []>} : vector<128x16xf32>, vector<16x2xf32>, vector<128x2xf32> -> vector<128x2xf32>
    %c0_15 = arith.constant 0 : index
    %c0_16 = arith.constant 0 : index
    %15 = vector.load %arg6[%c0_15, %c0_16] : memref<2x8xf32, #tpu.memory_space<vmem>>, vector<2x8xf32>
    %cst_17 = arith.constant dense<0.000000e+00> : vector<128x8xf32>
    %16 = tpu.matmul %14, %15, %cst_17 {dimension_numbers = #tpu.dot_dimension_numbers<[1], [0], [0], [1], [0, 0, 1, 1], [], []>} : vector<128x2xf32>, vector<2x8xf32>, vector<128x8xf32> -> vector<128x8xf32>
    %c0_18 = arith.constant 0 : index
    %c0_19 = arith.constant 0 : index
    %17 = vector.load %arg8[%c0_18, %c0_19] : memref<2x8xf32, #tpu.memory_space<vmem>>, vector<2x8xf32>
    %cst_20 = arith.constant dense<0.000000e+00> : vector<128x8xf32>
    %18 = tpu.matmul %13, %17, %cst_20 {dimension_numbers = #tpu.dot_dimension_numbers<[1], [0], [0], [1], [0, 0, 1, 1], [], []>} : vector<128x2xf32>, vector<2x8xf32>, vector<128x8xf32> -> vector<128x8xf32>
    %19 = arith.addf %16, %18 : vector<128x8xf32>
    %c0_21 = arith.constant 0 : index
    %c0_22 = arith.constant 0 : index
    %20 = vector.load %arg9[%c0_21, %c0_22] : memref<1x8xf32, #tpu.memory_space<vmem>>, vector<1x8xf32>
    %21 = vector.broadcast %20 : vector<1x8xf32> to vector<128x8xf32>
    %22 = arith.addf %19, %21 : vector<128x8xf32>
    %c0_23 = arith.constant 0 : index
    %c0_24 = arith.constant 0 : index
    %23 = vector.load %arg17[%c0_23, %c0_24] : memref<2x8xf32, #tpu.memory_space<vmem>>, vector<2x8xf32>
    %cst_25 = arith.constant dense<0.000000e+00> : vector<16x8xf32>
    %24 = tpu.matmul %0, %23, %cst_25 {dimension_numbers = #tpu.dot_dimension_numbers<[1], [0], [0], [1], [0, 0, 1, 1], [], []>} : vector<16x2xf32>, vector<2x8xf32>, vector<16x8xf32> -> vector<16x8xf32>
    %c0_26 = arith.constant 0 : index
    %c0_27 = arith.constant 0 : index
    %25 = vector.load %arg18[%c0_26, %c0_27] : memref<1x8xf32, #tpu.memory_space<vmem>>, vector<1x8xf32>
    %26 = vector.broadcast %25 : vector<1x8xf32> to vector<16x8xf32>
    %27 = arith.addf %24, %26 : vector<16x8xf32>
    %cst_28 = arith.constant dense<0.000000e+00> : vector<128x8xf32>
    %28 = tpu.matmul %2, %12, %cst_28 {dimension_numbers = #tpu.dot_dimension_numbers<[1], [0], [0], [1], [0, 0, 1, 1], [], []>} : vector<128x16xf32>, vector<16x8xf32>, vector<128x8xf32> -> vector<128x8xf32>
    %cst_29 = arith.constant dense<0.000000e+00> : vector<128x8xf32>
    %29 = tpu.matmul %4, %12, %cst_29 {dimension_numbers = #tpu.dot_dimension_numbers<[1], [0], [0], [1], [0, 0, 1, 1], [], []>} : vector<128x16xf32>, vector<16x8xf32>, vector<128x8xf32> -> vector<128x8xf32>
    %c0_30 = arith.constant 0 : index
    %c0_31 = arith.constant 0 : index
    %30 = vector.load %arg5[%c0_30, %c0_31] : memref<8x8xf32, #tpu.memory_space<vmem>>, vector<8x8xf32>
    %cst_32 = arith.constant dense<0.000000e+00> : vector<128x8xf32>
    %31 = tpu.matmul %29, %30, %cst_32 {dimension_numbers = #tpu.dot_dimension_numbers<[1], [0], [0], [1], [0, 0, 1, 1], [], []>} : vector<128x8xf32>, vector<8x8xf32>, vector<128x8xf32> -> vector<128x8xf32>
    %c0_33 = arith.constant 0 : index
    %c0_34 = arith.constant 0 : index
    %32 = vector.load %arg7[%c0_33, %c0_34] : memref<8x8xf32, #tpu.memory_space<vmem>>, vector<8x8xf32>
    %cst_35 = arith.constant dense<0.000000e+00> : vector<128x8xf32>
    %33 = tpu.matmul %28, %32, %cst_35 {dimension_numbers = #tpu.dot_dimension_numbers<[1], [0], [0], [1], [0, 0, 1, 1], [], []>} : vector<128x8xf32>, vector<8x8xf32>, vector<128x8xf32> -> vector<128x8xf32>
    %34 = arith.addf %31, %33 : vector<128x8xf32>
    %35 = arith.addf %34, %22 : vector<128x8xf32>
    %36 = math.tanh %35 : vector<128x8xf32>
    %37 = vector.broadcast %5 : vector<1x8xf32> to vector<128x8xf32>
    %38 = arith.mulf %36, %37 : vector<128x8xf32>
    %cst_36 = arith.constant dense<0.000000e+00> : vector<128xf32>
    %39 = vector.multi_reduction <add>, %38, %cst_36 [1] : vector<128x8xf32> to vector<128xf32>
    %40 = vector.shape_cast %39 : vector<128xf32> to vector<128x1xf32>
    %41 = vector.broadcast %6 : vector<1x1xf32> to vector<128x1xf32>
    %42 = arith.addf %40, %41 : vector<128x1xf32>
    %43 = arith.negf %42 : vector<128x1xf32>
    %44 = math.exp %43 : vector<128x1xf32>
    %cst_37 = arith.constant 1.000000e+00 : f32
    %45 = vector.broadcast %cst_37 : f32 to vector<128x1xf32>
    %46 = arith.addf %45, %44 : vector<128x1xf32>
    %47 = arith.divf %45, %46 : vector<128x1xf32>
    %48 = vector.broadcast %47 : vector<128x1xf32> to vector<128x8xf32>
    %49 = arith.mulf %48, %28 : vector<128x8xf32>
    %cst_38 = arith.constant dense<0.000000e+00> : vector<16x8xf32>
    %50 = tpu.matmul %4, %49, %cst_38 {dimension_numbers = #tpu.dot_dimension_numbers<[0], [0], [1], [1], [0, 1, 1, 1], [], []>} : vector<128x16xf32>, vector<128x8xf32>, vector<16x8xf32> -> vector<16x8xf32>
    %51 = vector.broadcast %47 : vector<128x1xf32> to vector<128x2xf32>
    %52 = arith.mulf %51, %13 : vector<128x2xf32>
    %cst_39 = arith.constant dense<0.000000e+00> : vector<16x2xf32>
    %53 = tpu.matmul %4, %52, %cst_39 {dimension_numbers = #tpu.dot_dimension_numbers<[0], [0], [1], [1], [0, 1, 1, 1], [], []>} : vector<128x16xf32>, vector<128x2xf32>, vector<16x2xf32> -> vector<16x2xf32>
    %54 = vector.broadcast %47 : vector<128x1xf32> to vector<128x8xf32>
    %55 = arith.mulf %54, %29 : vector<128x8xf32>
    %cst_40 = arith.constant dense<0.000000e+00> : vector<16x8xf32>
    %56 = tpu.matmul %2, %55, %cst_40 {dimension_numbers = #tpu.dot_dimension_numbers<[0], [0], [1], [1], [0, 1, 1, 1], [], []>} : vector<128x16xf32>, vector<128x8xf32>, vector<16x8xf32> -> vector<16x8xf32>
    %57 = vector.broadcast %47 : vector<128x1xf32> to vector<128x2xf32>
    %58 = arith.mulf %57, %14 : vector<128x2xf32>
    %cst_41 = arith.constant dense<0.000000e+00> : vector<16x2xf32>
    %59 = tpu.matmul %2, %58, %cst_41 {dimension_numbers = #tpu.dot_dimension_numbers<[0], [0], [1], [1], [0, 1, 1, 1], [], []>} : vector<128x16xf32>, vector<128x2xf32>, vector<16x2xf32> -> vector<16x2xf32>
    %c0_42 = arith.constant 0 : index
    %c0_43 = arith.constant 0 : index
    %60 = vector.load %arg12[%c0_42, %c0_43] : memref<8x8xf32, #tpu.memory_space<vmem>>, vector<8x8xf32>
    %cst_44 = arith.constant dense<0.000000e+00> : vector<16x8xf32>
    %61 = tpu.matmul %50, %60, %cst_44 {dimension_numbers = #tpu.dot_dimension_numbers<[1], [0], [0], [1], [0, 0, 1, 1], [], []>} : vector<16x8xf32>, vector<8x8xf32>, vector<16x8xf32> -> vector<16x8xf32>
    %c0_45 = arith.constant 0 : index
    %c0_46 = arith.constant 0 : index
    %62 = vector.load %arg13[%c0_45, %c0_46] : memref<2x8xf32, #tpu.memory_space<vmem>>, vector<2x8xf32>
    %cst_47 = arith.constant dense<0.000000e+00> : vector<16x8xf32>
    %63 = tpu.matmul %53, %62, %cst_47 {dimension_numbers = #tpu.dot_dimension_numbers<[1], [0], [0], [1], [0, 0, 1, 1], [], []>} : vector<16x2xf32>, vector<2x8xf32>, vector<16x8xf32> -> vector<16x8xf32>
    %64 = arith.addf %61, %63 : vector<16x8xf32>
    %c0_48 = arith.constant 0 : index
    %c0_49 = arith.constant 0 : index
    %65 = vector.load %arg14[%c0_48, %c0_49] : memref<8x8xf32, #tpu.memory_space<vmem>>, vector<8x8xf32>
    %cst_50 = arith.constant dense<0.000000e+00> : vector<16x8xf32>
    %66 = tpu.matmul %56, %65, %cst_50 {dimension_numbers = #tpu.dot_dimension_numbers<[1], [0], [0], [1], [0, 0, 1, 1], [], []>} : vector<16x8xf32>, vector<8x8xf32>, vector<16x8xf32> -> vector<16x8xf32>
    %67 = arith.addf %64, %66 : vector<16x8xf32>
    %c0_51 = arith.constant 0 : index
    %c0_52 = arith.constant 0 : index
    %68 = vector.load %arg15[%c0_51, %c0_52] : memref<2x8xf32, #tpu.memory_space<vmem>>, vector<2x8xf32>
    %cst_53 = arith.constant dense<0.000000e+00> : vector<16x8xf32>
    %69 = tpu.matmul %59, %68, %cst_53 {dimension_numbers = #tpu.dot_dimension_numbers<[1], [0], [0], [1], [0, 0, 1, 1], [], []>} : vector<16x2xf32>, vector<2x8xf32>, vector<16x8xf32> -> vector<16x8xf32>
    %70 = arith.addf %67, %69 : vector<16x8xf32>
    %c0_54 = arith.constant 0 : index
    %c0_55 = arith.constant 0 : index
    %71 = vector.load %arg16[%c0_54, %c0_55] : memref<8x8xf32, #tpu.memory_space<vmem>>, vector<8x8xf32>
    %cst_56 = arith.constant dense<0.000000e+00> : vector<16x8xf32>
    %72 = tpu.matmul %12, %71, %cst_56 {dimension_numbers = #tpu.dot_dimension_numbers<[1], [0], [0], [1], [0, 0, 1, 1], [], []>} : vector<16x8xf32>, vector<8x8xf32>, vector<16x8xf32> -> vector<16x8xf32>
    %73 = arith.addf %70, %72 : vector<16x8xf32>
    %74 = arith.addf %73, %27 : vector<16x8xf32>
    %75 = math.tanh %74 : vector<16x8xf32>
    %c0_57 = arith.constant 0 : index
    %c0_58 = arith.constant 0 : index
    %76 = vector.load %arg19[%c0_57, %c0_58] : memref<8x8xf32, #tpu.memory_space<vmem>>, vector<8x8xf32>
    %cst_59 = arith.constant dense<0.000000e+00> : vector<16x8xf32>
    %77 = tpu.matmul %75, %76, %cst_59 {dimension_numbers = #tpu.dot_dimension_numbers<[1], [0], [0], [1], [0, 0, 1, 1], [], []>} : vector<16x8xf32>, vector<8x8xf32>, vector<16x8xf32> -> vector<16x8xf32>
    %c0_60 = arith.constant 0 : index
    %c0_61 = arith.constant 0 : index
    %78 = vector.load %arg20[%c0_60, %c0_61] : memref<1x8xf32, #tpu.memory_space<vmem>>, vector<1x8xf32>
    %79 = vector.broadcast %78 : vector<1x8xf32> to vector<16x8xf32>
    %80 = arith.addf %77, %79 : vector<16x8xf32>
    %81 = math.tanh %80 : vector<16x8xf32>
    %cst_62 = arith.constant dense<0.000000e+00> : vector<128x8xf32>
    %82 = tpu.matmul %2, %81, %cst_62 {dimension_numbers = #tpu.dot_dimension_numbers<[1], [0], [0], [1], [0, 0, 1, 1], [], []>} : vector<128x16xf32>, vector<16x8xf32>, vector<128x8xf32> -> vector<128x8xf32>
    %cst_63 = arith.constant dense<0.000000e+00> : vector<128x8xf32>
    %83 = tpu.matmul %4, %81, %cst_63 {dimension_numbers = #tpu.dot_dimension_numbers<[1], [0], [0], [1], [0, 0, 1, 1], [], []>} : vector<128x16xf32>, vector<16x8xf32>, vector<128x8xf32> -> vector<128x8xf32>
    %c0_64 = arith.constant 0 : index
    %c0_65 = arith.constant 0 : index
    %84 = vector.load %arg5[%c0_64, %c0_65] : memref<8x8xf32, #tpu.memory_space<vmem>>, vector<8x8xf32>
    %cst_66 = arith.constant dense<0.000000e+00> : vector<128x8xf32>
    %85 = tpu.matmul %83, %84, %cst_66 {dimension_numbers = #tpu.dot_dimension_numbers<[1], [0], [0], [1], [0, 0, 1, 1], [], []>} : vector<128x8xf32>, vector<8x8xf32>, vector<128x8xf32> -> vector<128x8xf32>
    %c0_67 = arith.constant 0 : index
    %c0_68 = arith.constant 0 : index
    %86 = vector.load %arg7[%c0_67, %c0_68] : memref<8x8xf32, #tpu.memory_space<vmem>>, vector<8x8xf32>
    %cst_69 = arith.constant dense<0.000000e+00> : vector<128x8xf32>
    %87 = tpu.matmul %82, %86, %cst_69 {dimension_numbers = #tpu.dot_dimension_numbers<[1], [0], [0], [1], [0, 0, 1, 1], [], []>} : vector<128x8xf32>, vector<8x8xf32>, vector<128x8xf32> -> vector<128x8xf32>
    %88 = arith.addf %85, %87 : vector<128x8xf32>
    %89 = arith.addf %88, %22 : vector<128x8xf32>
    %90 = math.tanh %89 : vector<128x8xf32>
    %91 = vector.broadcast %5 : vector<1x8xf32> to vector<128x8xf32>
    %92 = arith.mulf %90, %91 : vector<128x8xf32>
    %cst_70 = arith.constant dense<0.000000e+00> : vector<128xf32>
    %93 = vector.multi_reduction <add>, %92, %cst_70 [1] : vector<128x8xf32> to vector<128xf32>
    %94 = vector.shape_cast %93 : vector<128xf32> to vector<128x1xf32>
    %95 = vector.broadcast %6 : vector<1x1xf32> to vector<128x1xf32>
    %96 = arith.addf %94, %95 : vector<128x1xf32>
    %97 = arith.negf %96 : vector<128x1xf32>
    %98 = math.exp %97 : vector<128x1xf32>
    %cst_71 = arith.constant 1.000000e+00 : f32
    %99 = vector.broadcast %cst_71 : f32 to vector<128x1xf32>
    %100 = arith.addf %99, %98 : vector<128x1xf32>
    %101 = arith.divf %99, %100 : vector<128x1xf32>
    %102 = vector.broadcast %101 : vector<128x1xf32> to vector<128x8xf32>
    %103 = arith.mulf %102, %82 : vector<128x8xf32>
    %cst_72 = arith.constant dense<0.000000e+00> : vector<16x8xf32>
    %104 = tpu.matmul %4, %103, %cst_72 {dimension_numbers = #tpu.dot_dimension_numbers<[0], [0], [1], [1], [0, 1, 1, 1], [], []>} : vector<128x16xf32>, vector<128x8xf32>, vector<16x8xf32> -> vector<16x8xf32>
    %105 = vector.broadcast %101 : vector<128x1xf32> to vector<128x2xf32>
    %106 = arith.mulf %105, %13 : vector<128x2xf32>
    %cst_73 = arith.constant dense<0.000000e+00> : vector<16x2xf32>
    %107 = tpu.matmul %4, %106, %cst_73 {dimension_numbers = #tpu.dot_dimension_numbers<[0], [0], [1], [1], [0, 1, 1, 1], [], []>} : vector<128x16xf32>, vector<128x2xf32>, vector<16x2xf32> -> vector<16x2xf32>
    %108 = vector.broadcast %101 : vector<128x1xf32> to vector<128x8xf32>
    %109 = arith.mulf %108, %83 : vector<128x8xf32>
    %cst_74 = arith.constant dense<0.000000e+00> : vector<16x8xf32>
    %110 = tpu.matmul %2, %109, %cst_74 {dimension_numbers = #tpu.dot_dimension_numbers<[0], [0], [1], [1], [0, 1, 1, 1], [], []>} : vector<128x16xf32>, vector<128x8xf32>, vector<16x8xf32> -> vector<16x8xf32>
    %111 = vector.broadcast %101 : vector<128x1xf32> to vector<128x2xf32>
    %112 = arith.mulf %111, %14 : vector<128x2xf32>
    %cst_75 = arith.constant dense<0.000000e+00> : vector<16x2xf32>
    %113 = tpu.matmul %2, %112, %cst_75 {dimension_numbers = #tpu.dot_dimension_numbers<[0], [0], [1], [1], [0, 1, 1, 1], [], []>} : vector<128x16xf32>, vector<128x2xf32>, vector<16x2xf32> -> vector<16x2xf32>
    %c0_76 = arith.constant 0 : index
    %c0_77 = arith.constant 0 : index
    %114 = vector.load %arg12[%c0_76, %c0_77] : memref<8x8xf32, #tpu.memory_space<vmem>>, vector<8x8xf32>
    %cst_78 = arith.constant dense<0.000000e+00> : vector<16x8xf32>
    %115 = tpu.matmul %104, %114, %cst_78 {dimension_numbers = #tpu.dot_dimension_numbers<[1], [0], [0], [1], [0, 0, 1, 1], [], []>} : vector<16x8xf32>, vector<8x8xf32>, vector<16x8xf32> -> vector<16x8xf32>
    %c0_79 = arith.constant 0 : index
    %c0_80 = arith.constant 0 : index
    %116 = vector.load %arg13[%c0_79, %c0_80] : memref<2x8xf32, #tpu.memory_space<vmem>>, vector<2x8xf32>
    %cst_81 = arith.constant dense<0.000000e+00> : vector<16x8xf32>
    %117 = tpu.matmul %107, %116, %cst_81 {dimension_numbers = #tpu.dot_dimension_numbers<[1], [0], [0], [1], [0, 0, 1, 1], [], []>} : vector<16x2xf32>, vector<2x8xf32>, vector<16x8xf32> -> vector<16x8xf32>
    %118 = arith.addf %115, %117 : vector<16x8xf32>
    %c0_82 = arith.constant 0 : index
    %c0_83 = arith.constant 0 : index
    %119 = vector.load %arg14[%c0_82, %c0_83] : memref<8x8xf32, #tpu.memory_space<vmem>>, vector<8x8xf32>
    %cst_84 = arith.constant dense<0.000000e+00> : vector<16x8xf32>
    %120 = tpu.matmul %110, %119, %cst_84 {dimension_numbers = #tpu.dot_dimension_numbers<[1], [0], [0], [1], [0, 0, 1, 1], [], []>} : vector<16x8xf32>, vector<8x8xf32>, vector<16x8xf32> -> vector<16x8xf32>
    %121 = arith.addf %118, %120 : vector<16x8xf32>
    %c0_85 = arith.constant 0 : index
    %c0_86 = arith.constant 0 : index
    %122 = vector.load %arg15[%c0_85, %c0_86] : memref<2x8xf32, #tpu.memory_space<vmem>>, vector<2x8xf32>
    %cst_87 = arith.constant dense<0.000000e+00> : vector<16x8xf32>
    %123 = tpu.matmul %113, %122, %cst_87 {dimension_numbers = #tpu.dot_dimension_numbers<[1], [0], [0], [1], [0, 0, 1, 1], [], []>} : vector<16x2xf32>, vector<2x8xf32>, vector<16x8xf32> -> vector<16x8xf32>
    %124 = arith.addf %121, %123 : vector<16x8xf32>
    %c0_88 = arith.constant 0 : index
    %c0_89 = arith.constant 0 : index
    %125 = vector.load %arg16[%c0_88, %c0_89] : memref<8x8xf32, #tpu.memory_space<vmem>>, vector<8x8xf32>
    %cst_90 = arith.constant dense<0.000000e+00> : vector<16x8xf32>
    %126 = tpu.matmul %81, %125, %cst_90 {dimension_numbers = #tpu.dot_dimension_numbers<[1], [0], [0], [1], [0, 0, 1, 1], [], []>} : vector<16x8xf32>, vector<8x8xf32>, vector<16x8xf32> -> vector<16x8xf32>
    %127 = arith.addf %124, %126 : vector<16x8xf32>
    %128 = arith.addf %127, %27 : vector<16x8xf32>
    %129 = math.tanh %128 : vector<16x8xf32>
    %c0_91 = arith.constant 0 : index
    %c0_92 = arith.constant 0 : index
    %130 = vector.load %arg19[%c0_91, %c0_92] : memref<8x8xf32, #tpu.memory_space<vmem>>, vector<8x8xf32>
    %cst_93 = arith.constant dense<0.000000e+00> : vector<16x8xf32>
    %131 = tpu.matmul %129, %130, %cst_93 {dimension_numbers = #tpu.dot_dimension_numbers<[1], [0], [0], [1], [0, 0, 1, 1], [], []>} : vector<16x8xf32>, vector<8x8xf32>, vector<16x8xf32> -> vector<16x8xf32>
    %c0_94 = arith.constant 0 : index
    %c0_95 = arith.constant 0 : index
    %132 = vector.load %arg20[%c0_94, %c0_95] : memref<1x8xf32, #tpu.memory_space<vmem>>, vector<1x8xf32>
    %133 = vector.broadcast %132 : vector<1x8xf32> to vector<16x8xf32>
    %134 = arith.addf %131, %133 : vector<16x8xf32>
    %135 = math.tanh %134 : vector<16x8xf32>
    %cst_96 = arith.constant dense<0.000000e+00> : vector<128x8xf32>
    %136 = tpu.matmul %2, %135, %cst_96 {dimension_numbers = #tpu.dot_dimension_numbers<[1], [0], [0], [1], [0, 0, 1, 1], [], []>} : vector<128x16xf32>, vector<16x8xf32>, vector<128x8xf32> -> vector<128x8xf32>
    %cst_97 = arith.constant dense<0.000000e+00> : vector<128x8xf32>
    %137 = tpu.matmul %4, %135, %cst_97 {dimension_numbers = #tpu.dot_dimension_numbers<[1], [0], [0], [1], [0, 0, 1, 1], [], []>} : vector<128x16xf32>, vector<16x8xf32>, vector<128x8xf32> -> vector<128x8xf32>
    %c0_98 = arith.constant 0 : index
    %c0_99 = arith.constant 0 : index
    %138 = vector.load %arg5[%c0_98, %c0_99] : memref<8x8xf32, #tpu.memory_space<vmem>>, vector<8x8xf32>
    %cst_100 = arith.constant dense<0.000000e+00> : vector<128x8xf32>
    %139 = tpu.matmul %137, %138, %cst_100 {dimension_numbers = #tpu.dot_dimension_numbers<[1], [0], [0], [1], [0, 0, 1, 1], [], []>} : vector<128x8xf32>, vector<8x8xf32>, vector<128x8xf32> -> vector<128x8xf32>
    %c0_101 = arith.constant 0 : index
    %c0_102 = arith.constant 0 : index
    %140 = vector.load %arg7[%c0_101, %c0_102] : memref<8x8xf32, #tpu.memory_space<vmem>>, vector<8x8xf32>
    %cst_103 = arith.constant dense<0.000000e+00> : vector<128x8xf32>
    %141 = tpu.matmul %136, %140, %cst_103 {dimension_numbers = #tpu.dot_dimension_numbers<[1], [0], [0], [1], [0, 0, 1, 1], [], []>} : vector<128x8xf32>, vector<8x8xf32>, vector<128x8xf32> -> vector<128x8xf32>
    %142 = arith.addf %139, %141 : vector<128x8xf32>
    %143 = arith.addf %142, %22 : vector<128x8xf32>
    %144 = math.tanh %143 : vector<128x8xf32>
    %145 = vector.broadcast %5 : vector<1x8xf32> to vector<128x8xf32>
    %146 = arith.mulf %144, %145 : vector<128x8xf32>
    %cst_104 = arith.constant dense<0.000000e+00> : vector<128xf32>
    %147 = vector.multi_reduction <add>, %146, %cst_104 [1] : vector<128x8xf32> to vector<128xf32>
    %148 = vector.shape_cast %147 : vector<128xf32> to vector<128x1xf32>
    %149 = vector.broadcast %6 : vector<1x1xf32> to vector<128x1xf32>
    %150 = arith.addf %148, %149 : vector<128x1xf32>
    %151 = arith.negf %150 : vector<128x1xf32>
    %152 = math.exp %151 : vector<128x1xf32>
    %cst_105 = arith.constant 1.000000e+00 : f32
    %153 = vector.broadcast %cst_105 : f32 to vector<128x1xf32>
    %154 = arith.addf %153, %152 : vector<128x1xf32>
    %155 = arith.divf %153, %154 : vector<128x1xf32>
    %156 = vector.broadcast %155 : vector<128x1xf32> to vector<128x8xf32>
    %157 = arith.mulf %156, %136 : vector<128x8xf32>
    %cst_106 = arith.constant dense<0.000000e+00> : vector<16x8xf32>
    %158 = tpu.matmul %4, %157, %cst_106 {dimension_numbers = #tpu.dot_dimension_numbers<[0], [0], [1], [1], [0, 1, 1, 1], [], []>} : vector<128x16xf32>, vector<128x8xf32>, vector<16x8xf32> -> vector<16x8xf32>
    %159 = vector.broadcast %155 : vector<128x1xf32> to vector<128x2xf32>
    %160 = arith.mulf %159, %13 : vector<128x2xf32>
    %cst_107 = arith.constant dense<0.000000e+00> : vector<16x2xf32>
    %161 = tpu.matmul %4, %160, %cst_107 {dimension_numbers = #tpu.dot_dimension_numbers<[0], [0], [1], [1], [0, 1, 1, 1], [], []>} : vector<128x16xf32>, vector<128x2xf32>, vector<16x2xf32> -> vector<16x2xf32>
    %162 = vector.broadcast %155 : vector<128x1xf32> to vector<128x8xf32>
    %163 = arith.mulf %162, %137 : vector<128x8xf32>
    %cst_108 = arith.constant dense<0.000000e+00> : vector<16x8xf32>
    %164 = tpu.matmul %2, %163, %cst_108 {dimension_numbers = #tpu.dot_dimension_numbers<[0], [0], [1], [1], [0, 1, 1, 1], [], []>} : vector<128x16xf32>, vector<128x8xf32>, vector<16x8xf32> -> vector<16x8xf32>
    %165 = vector.broadcast %155 : vector<128x1xf32> to vector<128x2xf32>
    %166 = arith.mulf %165, %14 : vector<128x2xf32>
    %cst_109 = arith.constant dense<0.000000e+00> : vector<16x2xf32>
    %167 = tpu.matmul %2, %166, %cst_109 {dimension_numbers = #tpu.dot_dimension_numbers<[0], [0], [1], [1], [0, 1, 1, 1], [], []>} : vector<128x16xf32>, vector<128x2xf32>, vector<16x2xf32> -> vector<16x2xf32>
    %c0_110 = arith.constant 0 : index
    %c0_111 = arith.constant 0 : index
    %168 = vector.load %arg12[%c0_110, %c0_111] : memref<8x8xf32, #tpu.memory_space<vmem>>, vector<8x8xf32>
    %cst_112 = arith.constant dense<0.000000e+00> : vector<16x8xf32>
    %169 = tpu.matmul %158, %168, %cst_112 {dimension_numbers = #tpu.dot_dimension_numbers<[1], [0], [0], [1], [0, 0, 1, 1], [], []>} : vector<16x8xf32>, vector<8x8xf32>, vector<16x8xf32> -> vector<16x8xf32>
    %c0_113 = arith.constant 0 : index
    %c0_114 = arith.constant 0 : index
    %170 = vector.load %arg13[%c0_113, %c0_114] : memref<2x8xf32, #tpu.memory_space<vmem>>, vector<2x8xf32>
    %cst_115 = arith.constant dense<0.000000e+00> : vector<16x8xf32>
    %171 = tpu.matmul %161, %170, %cst_115 {dimension_numbers = #tpu.dot_dimension_numbers<[1], [0], [0], [1], [0, 0, 1, 1], [], []>} : vector<16x2xf32>, vector<2x8xf32>, vector<16x8xf32> -> vector<16x8xf32>
    %172 = arith.addf %169, %171 : vector<16x8xf32>
    %c0_116 = arith.constant 0 : index
    %c0_117 = arith.constant 0 : index
    %173 = vector.load %arg14[%c0_116, %c0_117] : memref<8x8xf32, #tpu.memory_space<vmem>>, vector<8x8xf32>
    %cst_118 = arith.constant dense<0.000000e+00> : vector<16x8xf32>
    %174 = tpu.matmul %164, %173, %cst_118 {dimension_numbers = #tpu.dot_dimension_numbers<[1], [0], [0], [1], [0, 0, 1, 1], [], []>} : vector<16x8xf32>, vector<8x8xf32>, vector<16x8xf32> -> vector<16x8xf32>
    %175 = arith.addf %172, %174 : vector<16x8xf32>
    %c0_119 = arith.constant 0 : index
    %c0_120 = arith.constant 0 : index
    %176 = vector.load %arg15[%c0_119, %c0_120] : memref<2x8xf32, #tpu.memory_space<vmem>>, vector<2x8xf32>
    %cst_121 = arith.constant dense<0.000000e+00> : vector<16x8xf32>
    %177 = tpu.matmul %167, %176, %cst_121 {dimension_numbers = #tpu.dot_dimension_numbers<[1], [0], [0], [1], [0, 0, 1, 1], [], []>} : vector<16x2xf32>, vector<2x8xf32>, vector<16x8xf32> -> vector<16x8xf32>
    %178 = arith.addf %175, %177 : vector<16x8xf32>
    %c0_122 = arith.constant 0 : index
    %c0_123 = arith.constant 0 : index
    %179 = vector.load %arg16[%c0_122, %c0_123] : memref<8x8xf32, #tpu.memory_space<vmem>>, vector<8x8xf32>
    %cst_124 = arith.constant dense<0.000000e+00> : vector<16x8xf32>
    %180 = tpu.matmul %135, %179, %cst_124 {dimension_numbers = #tpu.dot_dimension_numbers<[1], [0], [0], [1], [0, 0, 1, 1], [], []>} : vector<16x8xf32>, vector<8x8xf32>, vector<16x8xf32> -> vector<16x8xf32>
    %181 = arith.addf %178, %180 : vector<16x8xf32>
    %182 = arith.addf %181, %27 : vector<16x8xf32>
    %183 = math.tanh %182 : vector<16x8xf32>
    %c0_125 = arith.constant 0 : index
    %c0_126 = arith.constant 0 : index
    %184 = vector.load %arg19[%c0_125, %c0_126] : memref<8x8xf32, #tpu.memory_space<vmem>>, vector<8x8xf32>
    %cst_127 = arith.constant dense<0.000000e+00> : vector<16x8xf32>
    %185 = tpu.matmul %183, %184, %cst_127 {dimension_numbers = #tpu.dot_dimension_numbers<[1], [0], [0], [1], [0, 0, 1, 1], [], []>} : vector<16x8xf32>, vector<8x8xf32>, vector<16x8xf32> -> vector<16x8xf32>
    %c0_128 = arith.constant 0 : index
    %c0_129 = arith.constant 0 : index
    %186 = vector.load %arg20[%c0_128, %c0_129] : memref<1x8xf32, #tpu.memory_space<vmem>>, vector<1x8xf32>
    %187 = vector.broadcast %186 : vector<1x8xf32> to vector<16x8xf32>
    %188 = arith.addf %185, %187 : vector<16x8xf32>
    %189 = math.tanh %188 : vector<16x8xf32>
    %cst_130 = arith.constant dense<0.000000e+00> : vector<128x8xf32>
    %190 = tpu.matmul %2, %189, %cst_130 {dimension_numbers = #tpu.dot_dimension_numbers<[1], [0], [0], [1], [0, 0, 1, 1], [], []>} : vector<128x16xf32>, vector<16x8xf32>, vector<128x8xf32> -> vector<128x8xf32>
    %cst_131 = arith.constant dense<0.000000e+00> : vector<128x8xf32>
    %191 = tpu.matmul %4, %189, %cst_131 {dimension_numbers = #tpu.dot_dimension_numbers<[1], [0], [0], [1], [0, 0, 1, 1], [], []>} : vector<128x16xf32>, vector<16x8xf32>, vector<128x8xf32> -> vector<128x8xf32>
    %c0_132 = arith.constant 0 : index
    %c0_133 = arith.constant 0 : index
    %192 = vector.load %arg5[%c0_132, %c0_133] : memref<8x8xf32, #tpu.memory_space<vmem>>, vector<8x8xf32>
    %cst_134 = arith.constant dense<0.000000e+00> : vector<128x8xf32>
    %193 = tpu.matmul %191, %192, %cst_134 {dimension_numbers = #tpu.dot_dimension_numbers<[1], [0], [0], [1], [0, 0, 1, 1], [], []>} : vector<128x8xf32>, vector<8x8xf32>, vector<128x8xf32> -> vector<128x8xf32>
    %c0_135 = arith.constant 0 : index
    %c0_136 = arith.constant 0 : index
    %194 = vector.load %arg7[%c0_135, %c0_136] : memref<8x8xf32, #tpu.memory_space<vmem>>, vector<8x8xf32>
    %cst_137 = arith.constant dense<0.000000e+00> : vector<128x8xf32>
    %195 = tpu.matmul %190, %194, %cst_137 {dimension_numbers = #tpu.dot_dimension_numbers<[1], [0], [0], [1], [0, 0, 1, 1], [], []>} : vector<128x8xf32>, vector<8x8xf32>, vector<128x8xf32> -> vector<128x8xf32>
    %196 = arith.addf %193, %195 : vector<128x8xf32>
    %197 = arith.addf %196, %22 : vector<128x8xf32>
    %198 = math.tanh %197 : vector<128x8xf32>
    %cst_138 = arith.constant dense<0.000000e+00> : vector<1x128xf32>
    %199 = tpu.matmul %5, %198, %cst_138 {dimension_numbers = #tpu.dot_dimension_numbers<[1], [1], [0], [0], [0, 0, 1, 0], [], []>} : vector<1x8xf32>, vector<128x8xf32>, vector<1x128xf32> -> vector<1x128xf32>
    %200 = vector.broadcast %6 : vector<1x1xf32> to vector<1x128xf32>
    %201 = arith.addf %199, %200 : vector<1x128xf32>
    %202 = arith.negf %201 : vector<1x128xf32>
    %203 = math.exp %202 : vector<1x128xf32>
    %cst_139 = arith.constant 1.000000e+00 : f32
    %204 = vector.broadcast %cst_139 : f32 to vector<1x128xf32>
    %205 = arith.addf %204, %203 : vector<1x128xf32>
    %206 = arith.divf %204, %205 : vector<1x128xf32>
    %c0_140 = arith.constant 0 : index
    %c0_141 = arith.constant 0 : index
    %207 = vector.load %arg21[%c0_140, %c0_141] : memref<1x128xf32, #tpu.memory_space<vmem>>, vector<1x128xf32>
    tpu.vector_store %arg21[%c0_140, %c0_141], %206 {strides = array<i32>} : memref<1x128xf32, #tpu.memory_space<vmem>>, vector<1x128xf32>,
    return
  }
}

</mosaic_0001>

<bundles_post_ra>
// kernel: tpu_custom_call.1
= control target key start
LH: loop header
LB: loop body
LE: loop exit
PB: predicated region body
PF: predicated region fallthrough
CT: control target
= control target key end

     0   :  { %s12848_s0 = inlined_call_operand.vmem [shape: f32[16,2], index: 0, kind: input, shape index: {}]   ;;  %s12849_s1 = inlined_call_operand.vmem [shape: bf16[128,16], index: 1, kind: input, shape index: {}]   ;;  %s12850_s2 = inlined_call_operand.vmem [shape: bf16[128,16], index: 2, kind: input, shape index: {}]   ;;  %s12851_s3 = inlined_call_operand.vmem [shape: f32[2,8], index: 3, kind: input, shape index: {}]   ;;  %s12852_s4 = inlined_call_operand.vmem [shape: f32[1,8], index: 4, kind: input, shape index: {}]   ;;  %s12853_s5 = inlined_call_operand.vmem [shape: f32[8,8], index: 5, kind: input, shape index: {}]   ;;  %s12854_s6 = inlined_call_operand.vmem [shape: f32[2,8], index: 6, kind: input, shape index: {}]   ;;  %s12855_s7 = inlined_call_operand.vmem [shape: f32[8,8], index: 7, kind: input, shape index: {}]   ;;  %s12856_s8 = inlined_call_operand.vmem [shape: f32[2,8], index: 8, kind: input, shape index: {}]   ;;  %s12857_s9 = inlined_call_operand.vmem [shape: f32[1,8], index: 9, kind: input, shape index: {}]   ;;  %s12858_s10 = inlined_call_operand.vmem [shape: f32[1,8], index: 10, kind: input, shape index: {}]   ;;  %s12859_s11 = inlined_call_operand.<no memory space> [shape: f32[1,1], index: 11, kind: input, shape index: {}]   ;;  %s12860_s12 = inlined_call_operand.vmem [shape: f32[8,8], index: 12, kind: input, shape index: {}]   ;;  %s12861_s13 = inlined_call_operand.vmem [shape: f32[2,8], index: 13, kind: input, shape index: {}]   ;;  %s12862_s14 = inlined_call_operand.vmem [shape: f32[8,8], index: 14, kind: input, shape index: {}]   ;;  %s12863_s15 = inlined_call_operand.vmem [shape: f32[2,8], index: 15, kind: input, shape index: {}]   ;;  %s12864_s16 = inlined_call_operand.vmem [shape: f32[8,8], index: 16, kind: input, shape index: {}]   ;;  %s12865_s17 = inlined_call_operand.vmem [shape: f32[2,8], index: 17, kind: input, shape index: {}]   ;;  %s12866_s18 = inlined_call_operand.vmem [shape: f32[1,8], index: 18, kind: input, shape index: {}]   ;;  %s12867_s19 = inlined_call_operand.vmem [shape: f32[8,8], index: 19, kind: input, shape index: {}]   ;;  %s12868_s20 = inlined_call_operand.vmem [shape: f32[1,8], index: 20, kind: input, shape index: {}]   ;;  %s12869_s21 = inlined_call_operand.hbm [shape: f32[1,128], index: 21, kind: output, shape index: {}]  }
   0x1   :  { %13083 = sst [smem:[#allocation121_spill]] %s12848_s0  ;;  %v26_v0 = vstv %s12859_s11 }
   0x2   :  { %13084 = sst [smem:[#allocation122_spill]] %s12849_s1  ;;  %27 = vst [vmem:[#allocation2] sm:$0x1] %v26_v0 }
   0x3   :  { %13085 = sst [smem:[#allocation123_spill]] %s12850_s2 }
   0x4   :  { %13086 = sst [smem:[#allocation124_spill]] %s12851_s3 }
   0x5   :  { %13087 = sst [smem:[#allocation125_spill]] %s12852_s4 }
   0x6   :  { %13088 = sst [smem:[#allocation126_spill]] %s12853_s5 }
   0x7   :  { %s13089_s3 = sld [smem:[#allocation124_spill]]  ;;  %vm154_vm0 = vcmask 1041408   ;;  %s13090_s0 = sld [smem:[#allocation121_spill]]  ;;  %vm147_vm1 = vcmask 15360   ;;  %vm235_vm2 = vcmask 130048  }
   0x8   :  { %s13091_s22 = sld [smem:[#allocation122_spill]]  ;;  %s13094_s25 = sld [smem:[#allocation123_spill]]  ;;  %v1039_v16 = vld [vmem:[%s12865_s17] sm:$0x3] }
   0xd   :  { %v139_v1 = vld [vmem:[%s13089_s3] sm:$0x3]  ;;  %v10912_v3 = vld [vmem:[%s13090_s0 + $0x8] sm:$0xff] }
   0xe   :  { %v10907_v2 = vld [vmem:[%s13090_s0] sm:$0xff]  ;;  %8719 = vmatprep.subr.msk.mxu0 %vm154_vm0, %v139_v1  ;;  %v8062_v6 = vld [vmem:[%s13091_s22 + $0x8] sm:$0xff]   ;;  %v8063_v12 = vld [vmem:[%s13091_s22 + $0x10] sm:$0xff]  }
   0xf   :  { %8721 = vmatprep.mubr.msk.f32.mxu0 %vm147_vm1, %v10907_v2  ;;  %v9814_v4 = vpack.c.bf16 %v10912_v3, %v10907_v2  ;;  %v7999_v5 = vld [vmem:[%s13091_s22] sm:$0xff]   ;;  %8720 = vmatpush3.msk.msra.mxu0 %vm154_vm0, %v139_v1  ;;  %v10937_v10 = vunpack.c.l.bf16 %v8062_v6  ;;  %v8069_v11 = vld [vmem:[%s13094_s25 + $0x8] sm:$0xff]  }
  0x10   :  { %v10926_v7 = vunpack.c.l.bf16 %v7999_v5  ;;  %8722 = vmatmul.mubr.msk.f32.vlgmr.msra.gmra.mrb[0].mxu0 %vm147_vm1, %v10912_v3  ;;  %v10930_v8 = vunpack.c.h.bf16 %v7999_v5  ;;  %v8031_v9 = vld [vmem:[%s13094_s25] sm:$0xff]   ;;  %v10949_v15 = vunpack.c.l.bf16 %v8069_v11 }
  0x11   :  { %9815 = vmatprep.subr.bf16.mxu1 %v9814_v4  ;;  %13095 = vst [vmem:[#allocation8_spill] sm:$0xff] %v10937_v10  ;;  %9819 = vmatprep.subr.bf16.mxu0 %v9814_v4  ;;  %v10945_v13 = vunpack.c.l.bf16 %v8031_v9  ;;  %v10947_v14 = vunpack.c.h.bf16 %v8031_v9 }
  0x12   :  { %13092 = vst [vmem:[#allocation6_spill] sm:$0xff] %v10926_v7  ;;  %13093 = vst [vmem:[#allocation7_spill] sm:$0xff] %v10930_v8  ;;  %9817 = vmatpush3.bf16.msra.mxu1 %v9814_v4  ;;  %8728 = vmatprep.mubr.msk.f32.mxu1 %vm235_vm2, %v10926_v7 }
  0x13   :  { %10270 = vmatprep.subr.bf16.mxu1 %v9814_v4  ;;  %9821 = vmatpush3.bf16.msra.mxu0 %v9814_v4  ;;  %13096 = vst [vmem:[#allocation9_spill] sm:$0xff] %v10945_v13  ;;  %13097 = vst [vmem:[#allocation10_spill] sm:$0xff] %v10947_v14 }
  0x14   :  { %13098 = vst [vmem:[#allocation11_spill] sm:$0xff] %v10949_v15 }
  0x15   :  { %28 = vsyncpa [#allocation4], 0  ;;  %8729 = vmatmul.mubr.msk.f32.vlgmr.msra.gmra.mrb[0].mxu1 %vm235_vm2, %v10930_v8  ;;  %v10956_v17 = vunpack.c.h.bf16 %v8062_v6  ;;  %v8070_v18 = vld [vmem:[%s13094_s25 + $0x10] sm:$0xff]   ;;  %8832 = vmatprep.subr.msk.mxu0 %vm154_vm0, %v1039_v16  ;;  %v10964_v19 = vunpack.c.l.bf16 %v8063_v12  ;;  %v8064_v20 = vld [vmem:[%s13091_s22 + $0x18] sm:$0xff]   ;;  %v10973_v21 = vunpack.c.h.bf16 %v8069_v11  ;;  %v10982_v23 = vunpack.c.h.bf16 %v8063_v12  ;;  %s13125_s3 = sld [smem:[#allocation125_spill]]  ;;  %s13162_s0 = sld [smem:[#allocation126_spill]] }
  0x16   :  { %8731 = vmatprep.mubr.msk.f32.mxu1 %vm235_vm2, %v10937_v10  ;;  %8756 = vmatprep.mubr.msk.f32.mxu0 %vm235_vm2, %v10945_v13  ;;  %v10977_v22 = vunpack.c.l.bf16 %v8070_v18  ;;  %v8071_v24 = vld [vmem:[%s13094_s25 + $0x18] sm:$0xff]   ;;  %v10989_v25 = vunpack.c.l.bf16 %v8064_v20  ;;  %v8065_v26 = vld [vmem:[%s13091_s22 + $0x20] sm:$0xff]   ;;  %v10996_v27 = vunpack.c.h.bf16 %v8070_v18  ;;  %v11004_v29 = vunpack.c.h.bf16 %v8064_v20  ;;  %v8066_v32 = vld [vmem:[%s13091_s22 + $0x28] sm:$0xff]   ;;  %s10787_s27 = smov [#allocation3]  }
  0x17   :  { %13099 = vst [vmem:[#allocation12_spill] sm:$0xff] %v10956_v17  ;;  %13100 = vst [vmem:[#allocation13_spill] sm:$0xff] %v10964_v19  ;;  %8757 = vmatmul.mubr.msk.f32.vlgmr.msra.gmra.mrb[2].mxu0 %vm235_vm2, %v10947_v14  ;;  %10271 = vmatpush3.bf16.msra.mxu1 %v9814_v4  ;;  %v11000_v28 = vunpack.c.l.bf16 %v8071_v24  ;;  %v8072_v30 = vld [vmem:[%s13094_s25 + $0x20] sm:$0xff]   ;;  %v11011_v31 = vunpack.c.l.bf16 %v8065_v26  ;;  %v11018_v33 = vunpack.c.h.bf16 %v8071_v24  ;;  %v11026_v35 = vunpack.c.h.bf16 %v8065_v26  ;;  %v8073_v36 = vld [vmem:[%s13094_s25 + $0x28] sm:$0xff]  }
  0x18   :  { %13101 = vst [vmem:[#allocation14_spill] sm:$0xff] %v10973_v21  ;;  %8759 = vmatprep.mubr.msk.f32.mxu0 %vm235_vm2, %v10949_v15  ;;  %13102 = vst [vmem:[#allocation15_spill] sm:$0xff] %v10977_v22  ;;  %8833 = vmatpush3.msk.msra.mxu0 %vm154_vm0, %v1039_v16  ;;  %v11022_v34 = vunpack.c.l.bf16 %v8072_v30  ;;  %v11033_v37 = vunpack.c.l.bf16 %v8066_v32  ;;  %v8067_v38 = vld [vmem:[%s13091_s22 + $0x30] sm:$0xff]   ;;  %v11040_v39 = vunpack.c.h.bf16 %v8072_v30  ;;  %v11044_v40 = vunpack.c.l.bf16 %v8073_v36  ;;  %v8068_v43 = vld [vmem:[%s13091_s22 + $0x38] sm:$0xff]  }
  0x19   :  { %8732 = vmatmul.mubr.msk.f32.gmra.mrb[2].mxu1 %vm235_vm2, %v10956_v17  ;;  %13103 = vst [vmem:[#allocation16_spill] sm:$0xff] %v10982_v23  ;;  %13104 = vst [vmem:[#allocation17_spill] sm:$0xff] %v10989_v25  ;;  %v11048_v41 = vunpack.c.h.bf16 %v8066_v32  ;;  %v11052_v42 = vunpack.c.l.bf16 %v8067_v38  ;;  %v11059_v44 = vunpack.c.h.bf16 %v8073_v36  ;;  %v11065_v45 = vunpack.c.h.bf16 %v8067_v38  ;;  %v8074_v47 = vld [vmem:[%s13094_s25 + $0x30] sm:$0xff]   ;;  %v8075_v50 = vld [vmem:[%s13094_s25 + $0x38] sm:$0xff]  }
  0x1a   :  { %8734 = vmatprep.mubr.msk.f32.mxu1 %vm235_vm2, %v10964_v19  ;;  %13105 = vst [vmem:[#allocation18_spill] sm:$0xff] %v10996_v27  ;;  %13106 = vst [vmem:[#allocation19_spill] sm:$0xff] %v11000_v28  ;;  %v11069_v46 = vunpack.c.l.bf16 %v8068_v43  ;;  %v11080_v48 = vunpack.c.h.bf16 %v8068_v43  ;;  %v11084_v49 = vunpack.c.l.bf16 %v8074_v47  ;;  %v11095_v51 = vunpack.c.h.bf16 %v8074_v47  ;;  %v623_v54 = vld [vmem:[%s12856_s8] sm:$0x3] }
  0x1b   :  { %8760 = vmatmul.mubr.msk.f32.gmra.mrb[4].mxu0 %vm235_vm2, %v10973_v21  ;;  %13107 = vst [vmem:[#allocation20_spill] sm:$0xff] %v11004_v29  ;;  %13108 = vst [vmem:[#allocation21_spill] sm:$0xff] %v11011_v31  ;;  %v11099_v52 = vunpack.c.l.bf16 %v8075_v50  ;;  %v11103_v53 = vunpack.c.h.bf16 %v8075_v50  ;;  %v622_v55 = vld [vmem:[%s12854_s6] sm:$0x3]  ;;  %8780 = vmatprep.subr.msk.mxu1 %vm154_vm0, %v623_v54  ;;  %vm1417_vm3 = vcmask 64512   ;;  %vm10785_vm4 = vmmov 0  }
  0x1c   :  { %8762 = vmatprep.mubr.msk.f32.mxu0 %vm235_vm2, %v10977_v22  ;;  %13109 = vst [vmem:[#allocation22_spill] sm:$0xff] %v11018_v33  ;;  %13110 = vst [vmem:[#allocation23_spill] sm:$0xff] %v11022_v34  ;;  %v7558_v56 = vld [vmem:[%s13125_s3] ss:$0 sm:$0xff]  ;;  %s7550_s3 = sshll.u32 %s10787_s27, 4  ;;  %s7551_s3 = int_to_ptr.vmem [resolvable:$true] %s7550_s3 }
  0x1d   :  { %8735 = vmatmul.mubr.msk.f32.gmra.mrb[4].mxu1 %vm235_vm2, %v10982_v23  ;;  %13111 = vst [vmem:[#allocation24_spill] sm:$0xff] %v11026_v35  ;;  %13112 = vst [vmem:[#allocation25_spill] sm:$0xff] %v11033_v37  ;;  %v11132_v0 = vld [vmem:[%s12855_s7] sm:$0xff]  ;;  %s10763_s6 = scalar_lea.vmem %s7551_s3, 32  ;;  %p10764_p1 = scmp.lt.s32.totalorder %s7551_s3, %s7551_s3 }
  0x1e   :  { %8737 = vmatprep.mubr.msk.f32.mxu1 %vm235_vm2, %v10989_v25  ;;  %13113 = vst [vmem:[#allocation26_spill] sm:$0xff] %v11040_v39  ;;  %13114 = vst [vmem:[#allocation27_spill] sm:$0xff] %v11044_v40 }
  0x1f   :  { %8763 = vmatmul.mubr.msk.f32.gmra.mrb[6].mxu0 %vm235_vm2, %v10996_v27  ;;  %13115 = vst [vmem:[#allocation28_spill] sm:$0xff] %v11048_v41  ;;  %13116 = vst [vmem:[#allocation29_spill] sm:$0xff] %v11052_v42 }
  0x20   :  { %8765 = vmatprep.mubr.msk.f32.mxu0 %vm235_vm2, %v11000_v28  ;;  %13117 = vst [vmem:[#allocation30_spill] sm:$0xff] %v11059_v44  ;;  %13118 = vst [vmem:[#allocation31_spill] sm:$0xff] %v11065_v45 }
  0x21   :  { %8738 = vmatmul.mubr.msk.f32.gmra.mrb[6].mxu1 %vm235_vm2, %v11004_v29  ;;  %13119 = vst [vmem:[#allocation32_spill] sm:$0xff] %v11069_v46  ;;  %13120 = vst [vmem:[#allocation33_spill] sm:$0xff] %v11080_v48 }
  0x22   :  { %8740 = vmatprep.mubr.msk.f32.mxu1 %vm235_vm2, %v11011_v31  ;;  %13121 = vst [vmem:[#allocation34_spill] sm:$0xff] %v11084_v49  ;;  %13122 = vst [vmem:[#allocation35_spill] sm:$0xff] %v11095_v51 }
  0x23   :  { %8766 = vmatmul.mubr.msk.f32.gmra.mrb[8].mxu0 %vm235_vm2, %v11018_v33  ;;  %13123 = vst [vmem:[#allocation36_spill] sm:$0xff] %v11099_v52  ;;  %13124 = vst [vmem:[#allocation37_spill] sm:$0xff] %v11103_v53 }
  0x24   :  { %8768 = vmatprep.mubr.msk.f32.mxu0 %vm235_vm2, %v11022_v34  ;;  %vm12795_vm5 = vmpackc.low %vm1417_vm3, %vm1417_vm3 }
  0x25   :  { %8741 = vmatmul.mubr.msk.f32.gmra.mrb[8].mxu1 %vm235_vm2, %v11026_v35 }
  0x26   :  { %8743 = vmatprep.mubr.msk.f32.mxu1 %vm235_vm2, %v11033_v37 }
  0x27   :  { %8769 = vmatmul.mubr.msk.f32.gmra.mrb[10].mxu0 %vm235_vm2, %v11040_v39 }
  0x28   :  { %8771 = vmatprep.mubr.msk.f32.mxu0 %vm235_vm2, %v11044_v40 }
  0x29   :  { %8744 = vmatmul.mubr.msk.f32.gmra.mrb[10].mxu1 %vm235_vm2, %v11048_v41 }
  0x2a   :  { %8746 = vmatprep.mubr.msk.f32.mxu1 %vm235_vm2, %v11052_v42 }
  0x2b   :  { %8772 = vmatmul.mubr.msk.f32.gmra.mrb[12].mxu0 %vm235_vm2, %v11059_v44 }
  0x2c   :  { %8834 = vmatprep.mubr.msk.f32.mxu0 %vm147_vm1, %v10907_v2 }
  0x2d   :  { %8747 = vmatmul.mubr.msk.f32.gmra.mrb[12].mxu1 %vm235_vm2, %v11065_v45 }
  0x2e   :  { %8749 = vmatprep.mubr.msk.f32.mxu1 %vm235_vm2, %v11069_v46 }
  0x2f   :  { %8835 = vmatmul.mubr.msk.f32.vlgmr.msra.gmra.mrb[14].mxu0 %vm147_vm1, %v10912_v3 }
  0x30   :  { %8841 = vmatprep.mubr.msk.f32.mxu0 %vm235_vm2, %v10926_v7 }
  0x31   :  { %8750 = vmatmul.mubr.msk.f32.gmra.mrb[14].mxu1 %vm235_vm2, %v11080_v48 }
  0x32   :  { %8774 = vmatprep.mubr.msk.f32.mxu1 %vm235_vm2, %v11084_v49 }
  0x35   :  { %8775 = vmatmul.mubr.msk.f32.vlgmr.msra.gmra.mrb[16].mxu1 %vm235_vm2, %v11095_v51 }
  0x36   :  { %8777 = vmatprep.mubr.msk.f32.mxu1 %vm235_vm2, %v11099_v52  ;;  %8781 = vmatpush3.msk.msra.mxu1 %vm154_vm0, %v623_v54 }
  0x37   :  { %8806 = vmatprep.subr.msk.mxu1 %vm154_vm0, %v622_v55 }
  0x39   :  { %8778 = vmatmul.mubr.msk.f32.gmra.mrb[18].mxu1 %vm235_vm2, %v11103_v53 }
  0xe3   :  { %v8723_v57 = vpop.f32.mrb[0].mxu0 }
  0xe4   :  { %v230_v58 = vadd.f32 %v8723_v57, %v7558_v56  ;;  %v224_v59 = vpop.f32.mrb[1].mxu0 }
  0xe5   :  { %v225_v60 = vadd.f32 %v7558_v56, %v224_v59 }
  0xe6   :  { %10383 = vtanh.f32 %v230_v58 }
  0xe7   :  { %10385 = vtanh.f32 %v225_v60 }
  0xe8   :  { %v11121_v61 = vpop.f32.mrb[0].mxu1 }
  0xe9   :  { %13126 = vst [vmem:[#allocation38_spill] sm:$0xff] %v11121_v61  ;;  %v11123_v62 = vpop.f32.mrb[1].mxu1 }
  0xea   :  { %13127 = vst [vmem:[#allocation39_spill] sm:$0xff] %v11123_v62  ;;  %8782 = vmatprep.mubr.msk.f32.mxu1 %vm147_vm1, %v11123_v62  ;;  %v11127_v63 = vpop.f32.mrb[2].mxu0 }
  0xeb   :  { %13128 = vst [vmem:[#allocation40_spill] sm:$0xff] %v11127_v63  ;;  %8783 = vmatmul.mubr.msk.f32.vlgmr.msra.gmra.mrb[20].mxu1 %vm147_vm1, %v11121_v61  ;;  %v11136_v1 = vpop.f32.mrb[3].mxu0 }
  0xec   :  { %13129 = vst [vmem:[#allocation41_spill] sm:$0xff] %v11136_v1  ;;  %v11138_v2 = vpop.f32.mrb[2].mxu1  ;;  %8807 = vmatpush3.msk.msra.mxu1 %vm154_vm0, %v622_v55 }
  0xed   :  { %13130 = vst [vmem:[#allocation42_spill] sm:$0xff] %v11138_v2  ;;  %v11141_v3 = vpop.f32.mrb[3].mxu1  ;;  %8893 = vmatprep.subr.mxu1 %v11132_v0 }
  0xee   :  { %13131 = vst [vmem:[#allocation43_spill] sm:$0xff] %v11141_v3  ;;  %8785 = vmatprep.mubr.msk.f32.mxu1 %vm147_vm1, %v11141_v3  ;;  %v11146_v4 = vpop.f32.mrb[4].mxu0 }
  0xef   :  { %13132 = vst [vmem:[#allocation44_spill] sm:$0xff] %v11146_v4  ;;  %8786 = vmatmul.mubr.msk.f32.gmra.mrb[22].mxu1 %vm147_vm1, %v11138_v2  ;;  %v11150_v5 = vpop.f32.mrb[5].mxu0 }
  0xf0   :  { %13133 = vst [vmem:[#allocation45_spill] sm:$0xff] %v11150_v5  ;;  %v11152_v6 = vpop.f32.mrb[4].mxu1  ;;  %v11154_v9 = vpop.eup %10383 }
  0xf1   :  { %13134 = vst [vmem:[#allocation46_spill] sm:$0xff] %v11152_v6  ;;  %13135 = vst [vmem:[#allocation47_spill] sm:$0xff] %v11154_v9  ;;  %v11156_v11 = vpop.f32.mrb[5].mxu1  ;;  %v11158_v12 = vpop.eup %10385 }
  0xf2   :  { %13136 = vst [vmem:[#allocation48_spill] sm:$0xff] %v11156_v11  ;;  %13137 = vst [vmem:[#allocation49_spill] sm:$0xff] %v11158_v12  ;;  %8788 = vmatprep.mubr.msk.f32.mxu1 %vm147_vm1, %v11156_v11  ;;  %v11162_v16 = vpop.f32.mrb[6].mxu0  ;;  %v9822_v18 = vpack.c.bf16 %v11154_v9, %v11158_v12 }
  0xf3   :  { %13138 = vst [vmem:[#allocation50_spill] sm:$0xff] %v11162_v16  ;;  %8789 = vmatmul.mubr.msk.f32.gmra.mrb[24].mxu1 %vm147_vm1, %v11152_v6  ;;  %v11168_v20 = vpop.f32.mrb[7].mxu0 }
  0xf4   :  { %13139 = vst [vmem:[#allocation51_spill] sm:$0xff] %v11168_v20  ;;  %v11170_v24 = vpop.f32.mrb[6].mxu1  ;;  %9823 = vmatprep.subr.bf16.mxu0 %v9822_v18 }
  0xf5   :  { %13140 = vst [vmem:[#allocation52_spill] sm:$0xff] %v11170_v24  ;;  %v11172_v26 = vpop.f32.mrb[7].mxu1  ;;  %9825 = vmatpush3.bf16.msra.mxu0 %v9822_v18 }
  0xf6   :  { %13141 = vst [vmem:[#allocation53_spill] sm:$0xff] %v11172_v26  ;;  %8791 = vmatprep.mubr.msk.f32.mxu1 %vm147_vm1, %v11172_v26  ;;  %v11176_v30 = vpop.f32.mrb[8].mxu0  ;;  %9827 = vmatprep.subr.bf16.mxu0 %v9822_v18 }
  0xf7   :  { %13142 = vst [vmem:[#allocation54_spill] sm:$0xff] %v11176_v30  ;;  %8792 = vmatmul.mubr.msk.f32.gmra.mrb[26].mxu1 %vm147_vm1, %v11170_v24  ;;  %v11180_v32 = vpop.f32.mrb[9].mxu0 }
  0xf8   :  { %13143 = vst [vmem:[#allocation55_spill] sm:$0xff] %v11180_v32  ;;  %v11182_v36 = vpop.f32.mrb[8].mxu1  ;;  %8842 = vmatmul.mubr.msk.f32.vlgmr.msra.gmra.mrb[16].mxu0 %vm235_vm2, %v10930_v8 }
  0xf9   :  { %13144 = vst [vmem:[#allocation56_spill] sm:$0xff] %v11182_v36  ;;  %v11186_v38 = vpop.f32.mrb[9].mxu1  ;;  %9829 = vmatpush3.bf16.msra.mxu0 %v9822_v18  ;;  %8844 = vmatprep.mubr.msk.f32.mxu0 %vm235_vm2, %v10937_v10 }
  0xfa   :  { %13145 = vst [vmem:[#allocation57_spill] sm:$0xff] %v11186_v38  ;;  %v11190_v43 = vpop.f32.mrb[10].mxu0  ;;  %8794 = vmatprep.mubr.msk.f32.mxu1 %vm147_vm1, %v11186_v38 }
  0xfb   :  { %13146 = vst [vmem:[#allocation58_spill] sm:$0xff] %v11190_v43  ;;  %v11194_v47 = vpop.f32.mrb[11].mxu0  ;;  %8795 = vmatmul.mubr.msk.f32.gmra.mrb[28].mxu1 %vm147_vm1, %v11182_v36 }
  0xfc   :  { %13147 = vst [vmem:[#allocation59_spill] sm:$0xff] %v11194_v47  ;;  %v11198_v50 = vpop.f32.mrb[10].mxu1  ;;  %8845 = vmatmul.mubr.msk.f32.gmra.mrb[18].mxu0 %vm235_vm2, %v10956_v17 }
  0xfd   :  { %13148 = vst [vmem:[#allocation60_spill] sm:$0xff] %v11198_v50  ;;  %v11202_v54 = vpop.f32.mrb[11].mxu1  ;;  %8847 = vmatprep.mubr.msk.f32.mxu0 %vm235_vm2, %v10964_v19 }
  0xfe   :  { %13149 = vst [vmem:[#allocation61_spill] sm:$0xff] %v11202_v54  ;;  %8797 = vmatprep.mubr.msk.f32.mxu1 %vm147_vm1, %v11202_v54  ;;  %v11208_v55 = vpop.f32.mrb[12].mxu0 }
  0xff   :  { %13150 = vst [vmem:[#allocation62_spill] sm:$0xff] %v11208_v55  ;;  %v11210_v56 = vpop.f32.mrb[13].mxu0  ;;  %8798 = vmatmul.mubr.msk.f32.gmra.mrb[30].mxu1 %vm147_vm1, %v11198_v50 }
 0x100   :  { %13151 = vst [vmem:[#allocation63_spill] sm:$0xff] %v11210_v56  ;;  %v11214_v57 = vpop.f32.mrb[12].mxu1  ;;  %8848 = vmatmul.mubr.msk.f32.gmra.mrb[20].mxu0 %vm235_vm2, %v10982_v23 }
 0x101   :  { %13152 = vst [vmem:[#allocation64_spill] sm:$0xff] %v11214_v57  ;;  %v11218_v58 = vpop.f32.mrb[13].mxu1  ;;  %8850 = vmatprep.mubr.msk.f32.mxu0 %vm235_vm2, %v10989_v25 }
 0x102   :  { %13153 = vst [vmem:[#allocation65_spill] sm:$0xff] %v11218_v58  ;;  %8800 = vmatprep.mubr.msk.f32.mxu1 %vm147_vm1, %v11218_v58  ;;  %v11224_v59 = vpop.f32.mrb[14].mxu0 }
 0x103   :  { %13154 = vst [vmem:[#allocation66_spill] sm:$0xff] %v11224_v59  ;;  %v11226_v60 = vpop.f32.mrb[15].mxu0  ;;  %8801 = vmatmul.mubr.msk.f32.gmra.mrb[32].mxu1 %vm147_vm1, %v11214_v57 }
 0x104   :  { %13155 = vst [vmem:[#allocation67_spill] sm:$0xff] %v11226_v60  ;;  %v11230_v18 = vpop.f32.mrb[14].mxu1  ;;  %8851 = vmatmul.mubr.msk.f32.gmra.mrb[22].mxu0 %vm235_vm2, %v11004_v29 }
 0x105   :  { %13156 = vst [vmem:[#allocation68_spill] sm:$0xff] %v11230_v18  ;;  %v11234_v9 = vpop.f32.mrb[15].mxu1  ;;  %8853 = vmatprep.mubr.msk.f32.mxu0 %vm235_vm2, %v11011_v31 }
 0x106   :  { %13157 = vst [vmem:[#allocation69_spill] sm:$0xff] %v11234_v9  ;;  %8803 = vmatprep.mubr.msk.f32.mxu1 %vm147_vm1, %v11234_v9 }
 0x107   :  { %8804 = vmatmul.mubr.msk.f32.gmra.mrb[34].mxu1 %vm147_vm1, %v11230_v18 }
 0x108   :  { %v11242_v60 = vpop.f32.mrb[16].mxu1  ;;  %8854 = vmatmul.mubr.msk.f32.gmra.mrb[24].mxu0 %vm235_vm2, %v11026_v35  ;;  %8808 = vmatprep.mubr.msk.f32.mxu1 %vm147_vm1, %v11136_v1 }
 0x109   :  { %13158 = vst [vmem:[#allocation70_spill] sm:$0xff] %v11242_v60  ;;  %v11248_v59 = vpop.f32.mrb[17].mxu1  ;;  %8856 = vmatprep.mubr.msk.f32.mxu0 %vm235_vm2, %v11033_v37 }
 0x10a   :  { %13159 = vst [vmem:[#allocation71_spill] sm:$0xff] %v11248_v59 }
 0x10b   :  { %8809 = vmatmul.mubr.msk.f32.vlgmr.msra.gmra.mrb[20].mxu1 %vm147_vm1, %v11127_v63 }
 0x10c   :  { %v11254_v12 = vpop.f32.mrb[18].mxu1  ;;  %8857 = vmatmul.mubr.msk.f32.gmra.mrb[26].mxu0 %vm235_vm2, %v11048_v41  ;;  %8811 = vmatprep.mubr.msk.f32.mxu1 %vm147_vm1, %v11150_v5 }
 0x10d   :  { %13160 = vst [vmem:[#allocation72_spill] sm:$0xff] %v11254_v12  ;;  %v11260_v9 = vpop.f32.mrb[19].mxu1  ;;  %8859 = vmatprep.mubr.msk.f32.mxu0 %vm235_vm2, %v11052_v42  ;;  %8894 = vmatpush3.msra.mxu1 %v11132_v0  ;;  %v1415_v0 = vld [vmem:[%s13162_s0] sm:$0xff] }
 0x10e   :  { %13161 = vst [vmem:[#allocation73_spill] sm:$0xff] %v11260_v9  ;;  %8919 = vmatprep.subr.mxu1 %v1415_v0 }
 0x10f   :  { %8812 = vmatmul.mubr.msk.f32.gmra.mrb[22].mxu1 %vm147_vm1, %v11146_v4 }
 0x110   :  { %8860 = vmatmul.mubr.msk.f32.gmra.mrb[28].mxu0 %vm235_vm2, %v11065_v45  ;;  %8814 = vmatprep.mubr.msk.f32.mxu1 %vm147_vm1, %v11168_v20 }
 0x111   :  { %8862 = vmatprep.mubr.msk.f32.mxu0 %vm235_vm2, %v11069_v46 }
 0x113   :  { %8815 = vmatmul.mubr.msk.f32.gmra.mrb[24].mxu1 %vm147_vm1, %v11162_v16 }
 0x114   :  { %8863 = vmatmul.mubr.msk.f32.gmra.mrb[30].mxu0 %vm235_vm2, %v11080_v48  ;;  %8817 = vmatprep.mubr.msk.f32.mxu1 %vm147_vm1, %v11180_v32 }
 0x115   :  { %8869 = vmatprep.mubr.msk.f32.mxu0 %vm235_vm2, %v10945_v13 }
 0x117   :  { %8818 = vmatmul.mubr.msk.f32.gmra.mrb[26].mxu1 %vm147_vm1, %v11176_v30 }
 0x118   :  { %8870 = vmatmul.mubr.msk.f32.vlgmr.msra.gmra.mrb[32].mxu0 %vm235_vm2, %v10947_v14  ;;  %8820 = vmatprep.mubr.msk.f32.mxu1 %vm147_vm1, %v11194_v47 }
 0x119   :  { %8872 = vmatprep.mubr.msk.f32.mxu0 %vm235_vm2, %v10949_v15 }
 0x11b   :  { %8821 = vmatmul.mubr.msk.f32.gmra.mrb[28].mxu1 %vm147_vm1, %v11190_v43 }
 0x11c   :  { %8873 = vmatmul.mubr.msk.f32.gmra.mrb[34].mxu0 %vm235_vm2, %v10973_v21  ;;  %8823 = vmatprep.mubr.msk.f32.mxu1 %vm147_vm1, %v11210_v56 }
 0x11d   :  { %8875 = vmatprep.mubr.msk.f32.mxu0 %vm235_vm2, %v10977_v22 }
 0x11f   :  { %8824 = vmatmul.mubr.msk.f32.gmra.mrb[30].mxu1 %vm147_vm1, %v11208_v55 }
 0x120   :  { %8876 = vmatmul.mubr.msk.f32.gmra.mrb[36].mxu0 %vm235_vm2, %v10996_v27  ;;  %8826 = vmatprep.mubr.msk.f32.mxu1 %vm147_vm1, %v11248_v59 }
 0x121   :  { %8878 = vmatprep.mubr.msk.f32.mxu0 %vm235_vm2, %v11000_v28 }
 0x123   :  { %8827 = vmatmul.mubr.msk.f32.gmra.mrb[32].mxu1 %vm147_vm1, %v11242_v60 }
 0x124   :  { %8879 = vmatmul.mubr.msk.f32.gmra.mrb[38].mxu0 %vm235_vm2, %v11018_v33  ;;  %8829 = vmatprep.mubr.msk.f32.mxu1 %vm147_vm1, %v11260_v9 }
 0x125   :  { %8881 = vmatprep.mubr.msk.f32.mxu0 %vm235_vm2, %v11022_v34 }
 0x127   :  { %8830 = vmatmul.mubr.msk.f32.gmra.mrb[34].mxu1 %vm147_vm1, %v11254_v12 }
 0x128   :  { %8882 = vmatmul.mubr.msk.f32.gmra.mrb[40].mxu0 %vm235_vm2, %v11040_v39 }
 0x129   :  { %8884 = vmatprep.mubr.msk.f32.mxu0 %vm235_vm2, %v11044_v40 }
 0x12c   :  { %8885 = vmatmul.mubr.msk.f32.gmra.mrb[42].mxu0 %vm235_vm2, %v11059_v44 }
 0x12d   :  { %8887 = vmatprep.mubr.msk.f32.mxu0 %vm235_vm2, %v11084_v49 }
 0x130   :  { %8888 = vmatmul.mubr.msk.f32.gmra.mrb[44].mxu0 %vm235_vm2, %v11095_v51 }
 0x131   :  { %8890 = vmatprep.mubr.msk.f32.mxu0 %vm235_vm2, %v11099_v52 }
 0x134   :  { %8891 = vmatmul.mubr.msk.f32.gmra.mrb[46].mxu0 %vm235_vm2, %v11103_v53 }
 0x1cb   :  { %v11332_v9 = vpop.f32.mrb[16].mxu0 }
 0x1cc   :  { %v11334_v59 = vpop.f32.mrb[17].mxu0 }
 0x1cd   :  { %8895 = vmatprep.mubr.msk.f32.mxu1 %vm1417_vm3, %v11334_v59 }
 0x1ce   :  { %8896 = vmatmul.mubr.msk.f32.vlgmr.msra.gmra.mrb[36].mxu1 %vm1417_vm3, %v11332_v9 }
 0x1cf   :  { %v11340_v58 = vpop.f32.mrb[18].mxu0  ;;  %8920 = vmatpush3.msra.mxu1 %v1415_v0 }
 0x1d0   :  { %13163 = vst [vmem:[#allocation74_spill] sm:$0xff] %v11340_v58  ;;  %v11342_v56 = vpop.f32.mrb[19].mxu0 }
 0x1d1   :  { %13164 = vst [vmem:[#allocation75_spill] sm:$0xff] %v11342_v56  ;;  %8898 = vmatprep.mubr.msk.f32.mxu1 %vm1417_vm3, %v11342_v56 }
 0x1d2   :  { %8899 = vmatmul.mubr.msk.f32.gmra.mrb[38].mxu1 %vm1417_vm3, %v11340_v58 }
 0x1d3   :  { %v11348_v54 = vpop.f32.mrb[20].mxu0 }
 0x1d4   :  { %13165 = vst [vmem:[#allocation76_spill] sm:$0xff] %v11348_v54  ;;  %v11350_v12 = vpop.f32.mrb[21].mxu0 }
 0x1d5   :  { %13166 = vst [vmem:[#allocation77_spill] sm:$0xff] %v11350_v12  ;;  %8901 = vmatprep.mubr.msk.f32.mxu1 %vm1417_vm3, %v11350_v12 }
 0x1d6   :  { %8902 = vmatmul.mubr.msk.f32.gmra.mrb[40].mxu1 %vm1417_vm3, %v11348_v54 }
 0x1d7   :  { %v11356_v18 = vpop.f32.mrb[22].mxu0 }
 0x1d8   :  { %13167 = vst [vmem:[#allocation78_spill] sm:$0xff] %v11356_v18  ;;  %v11358_v0 = vpop.f32.mrb[23].mxu0 }
 0x1d9   :  { %13168 = vst [vmem:[#allocation79_spill] sm:$0xff] %v11358_v0  ;;  %8904 = vmatprep.mubr.msk.f32.mxu1 %vm1417_vm3, %v11358_v0 }
 0x1da   :  { %8905 = vmatmul.mubr.msk.f32.gmra.mrb[42].mxu1 %vm1417_vm3, %v11356_v18 }
 0x1db   :  { %v11364_v47 = vpop.f32.mrb[24].mxu0 }
 0x1dc   :  { %13169 = vst [vmem:[#allocation80_spill] sm:$0xff] %v11364_v47  ;;  %v11366_v38 = vpop.f32.mrb[25].mxu0 }
 0x1dd   :  { %13170 = vst [vmem:[#allocation81_spill] sm:$0xff] %v11366_v38  ;;  %8907 = vmatprep.mubr.msk.f32.mxu1 %vm1417_vm3, %v11366_v38 }
 0x1de   :  { %8908 = vmatmul.mubr.msk.f32.gmra.mrb[44].mxu1 %vm1417_vm3, %v11364_v47  ;;  %v8810_v32 = vpop.f32.mrb[20].mxu1 }
 0x1df   :  { %v11372_v26 = vpop.f32.mrb[26].mxu0  ;;  %v937_v60 = vpop.f32.mrb[21].mxu1 }
 0x1e0   :  { %13171 = vst [vmem:[#allocation82_spill] sm:$0xff] %v11372_v26  ;;  %v11374_v57 = vpop.f32.mrb[27].mxu0 }
 0x1e1   :  { %13172 = vst [vmem:[#allocation83_spill] sm:$0xff] %v11374_v57  ;;  %8910 = vmatprep.mubr.msk.f32.mxu1 %vm1417_vm3, %v11374_v57 }
 0x1e2   :  { %8911 = vmatmul.mubr.msk.f32.gmra.mrb[46].mxu1 %vm1417_vm3, %v11372_v26  ;;  %v8813_v0 = vpop.f32.mrb[22].mxu1 }
 0x1e3   :  { %v11380_v18 = vpop.f32.mrb[28].mxu0  ;;  %v11382_v30 = vpop.f32.mrb[23].mxu1 }
 0x1e4   :  { %13173 = vst [vmem:[#allocation84_spill] sm:$0xff] %v11380_v18  ;;  %v11384_v38 = vpop.f32.mrb[29].mxu0 }
 0x1e5   :  { %13174 = vst [vmem:[#allocation85_spill] sm:$0xff] %v11384_v38  ;;  %8913 = vmatprep.mubr.msk.f32.mxu1 %vm1417_vm3, %v11384_v38 }
 0x1e6   :  { %8914 = vmatmul.mubr.msk.f32.gmra.mrb[48].mxu1 %vm1417_vm3, %v11380_v18  ;;  %v11390_v47 = vpop.f32.mrb[24].mxu1 }
 0x1e7   :  { %v11392_v24 = vpop.f32.mrb[30].mxu0  ;;  %v11394_v57 = vpop.f32.mrb[25].mxu1 }
 0x1e8   :  { %13175 = vst [vmem:[#allocation86_spill] sm:$0xff] %v11392_v24  ;;  %v11396_v26 = vpop.f32.mrb[31].mxu0 }
 0x1e9   :  { %13176 = vst [vmem:[#allocation87_spill] sm:$0xff] %v11396_v26  ;;  %8916 = vmatprep.mubr.msk.f32.mxu1 %vm1417_vm3, %v11396_v26 }
 0x1ea   :  { %8917 = vmatmul.mubr.msk.f32.gmra.mrb[50].mxu1 %vm1417_vm3, %v11392_v24  ;;  %v11402_v55 = vpop.f32.mrb[26].mxu1 }
 0x1eb   :  { %v11404_v38 = vpop.f32.mrb[32].mxu0  ;;  %v11406_v50 = vpop.f32.mrb[27].mxu1 }
 0x1ec   :  { %v11408_v18 = vpop.f32.mrb[33].mxu0 }
 0x1ed   :  { %8921 = vmatprep.mubr.msk.f32.mxu1 %vm1417_vm3, %v11408_v18 }
 0x1ee   :  { %8922 = vmatmul.mubr.msk.f32.vlgmr.msra.gmra.mrb[36].mxu1 %vm1417_vm3, %v11404_v38  ;;  %v11414_v20 = vpop.f32.mrb[28].mxu1 }
 0x1ef   :  { %v11416_v26 = vpop.f32.mrb[34].mxu0  ;;  %v11418_v11 = vpop.f32.mrb[29].mxu1 }
 0x1f0   :  { %13177 = vst [vmem:[#allocation88_spill] sm:$0xff] %v11416_v26  ;;  %v11420_v24 = vpop.f32.mrb[35].mxu0 }
 0x1f1   :  { %13178 = vst [vmem:[#allocation89_spill] sm:$0xff] %v11420_v24  ;;  %8924 = vmatprep.mubr.msk.f32.mxu1 %vm1417_vm3, %v11420_v24 }
 0x1f2   :  { %8925 = vmatmul.mubr.msk.f32.gmra.mrb[38].mxu1 %vm1417_vm3, %v11416_v26  ;;  %v11426_v12 = vpop.f32.mrb[30].mxu1 }
 0x1f3   :  { %v11428_v43 = vpop.f32.mrb[36].mxu0  ;;  %v11430_v36 = vpop.f32.mrb[31].mxu1 }
 0x1f4   :  { %13179 = vst [vmem:[#allocation90_spill] sm:$0xff] %v11428_v43  ;;  %v11432_v54 = vpop.f32.mrb[37].mxu0 }
 0x1f5   :  { %13180 = vst [vmem:[#allocation91_spill] sm:$0xff] %v11432_v54  ;;  %8927 = vmatprep.mubr.msk.f32.mxu1 %vm1417_vm3, %v11432_v54 }
 0x1f6   :  { %8928 = vmatmul.mubr.msk.f32.gmra.mrb[40].mxu1 %vm1417_vm3, %v11428_v43  ;;  %v11438_v53 = vpop.f32.mrb[32].mxu1 }
 0x1f7   :  { %v11440_v16 = vpop.f32.mrb[38].mxu0  ;;  %v11442_v6 = vpop.f32.mrb[33].mxu1 }
 0x1f8   :  { %13181 = vst [vmem:[#allocation92_spill] sm:$0xff] %v11440_v16  ;;  %v11444_v52 = vpop.f32.mrb[39].mxu0 }
 0x1f9   :  { %13182 = vst [vmem:[#allocation93_spill] sm:$0xff] %v11444_v52  ;;  %8930 = vmatprep.mubr.msk.f32.mxu1 %vm1417_vm3, %v11444_v52 }
 0x1fa   :  { %8931 = vmatmul.mubr.msk.f32.gmra.mrb[42].mxu1 %vm1417_vm3, %v11440_v16  ;;  %v11450_v5 = vpop.f32.mrb[34].mxu1 }
 0x1fb   :  { %v11452_v54 = vpop.f32.mrb[40].mxu0  ;;  %v11454_v24 = vpop.f32.mrb[35].mxu1 }
 0x1fc   :  { %13183 = vst [vmem:[#allocation94_spill] sm:$0xff] %v11452_v54  ;;  %v11456_v43 = vpop.f32.mrb[41].mxu0 }
 0x1fd   :  { %13184 = vst [vmem:[#allocation95_spill] sm:$0xff] %v11456_v43  ;;  %8933 = vmatprep.mubr.msk.f32.mxu1 %vm1417_vm3, %v11456_v43 }
 0x1fe   :  { %8934 = vmatmul.mubr.msk.f32.gmra.mrb[44].mxu1 %vm1417_vm3, %v11452_v54 }
 0x1ff   :  { %v11462_v3 = vpop.f32.mrb[42].mxu0 }
 0x200   :  { %13185 = vst [vmem:[#allocation96_spill] sm:$0xff] %v11462_v3  ;;  %v11464_v52 = vpop.f32.mrb[43].mxu0 }
 0x201   :  { %13186 = vst [vmem:[#allocation97_spill] sm:$0xff] %v11464_v52  ;;  %8936 = vmatprep.mubr.msk.f32.mxu1 %vm1417_vm3, %v11464_v52  ;;  %v11489_v52 = vld [vmem:[%s12857_s9] ss:$0 sm:$0xff] }
 0x202   :  { %8937 = vmatmul.mubr.msk.f32.gmra.mrb[46].mxu1 %vm1417_vm3, %v11462_v3  ;;  %v1837_v3 = vlaneseq }
 0x203   :  { %v11470_v16 = vpop.f32.mrb[44].mxu0 }
 0x204   :  { %13187 = vst [vmem:[#allocation98_spill] sm:$0xff] %v11470_v16  ;;  %v11472_v56 = vpop.f32.mrb[45].mxu0  ;;  %v11502_v4 = vshrl.u32 %v1837_v3, 7  ;;  %v11517_v3 = vadd.f32 %v11489_v52, %v11394_v57  ;;  %v11532_v57 = vadd.f32 %v11489_v52, %v11406_v50  ;;  %v11543_v50 = vadd.f32 %v11489_v52, %v11418_v11 }
 0x205   :  { %13188 = vst [vmem:[#allocation99_spill] sm:$0xff] %v11472_v56  ;;  %8939 = vmatprep.mubr.msk.f32.mxu1 %vm1417_vm3, %v11472_v56  ;;  %v11492_v56 = vadd.f32 %v8810_v32, %v11489_v52  ;;  %v11506_v32 = vadd.f32 %v11489_v52, %v11382_v30  ;;  %v11552_v11 = vadd.f32 %v11426_v12, %v11489_v52 }
 0x206   :  { %8940 = vmatmul.mubr.msk.f32.gmra.mrb[48].mxu1 %vm1417_vm3, %v11470_v16  ;;  %v11495_v16 = vadd.f32 %v11489_v52, %v937_v60  ;;  %13194 = vst [vmem:[#allocation105_spill] sm:$0xff] %v11502_v4  ;;  %13197 = vst [vmem:[#allocation108_spill] sm:$0xff] %v11517_v3 }
 0x207   :  { %v11478_v43 = vpop.f32.mrb[46].mxu0  ;;  %13191 = vst [vmem:[#allocation102_spill] sm:$0xff] %v11492_v56  ;;  %13195 = vst [vmem:[#allocation106_spill] sm:$0xff] %v11506_v32 }
 0x208   :  { %13189 = vst [vmem:[#allocation100_spill] sm:$0xff] %v11478_v43  ;;  %v11480_v54 = vpop.f32.mrb[47].mxu0  ;;  %13192 = vst [vmem:[#allocation103_spill] sm:$0xff] %v11495_v16 }
 0x209   :  { %13190 = vst [vmem:[#allocation101_spill] sm:$0xff] %v11480_v54  ;;  %8942 = vmatprep.mubr.msk.f32.mxu1 %vm1417_vm3, %v11480_v54  ;;  %13200 = vst [vmem:[#allocation111_spill] sm:$0xff] %v11532_v57 }
 0x20a   :  { %8943 = vmatmul.mubr.msk.f32.gmra.mrb[50].mxu1 %vm1417_vm3, %v11478_v43  ;;  %v11500_v43 = vadd.f32 %v8813_v0, %v11489_v52  ;;  %v11528_v0 = vadd.f32 %v11402_v55, %v11489_v52  ;;  %13202 = vst [vmem:[#allocation113_spill] sm:$0xff] %v11543_v50  ;;  %13203 = vst [vmem:[#allocation114_spill] sm:$0xff] %v11552_v11 }
 0x20c   :  { %13193 = vst [vmem:[#allocation104_spill] sm:$0xff] %v11500_v43  ;;  %13199 = vst [vmem:[#allocation110_spill] sm:$0xff] %v11528_v0 }
 0x2c1   :  { %v8923_v26 = vpop.f32.mrb[36].mxu1 }
 0x2c2   :  { %v1805_v58 = vadd.f32 %v8923_v26, %v11492_v56  ;;  %v1725_v51 = vpop.f32.mrb[37].mxu1  ;;  %v13235_v56 = vld [vmem:[#allocation54_spill] sm:$0xff] }
 0x2c3   :  { %v1804_v54 = vadd.f32 %v1725_v51, %v11495_v16  ;;  %v11512_v51 = vadd.f32 %v11390_v47, %v11489_v52  ;;  %v13234_v16 = vld [vmem:[#allocation52_spill] sm:$0xff] }
 0x2c4   :  { %10387 = vtanh.f32 %v1805_v58 }
 0x2c5   :  { %10389 = vtanh.f32 %v1804_v54  ;;  %v8926_v2 = vpop.f32.mrb[38].mxu1  ;;  %13196 = vst [vmem:[#allocation107_spill] sm:$0xff] %v11512_v51 }
 0x2c6   :  { %v1807_v60 = vadd.f32 %v8926_v2, %v11500_v43  ;;  %v1735_v49 = vpop.f32.mrb[39].mxu1  ;;  %v11522_v2 = vld [vmem:[%s12858_s10] ss:$0 sm:$0xff] }
 0x2c7   :  { %v1806_v26 = vadd.f32 %v1735_v49, %v11506_v32  ;;  %13198 = vst [vmem:[#allocation109_spill] sm:$0xff] %v11522_v2 }
 0x2c8   :  { %10391 = vtanh.f32 %v1807_v60 }
 0x2c9   :  { %10393 = vtanh.f32 %v1806_v26  ;;  %v8929_v30 = vpop.f32.mrb[40].mxu1 }
 0x2ca   :  { %v1809_v49 = vadd.f32 %v8929_v30, %v11512_v51  ;;  %v1745_v54 = vpop.f32.mrb[41].mxu1 }
 0x2cb   :  { %v1808_v47 = vadd.f32 %v1745_v54, %v11517_v3  ;;  %v11538_v54 = vadd.f32 %v11414_v20, %v11489_v52 }
 0x2cc   :  { %10395 = vtanh.f32 %v1809_v49 }
 0x2cd   :  { %10397 = vtanh.f32 %v1808_v47  ;;  %v8932_v60 = vpop.f32.mrb[42].mxu1  ;;  %13201 = vst [vmem:[#allocation112_spill] sm:$0xff] %v11538_v54 }
 0x2ce   :  { %v10388_v26 = vpop.eup %10387  ;;  %v1811_v58 = vadd.f32 %v8932_v60, %v11528_v0  ;;  %v1755_v4 = vpop.f32.mrb[43].mxu1 }
 0x2cf   :  { %v10390_v32 = vpop.eup %10389  ;;  %v1810_v30 = vadd.f32 %v1755_v4, %v11532_v57  ;;  %v1843_v4 = vmul.f32 %v11522_v2, %v10388_v26 }
 0x2d0   :  { %10399 = vtanh.f32 %v1811_v58  ;;  %v1842_v55 = vmul.f32 %v11522_v2, %v10390_v32  ;;  %v11556_v58 = vadd.f32 %v11489_v52, %v11430_v36  ;;  %v11565_v36 = vadd.f32 %v11438_v53, %v11489_v52 }
 0x2d1   :  { %10401 = vtanh.f32 %v1810_v30  ;;  %v8935_v49 = vpop.f32.mrb[44].mxu1 }
 0x2d2   :  { %v10392_v47 = vpop.eup %10391  ;;  %v1813_v60 = vadd.f32 %v8935_v49, %v11538_v54  ;;  %v1765_v0 = vpop.f32.mrb[45].mxu1  ;;  %v1858_v3 = vsel %vm1417_vm3, %v1842_v55, 0.0  ;;  %13204 = vst [vmem:[#allocation115_spill] sm:$0xff] %v11556_v58  ;;  %13205 = vst [vmem:[#allocation116_spill] sm:$0xff] %v11565_v36 }
 0x2d3   :  { %v10394_v57 = vpop.eup %10393  ;;  %v1812_v20 = vadd.f32 %v1765_v0, %v11543_v50  ;;  %1859 = vadd.xlane.f32.xlu0 %v1858_v3  ;;  %v1845_v32 = vmul.f32 %v11522_v2, %v10392_v47  ;;  %v1861_v47 = vsel %vm1417_vm3, %v1843_v4, 0.0 }
 0x2d4   :  { %10403 = vtanh.f32 %v1813_v60  ;;  %v1844_v26 = vmul.f32 %v11522_v2, %v10394_v57  ;;  %v11570_v57 = vadd.f32 %v11489_v52, %v11442_v6  ;;  %v11579_v6 = vadd.f32 %v11450_v5, %v11489_v52 }
 0x2d5   :  { %10405 = vtanh.f32 %v1812_v20  ;;  %v8938_v30 = vpop.f32.mrb[46].mxu1  ;;  %v1867_v55 = vsel %vm1417_vm3, %v1845_v32, 0.0 }
 0x2d6   :  { %v10396_v49 = vpop.eup %10395  ;;  %v1815_v3 = vadd.f32 %v8938_v30, %v11552_v11  ;;  %1868 = vadd.xlane.f32.xlu1 %v1867_v55  ;;  %v1775_v0 = vpop.f32.mrb[47].mxu1  ;;  %13206 = vst [vmem:[#allocation117_spill] sm:$0xff] %v11570_v57  ;;  %v1864_v30 = vsel %vm1417_vm3, %v1844_v26, 0.0  ;;  %13207 = vst [vmem:[#allocation118_spill] sm:$0xff] %v11579_v6 }
 0x2d7   :  { %v10398_v12 = vpop.eup %10397  ;;  %v1814_v60 = vadd.f32 %v1775_v0, %v11556_v58  ;;  %1862 = vadd.xlane.f32.xlu0 %v1861_v47  ;;  %v1847_v4 = vmul.f32 %v11522_v2, %v10396_v49  ;;  %v11584_v49 = vadd.f32 %v11489_v52, %v11454_v24 }
 0x2d8   :  { %10407 = vtanh.f32 %v1815_v3  ;;  %v1846_v20 = vmul.f32 %v11522_v2, %v10398_v12 }
 0x2d9   :  { %10409 = vtanh.f32 %v1814_v60  ;;  %v8941_v32 = vpop.f32.mrb[48].mxu1  ;;  %13208 = vst [vmem:[#allocation119_spill] sm:$0xff] %v11584_v49 }
 0x2da   :  { %v10400_v55 = vpop.eup %10399  ;;  %v1817_v0 = vadd.f32 %v8941_v32, %v11565_v36  ;;  %1865 = vadd.xlane.f32.xlu1 %v1864_v30  ;;  %v1785_v47 = vpop.f32.mrb[49].mxu1  ;;  %v1870_v53 = vsel %vm1417_vm3, %v1846_v20, 0.0  ;;  %v1873_v32 = vsel %vm1417_vm3, %v1847_v4, 0.0 }
 0x2db   :  { %v10402_v3 = vpop.eup %10401  ;;  %v1816_v12 = vadd.f32 %v1785_v47, %v11570_v57  ;;  %1871 = vadd.xlane.f32.xlu0 %v1870_v53  ;;  %v1849_v20 = vmul.f32 %v11522_v2, %v10400_v55 }
 0x2dc   :  { %10411 = vtanh.f32 %v1817_v0  ;;  %v1848_v26 = vmul.f32 %v11522_v2, %v10402_v3 }
 0x2dd   :  { %10413 = vtanh.f32 %v1816_v12  ;;  %v8944_v60 = vpop.f32.mrb[50].mxu1  ;;  %v1879_v24 = vsel %vm1417_vm3, %v1849_v20, 0.0 }
 0x2de   :  { %v10404_v30 = vpop.eup %10403  ;;  %v1819_v47 = vadd.f32 %v8944_v60, %v11579_v6  ;;  %1874 = vadd.xlane.f32.xlu1 %v1873_v32  ;;  %v1795_v53 = vpop.f32.mrb[51].mxu1  ;;  %v1876_v5 = vsel %vm1417_vm3, %v1848_v26, 0.0 }
 0x2df   :  { %v10406_v0 = vpop.eup %10405  ;;  %v1818_v3 = vadd.f32 %v1795_v53, %v11584_v49  ;;  %1877 = vadd.xlane.f32.xlu0 %v1876_v5  ;;  %v1851_v4 = vmul.f32 %v11522_v2, %v10404_v30 }
 0x2e0   :  { %10415 = vtanh.f32 %v1819_v47  ;;  %v1850_v52 = vmul.f32 %v11522_v2, %v10406_v0 }
 0x2e1   :  { %10417 = vtanh.f32 %v1818_v3  ;;  %v1885_v32 = vsel %vm1417_vm3, %v1851_v4, 0.0 }
 0x2e2   :  { %v10408_v55 = vpop.eup %10407  ;;  %1880 = vadd.xlane.f32.xlu1 %v1879_v24  ;;  %v1882_v12 = vsel %vm1417_vm3, %v1850_v52, 0.0 }
 0x2e3   :  { %v10410_v60 = vpop.eup %10409  ;;  %1883 = vadd.xlane.f32.xlu0 %v1882_v12  ;;  %v1853_v53 = vmul.f32 %v11522_v2, %v10408_v55 }
 0x2e4   :  { %v1852_v26 = vmul.f32 %v11522_v2, %v10410_v60 }
 0x2e5   :  { %v1891_v30 = vsel %vm1417_vm3, %v1853_v53, 0.0  ;;  %v10783_v53 = vmov 0  }
 0x2e6   :  { %v10412_v47 = vpop.eup %10411  ;;  %1886 = vadd.xlane.f32.xlu1 %v1885_v32  ;;  %v1888_v5 = vsel %vm1417_vm3, %v1852_v26, 0.0  ;;  %10381 = vset.pattern.permute.xlu0 %v10783_v53 }
 0x2e7   :  { %v10414_v0 = vpop.eup %10413  ;;  %1889 = vadd.xlane.f32.xlu0 %v1888_v5  ;;  %v1855_v3 = vmul.f32 %v11522_v2, %v10412_v47  ;;  %10382 = vset.pattern.permute.xlu1 %v10783_v53  ;;  %v11608_v47 = vld [vmem:[#allocation2] ss:$0 sm:$0xff] }
 0x2e8   :  { %v1854_v20 = vmul.f32 %v11522_v2, %v10414_v0  ;;  %13209 = vst [vmem:[#allocation120_spill] sm:$0xff] %v11608_v47 }
 0x2e9   :  { %v1897_v55 = vsel %vm1417_vm3, %v1855_v3, 0.0 }
 0x2ea   :  { %v10416_v52 = vpop.eup %10415  ;;  %1892 = vadd.xlane.f32.xlu1 %v1891_v30  ;;  %v1894_v24 = vsel %vm1417_vm3, %v1854_v20, 0.0 }
 0x2eb   :  { %v10418_v12 = vpop.eup %10417  ;;  %1895 = vadd.xlane.f32.xlu0 %v1894_v24  ;;  %v1857_v60 = vmul.f32 %v11522_v2, %v10416_v52 }
 0x2ec   :  { %v1856_v4 = vmul.f32 %v11522_v2, %v10418_v12 }
 0x2ed   :  { %v1903_v32 = vsel %vm1417_vm3, %v1857_v60, 0.0 }
 0x2ee   :  { %1898 = vadd.xlane.f32.xlu1 %v1897_v55  ;;  %v1900_v26 = vsel %vm1417_vm3, %v1856_v4, 0.0 }
 0x2ef   :  { %1901 = vadd.xlane.f32.xlu0 %v1900_v26 }
 0x2f2   :  { %1904 = vadd.xlane.f32.xlu1 %v1903_v32 }
 0x360   :  { %v1860_v5 = vpop.xlane.xlu0 %1859 }
 0x361   :  { %v1912_v0 = vadd.f32 %v11608_v47, %v1860_v5 }
 0x363   :  { %v7697_v20 = vmul.f32 -1.442695, %v1912_v0  ;;  %v1869_v30 = vpop.xlane.xlu1 %1868 }
 0x364   :  { %v1915_v3 = vadd.f32 %v11608_v47, %v1869_v30  ;;  %v1863_v52 = vpop.xlane.xlu0 %1862 }
 0x365   :  { %10419 = vpow2.f32 %v7697_v20  ;;  %v1913_v24 = vadd.f32 %v11608_v47, %v1863_v52 }
 0x366   :  { %v7700_v12 = vmul.f32 -1.442695, %v1915_v3 }
 0x367   :  { %v7698_v4 = vmul.f32 -1.442695, %v1913_v24  ;;  %v1866_v55 = vpop.xlane.xlu1 %1865 }
 0x368   :  { %10421 = vpow2.f32 %v7700_v12  ;;  %v1914_v60 = vadd.f32 %v11608_v47, %v1866_v55  ;;  %v1872_v26 = vpop.xlane.xlu0 %1871 }
 0x369   :  { %10423 = vpow2.f32 %v7698_v4  ;;  %v1916_v32 = vadd.f32 %v11608_v47, %v1872_v26 }
 0x36a   :  { %v7699_v53 = vmul.f32 -1.442695, %v1914_v60 }
 0x36b   :  { %v1875_v5 = vpop.xlane.xlu1 %1874  ;;  %v7701_v0 = vmul.f32 -1.442695, %v1916_v32 }
 0x36c   :  { %v1917_v49 = vadd.f32 %v11608_v47, %v1875_v5  ;;  %v1878_v30 = vpop.xlane.xlu0 %1877  ;;  %10425 = vpow2.f32 %v7699_v53 }
 0x36d   :  { %10427 = vpow2.f32 %v7701_v0  ;;  %v1918_v5 = vadd.f32 %v11608_v47, %v1878_v30 }
 0x36e   :  { %v7702_v20 = vmul.f32 -1.442695, %v1917_v49 }
 0x36f   :  { %v10420_v6 = vpop.eup %10419  ;;  %v1881_v52 = vpop.xlane.xlu1 %1880 }
 0x370   :  { %v1976_v3 = vadd.f32 1.0, %v10420_v6  ;;  %v1884_v24 = vpop.xlane.xlu0 %1883  ;;  %10429 = vpow2.f32 %v7702_v20  ;;  %v1919_v12 = vadd.f32 %v11608_v47, %v1881_v52  ;;  %v7703_v52 = vmul.f32 -1.442695, %v1918_v5 }
 0x372   :  { %v10422_v55 = vpop.eup %10421  ;;  %10431 = vrcp.f32 %v1976_v3  ;;  %v7704_v57 = vmul.f32 -1.442695, %v1919_v12  ;;  %v1920_v3 = vadd.f32 %v11608_v47, %v1884_v24 }
 0x373   :  { %v10424_v4 = vpop.eup %10423  ;;  %v1887_v26 = vpop.xlane.xlu1 %1886  ;;  %v1979_v49 = vadd.f32 1.0, %v10422_v55 }
 0x374   :  { %v1977_v60 = vadd.f32 1.0, %v10424_v4  ;;  %v1921_v32 = vadd.f32 %v11608_v47, %v1887_v26  ;;  %v1890_v53 = vpop.xlane.xlu0 %1889 }
 0x375   :  { %v1922_v55 = vadd.f32 %v11608_v47, %v1890_v53 }
 0x376   :  { %10433 = vrcp.f32 %v1977_v60  ;;  %v7706_v36 = vmul.f32 -1.442695, %v1921_v32  ;;  %v10426_v6 = vpop.eup %10425 }
 0x377   :  { %v1893_v0 = vpop.xlane.xlu1 %1892  ;;  %v10428_v58 = vpop.eup %10427  ;;  %v1978_v4 = vadd.f32 1.0, %v10426_v6  ;;  %v7707_v6 = vmul.f32 -1.442695, %v1922_v55 }
 0x378   :  { %10435 = vpow2.f32 %v7706_v36  ;;  %v1923_v20 = vadd.f32 %v11608_v47, %v1893_v0  ;;  %v1896_v30 = vpop.xlane.xlu0 %1895  ;;  %v7705_v36 = vmul.f32 -1.442695, %v1920_v3  ;;  %v1980_v24 = vadd.f32 1.0, %v10428_v58 }
 0x379   :  { %10437 = vpow2.f32 %v7704_v57  ;;  %v1924_v0 = vadd.f32 %v11608_v47, %v1896_v30 }
 0x37a   :  { %10439 = vrcp.f32 %v1979_v49  ;;  %v7708_v26 = vmul.f32 -1.442695, %v1923_v20  ;;  %v10430_v11 = vpop.eup %10429 }
 0x37b   :  { %v1899_v12 = vpop.xlane.xlu1 %1898  ;;  %v1981_v57 = vadd.f32 1.0, %v10430_v11  ;;  %v7709_v58 = vmul.f32 -1.442695, %v1924_v0 }
 0x37c   :  { %v10432_v50 = vpop.eup %10431  ;;  %10441 = vpow2.f32 %v7708_v26  ;;  %v1925_v60 = vadd.f32 %v11608_v47, %v1899_v12  ;;  %v1902_v53 = vpop.xlane.xlu0 %1901 }
 0x37d   :  { %10443 = vpow2.f32 %v7703_v52  ;;  %2026 = vperm.xlu0 %10381, %v10432_v50  }
 0x37e   :  { %10445 = vrcp.f32 %v1978_v4  ;;  %v7710_v32 = vmul.f32 -1.442695, %v1925_v60  ;;  %v1926_v4 = vadd.f32 %v11608_v47, %v1902_v53 }
 0x37f   :  { %v1905_v5 = vpop.xlane.xlu1 %1904 }
 0x380   :  { %v10434_v49 = vpop.eup %10433  ;;  %10447 = vpow2.f32 %v7710_v32  ;;  %v1927_v20 = vadd.f32 %v11608_v47, %v1905_v5  ;;  %v7711_v32 = vmul.f32 -1.442695, %v1926_v4  ;;  %v13231_v47 = vld [vmem:[#allocation51_spill] sm:$0xff] }
 0x381   :  { %10449 = vpow2.f32 %v7705_v36  ;;  %2031 = vperm.xlu1 %10382, %v10434_v49  }
 0x382   :  { %v10436_v26 = vpop.eup %10435  ;;  %10451 = vrcp.f32 %v1981_v57  ;;  %v7712_v52 = vmul.f32 -1.442695, %v1927_v20 }
 0x383   :  { %v10438_v3 = vpop.eup %10437  ;;  %10453 = vrcp.f32 %v1980_v24  ;;  %v1985_v50 = vadd.f32 1.0, %v10436_v26 }
 0x384   :  { %v10440_v11 = vpop.eup %10439  ;;  %10455 = vpow2.f32 %v7707_v6  ;;  %v1983_v12 = vadd.f32 1.0, %v10438_v3 }
 0x385   :  { %10457 = vrcp.f32 %v1985_v50  ;;  %2041 = vperm.xlu1 %10382, %v10440_v11  }
 0x386   :  { %v10442_v30 = vpop.eup %10441  ;;  %10459 = vpow2.f32 %v7712_v52 }
 0x387   :  { %v10444_v55 = vpop.eup %10443  ;;  %v1987_v60 = vadd.f32 1.0, %v10442_v30  ;;  %10461 = vpow2.f32 %v7709_v58 }
 0x388   :  { %v10446_v36 = vpop.eup %10445  ;;  %v1982_v24 = vadd.f32 1.0, %v10444_v55 }
 0x389   :  { %10463 = vrcp.f32 %v1987_v60  ;;  %2036 = vperm.xlu1 %10382, %v10446_v36  }
 0x38a   :  { %v10448_v57 = vpop.eup %10447  ;;  %10465 = vrcp.f32 %v1983_v12 }
 0x38b   :  { %v10450_v5 = vpop.eup %10449  ;;  %v1989_v49 = vadd.f32 1.0, %v10448_v57  ;;  %10467 = vpow2.f32 %v7711_v32 }
 0x38c   :  { %v10452_v6 = vpop.eup %10451  ;;  %v1984_v53 = vadd.f32 1.0, %v10450_v5 }
 0x38d   :  { %v10454_v0 = vpop.eup %10453  ;;  %10469 = vrcp.f32 %v1989_v49  ;;  %2051 = vperm.xlu1 %10382, %v10452_v6  }
 0x38e   :  { %v10456_v20 = vpop.eup %10455  ;;  %10471 = vrcp.f32 %v1982_v24 }
 0x38f   :  { %v10458_v26 = vpop.eup %10457  ;;  %10473 = vrcp.f32 %v1984_v53  ;;  %v1986_v11 = vadd.f32 1.0, %v10456_v20 }
 0x390   :  { %v10460_v52 = vpop.eup %10459  ;;  %2071 = vperm.xlu0 %10381, %v10458_v26  }
 0x391   :  { %v1991_v3 = vadd.f32 1.0, %v10460_v52  ;;  %2046 = vperm.xlu1 %10382, %v10454_v0   ;;  %v10462_v50 = vpop.eup %10461 }
 0x392   :  { %v1988_v12 = vadd.f32 1.0, %v10462_v50 }
 0x393   :  { %v10464_v58 = vpop.eup %10463  ;;  %10475 = vrcp.f32 %v1991_v3 }
 0x394   :  { %v10466_v4 = vpop.eup %10465  ;;  %2081 = vperm.xlu0 %10381, %v10464_v58   ;;  %10477 = vrcp.f32 %v1986_v11 }
 0x395   :  { %2061 = vperm.xlu1 %10382, %v10466_v4   ;;  %v10468_v30 = vpop.eup %10467  ;;  %10479 = vrcp.f32 %v1988_v12  ;;  %v13210_v4 = vld [vmem:[#allocation34_spill] sm:$0xff] }
 0x396   :  { %v1990_v36 = vadd.f32 1.0, %v10468_v30 }
 0x397   :  { %v10470_v55 = vpop.eup %10469 }
 0x398   :  { %v10472_v60 = vpop.eup %10471  ;;  %2091 = vperm.xlu0 %10381, %v10470_v55   ;;  %10481 = vrcp.f32 %v1990_v36  ;;  %v13211_v36 = vld [vmem:[#allocation42_spill] sm:$0xff] }
 0x399   :  { %2056 = vperm.xlu1 %10382, %v10472_v60   ;;  %v10474_v32 = vpop.eup %10473 }
 0x39d   :  { %v10476_v57 = vpop.eup %10475  ;;  %2066 = vperm.xlu1 %10382, %v10474_v32   ;;  %v13212_v32 = vld [vmem:[#allocation44_spill] sm:$0xff] }
 0x39e   :  { %2101 = vperm.xlu0 %10381, %v10476_v57   ;;  %v10478_v24 = vpop.eup %10477 }
 0x39f   :  { %v10480_v5 = vpop.eup %10479 }
 0x3a1   :  { %2076 = vperm.xlu1 %10382, %v10478_v24  }
 0x3a2   :  { %v10482_v49 = vpop.eup %10481 }
 0x3a5   :  { %2086 = vperm.xlu1 %10382, %v10480_v5   ;;  %v13215_v5 = vld [vmem:[#allocation88_spill] sm:$0xff] }
 0x3a9   :  { %2096 = vperm.xlu1 %10382, %v10482_v49  }
 0x3bc   :  { %2334 = vxpose.xlu0.b32.start [1/16] (narrow) %v10926_v7, 16 }
 0x3c0   :  { %2335 = vxpose.xlu0.b32.cont [2/16] (narrow) %v10930_v8, 16 }
 0x3c4   :  { %2336 = vxpose.xlu0.b32.cont [3/16] (narrow) %v10937_v10, 16 }
 0x3c8   :  { %2337 = vxpose.xlu0.b32.cont [4/16] (narrow) %v10956_v17, 16 }
 0x3cc   :  { %2338 = vxpose.xlu0.b32.cont [5/16] (narrow) %v10964_v19, 16 }
 0x3d0   :  { %2339 = vxpose.xlu0.b32.cont [6/16] (narrow) %v10982_v23, 16 }
 0x3d2   :  { %2120 = vxpose.xlu1.b32.start [1/16] (narrow) %v10945_v13, 16 }
 0x3d4   :  { %2340 = vxpose.xlu0.b32.cont [7/16] (narrow) %v10989_v25, 16 }
 0x3d6   :  { %2121 = vxpose.xlu1.b32.cont [2/16] (narrow) %v10947_v14, 16 }
 0x3d8   :  { %2341 = vxpose.xlu0.b32.cont [8/16] (narrow) %v11004_v29, 16 }
 0x3da   :  { %2122 = vxpose.xlu1.b32.cont [3/16] (narrow) %v10949_v15, 16 }
 0x3dc   :  { %2342 = vxpose.xlu0.b32.cont [9/16] (narrow) %v11011_v31, 16 }
 0x3de   :  { %2123 = vxpose.xlu1.b32.cont [4/16] (narrow) %v10973_v21, 16 }
 0x3e0   :  { %2343 = vxpose.xlu0.b32.cont [10/16] (narrow) %v11026_v35, 16 }
 0x3e2   :  { %2124 = vxpose.xlu1.b32.cont [5/16] (narrow) %v10977_v22, 16 }
 0x3e4   :  { %2344 = vxpose.xlu0.b32.cont [11/16] (narrow) %v11033_v37, 16 }
 0x3e6   :  { %2125 = vxpose.xlu1.b32.cont [6/16] (narrow) %v10996_v27, 16 }
 0x3e8   :  { %2345 = vxpose.xlu0.b32.cont [12/16] (narrow) %v11048_v41, 16  ;;  %v13249_v41 = vld [vmem:[#allocation59_spill] sm:$0xff] }
 0x3ea   :  { %2126 = vxpose.xlu1.b32.cont [7/16] (narrow) %v11000_v28, 16 }
 0x3ec   :  { %2346 = vxpose.xlu0.b32.cont [13/16] (narrow) %v11052_v42, 16  ;;  %v13247_v42 = vld [vmem:[#allocation57_spill] sm:$0xff] }
 0x3ee   :  { %2127 = vxpose.xlu1.b32.cont [8/16] (narrow) %v11018_v33, 16 }
 0x3f0   :  { %2347 = vxpose.xlu0.b32.cont [14/16] (narrow) %v11065_v45, 16 }
 0x3f2   :  { %2128 = vxpose.xlu1.b32.cont [9/16] (narrow) %v11022_v34, 16 }
 0x3f4   :  { %2348 = vxpose.xlu0.b32.cont [15/16] (narrow) %v11069_v46, 16 }
 0x3f6   :  { %2129 = vxpose.xlu1.b32.cont [10/16] (narrow) %v11040_v39, 16 }
 0x3f8   :  { %2349 = vxpose.xlu0.b32.end [16/16] (narrow) %v11080_v48, 16  ;;  %v13243_v48 = vld [vmem:[#allocation55_spill] sm:$0xff] }
 0x3fa   :  { %2130 = vxpose.xlu1.b32.cont [11/16] (narrow) %v11044_v40, 16  ;;  %v13257_v40 = vld [vmem:[#allocation63_spill] sm:$0xff] }
 0x3fc   :  { %v2027_v6 = vpop.permute.xlu0 %2026 }
 0x3fd   :  { %v2441_v0 = vmul.f32 %v2027_v6, %v11136_v1  ;;  %v2104_v20 = vmul.f32 %v2027_v6, %v11334_v59  ;;  %v2227_v53 = vmul.f32 %v2027_v6, %v11123_v62  ;;  %v2318_v26 = vmul.f32 %v2027_v6, %v11408_v18 }
 0x3fe   :  { %2131 = vxpose.xlu1.b32.cont [12/16] (narrow) %v11059_v44, 16  ;;  %v13248_v44 = vld [vmem:[#allocation95_spill] sm:$0xff] }
 0x400   :  { %v2032_v52 = vpop.permute.xlu1 %2031 }
 0x401   :  { %v2105_v3 = vmul.f32 %v11332_v9, %v2032_v52  ;;  %v2228_v50 = vmul.f32 %v11121_v61, %v2032_v52  ;;  %v2319_v11 = vmul.f32 %v11404_v38, %v2032_v52  ;;  %v2442_v58 = vmul.f32 %v11127_v63, %v2032_v52  ;;  %v13213_v9 = vld [vmem:[#allocation35_spill] sm:$0xff]  ;;  %v13214_v38 = vld [vmem:[#allocation74_spill] sm:$0xff]  ;;  %v13218_v52 = vld [vmem:[#allocation89_spill] sm:$0xff] }
 0x402   :  { %2132 = vxpose.xlu1.b32.cont [13/16] (narrow) %v13210_v4, 16  ;;  %v13230_v63 = vld [vmem:[#allocation91_spill] sm:$0xff]  ;;  %v13246_v4 = vld [vmem:[#allocation81_spill] sm:$0xff] }
 0x403   :  { %v9830_v30 = vpack.c.bf16 %v2105_v3, %v2104_v20  ;;  %v9894_v12 = vpack.c.bf16 %v2319_v11, %v2318_v26  ;;  %v11663_v55 = vpack.c.bf16 %v2228_v50, %v2227_v53  ;;  %v11665_v59 = vpack.c.bf16 %v2442_v58, %v2441_v0  ;;  %v13216_v20 = vld [vmem:[#allocation75_spill] sm:$0xff]  ;;  %v13219_v50 = vld [vmem:[#allocation45_spill] sm:$0xff]  ;;  %v13220_v58 = vld [vmem:[#allocation36_spill] sm:$0xff] }
 0x404   :  { %v2042_v60 = vpop.permute.xlu1 %2041  ;;  %v13217_v0 = vld [vmem:[#allocation43_spill] sm:$0xff] }
 0x405   :  { %v2230_v18 = vmul.f32 %v13211_v36, %v2042_v60  ;;  %v2444_v57 = vmul.f32 %v13212_v32, %v2042_v60  ;;  %9831 = vmatprep.subr.bf16.mxu0 %v9830_v30  ;;  %9895 = vmatprep.subr.bf16.mxu1 %v9894_v12  ;;  %v2107_v24 = vmul.f32 %v13214_v38, %v2042_v60  ;;  %v13221_v38 = vld [vmem:[#allocation46_spill] sm:$0xff] }
 0x406   :  { %2133 = vxpose.xlu1.b32.cont [14/16] (narrow) %v13213_v9, 16  ;;  %9833 = vmatpush3.bf16.msra.mxu0 %v9830_v30  ;;  %v2321_v49 = vmul.f32 %v13215_v5, %v2042_v60  ;;  %v13222_v5 = vld [vmem:[#allocation50_spill] sm:$0xff] }
 0x407   :  { %9897 = vmatpush3.bf16.msra.mxu1 %v9894_v12 }
 0x408   :  { %v2037_v6 = vpop.permute.xlu1 %2036 }
 0x409   :  { %v2106_v53 = vmul.f32 %v2037_v6, %v13216_v20  ;;  %v2229_v26 = vmul.f32 %v2037_v6, %v13217_v0  ;;  %v2320_v3 = vmul.f32 %v2037_v6, %v13218_v52  ;;  %v2443_v11 = vmul.f32 %v2037_v6, %v13219_v50  ;;  %v13223_v20 = vld [vmem:[#allocation37_spill] sm:$0xff]  ;;  %v13224_v52 = vld [vmem:[#allocation76_spill] sm:$0xff] }
 0x40a   :  { %2134 = vxpose.xlu1.b32.cont [15/16] (narrow) %v13220_v58, 16  ;;  %v13229_v0 = vld [vmem:[#allocation48_spill] sm:$0xff] }
 0x40b   :  { %v9834_v32 = vpack.c.bf16 %v2107_v24, %v2106_v53  ;;  %v9898_v36 = vpack.c.bf16 %v2321_v49, %v2320_v3  ;;  %v11677_v1 = vpack.c.bf16 %v2230_v18, %v2229_v26  ;;  %v11679_v30 = vpack.c.bf16 %v2444_v57, %v2443_v11  ;;  %v13225_v24 = vld [vmem:[#allocation90_spill] sm:$0xff]  ;;  %v13226_v18 = vld [vmem:[#allocation56_spill] sm:$0xff]  ;;  %v13228_v11 = vld [vmem:[#allocation77_spill] sm:$0xff] }
 0x40c   :  { %v2052_v12 = vpop.permute.xlu1 %2051  ;;  %v13227_v57 = vld [vmem:[#allocation58_spill] sm:$0xff] }
 0x40d   :  { %v2232_v60 = vmul.f32 %v13221_v38, %v2052_v12  ;;  %v2446_v62 = vmul.f32 %v13222_v5, %v2052_v12  ;;  %9835 = vmatprep.subr.bf16.mxu0 %v9834_v32  ;;  %9899 = vmatprep.subr.bf16.mxu1 %v9898_v36  ;;  %v2109_v50 = vmul.f32 %v13224_v52, %v2052_v12 }
 0x40e   :  { %2135 = vxpose.xlu1.b32.end [16/16] (narrow) %v13223_v20, 16  ;;  %9837 = vmatpush3.bf16.msra.mxu0 %v9834_v32  ;;  %v2323_v49 = vmul.f32 %v13225_v24, %v2052_v12  ;;  %v13232_v12 = vld [vmem:[#allocation60_spill] sm:$0xff]  ;;  %v13242_v20 = vld [vmem:[#allocation93_spill] sm:$0xff] }
 0x40f   :  { %9901 = vmatpush3.bf16.msra.mxu1 %v9898_v36  ;;  %v2072_v6 = vpop.permute.xlu0 %2071 }
 0x410   :  { %v2236_v53 = vmul.f32 %v13226_v18, %v2072_v6  ;;  %v2450_v26 = vmul.f32 %v13227_v57, %v2072_v6  ;;  %v2047_v3 = vpop.permute.xlu1 %2046  ;;  %v13233_v18 = vld [vmem:[#allocation62_spill] sm:$0xff] }
 0x411   :  { %v2108_v38 = vmul.f32 %v2047_v3, %v13228_v11  ;;  %v2231_v5 = vmul.f32 %v2047_v3, %v13229_v0  ;;  %v2322_v61 = vmul.f32 %v2047_v3, %v13230_v63  ;;  %v2445_v54 = vmul.f32 %v2047_v3, %v13231_v47  ;;  %v13241_v47 = vld [vmem:[#allocation53_spill] sm:$0xff] }
 0x413   :  { %v2082_v32 = vpop.permute.xlu0 %2081  ;;  %v9838_v36 = vpack.c.bf16 %v2109_v50, %v2108_v38  ;;  %v9902_v2 = vpack.c.bf16 %v2323_v49, %v2322_v61  ;;  %v11692_v51 = vpack.c.bf16 %v2232_v60, %v2231_v5  ;;  %v11694_v52 = vpack.c.bf16 %v2446_v62, %v2445_v54  ;;  %v13236_v50 = vld [vmem:[#allocation78_spill] sm:$0xff]  ;;  %v13237_v38 = vld [vmem:[#allocation92_spill] sm:$0xff] }
 0x414   :  { %v2238_v24 = vmul.f32 %v13232_v12, %v2082_v32  ;;  %v2452_v57 = vmul.f32 %v13233_v18, %v2082_v32  ;;  %v2062_v43 = vpop.permute.xlu1 %2061  ;;  %v13238_v62 = vld [vmem:[#allocation64_spill] sm:$0xff]  ;;  %v13239_v5 = vld [vmem:[#allocation70_spill] sm:$0xff]  ;;  %v13240_v18 = vld [vmem:[#allocation79_spill] sm:$0xff] }
 0x415   :  { %v2234_v11 = vmul.f32 %v13234_v16, %v2062_v43  ;;  %v2448_v0 = vmul.f32 %v13235_v56, %v2062_v43  ;;  %9839 = vmatprep.subr.bf16.mxu0 %v9838_v36  ;;  %9903 = vmatprep.subr.bf16.mxu1 %v9902_v2  ;;  %v2111_v61 = vmul.f32 %v13236_v50, %v2062_v43 }
 0x416   :  { %9841 = vmatpush3.bf16.msra.mxu0 %v9838_v36  ;;  %9905 = vmatpush3.bf16.msra.mxu1 %v9902_v2  ;;  %v2325_v60 = vmul.f32 %v13237_v38, %v2062_v43  ;;  %v13244_v43 = vld [vmem:[#allocation80_spill] sm:$0xff] }
 0x417   :  { %v2092_v63 = vpop.permute.xlu0 %2091  ;;  %v2113_v38 = vmul.f32 %v13244_v43, %v2072_v6 }
 0x418   :  { %v2240_v54 = vmul.f32 %v13238_v62, %v2092_v63  ;;  %v2454_v49 = vmul.f32 %v13239_v5, %v2092_v63  ;;  %v2057_v3 = vpop.permute.xlu1 %2056  ;;  %v13245_v62 = vld [vmem:[#allocation94_spill] sm:$0xff] }
 0x419   :  { %v2110_v12 = vmul.f32 %v2057_v3, %v13240_v18  ;;  %v2233_v16 = vmul.f32 %v2057_v3, %v13241_v47  ;;  %v2324_v56 = vmul.f32 %v2057_v3, %v13242_v20  ;;  %v2447_v58 = vmul.f32 %v2057_v3, %v13243_v48  ;;  %v13256_v48 = vld [vmem:[#allocation97_spill] sm:$0xff] }
 0x41a   :  { %v2327_v9 = vmul.f32 %v13245_v62, %v2072_v6 }
 0x41b   :  { %v9842_v36 = vpack.c.bf16 %v2111_v61, %v2110_v12  ;;  %v9906_v2 = vpack.c.bf16 %v2325_v60, %v2324_v56  ;;  %v11708_v46 = vpack.c.bf16 %v2234_v11, %v2233_v16  ;;  %v11710_v50 = vpack.c.bf16 %v2448_v0, %v2447_v58  ;;  %v13250_v56 = vld [vmem:[#allocation68_spill] sm:$0xff]  ;;  %v13252_v61 = vld [vmem:[#allocation82_spill] sm:$0xff] }
 0x41c   :  { %v2067_v5 = vpop.permute.xlu1 %2066  ;;  %v13251_v12 = vld [vmem:[#allocation72_spill] sm:$0xff] }
 0x41d   :  { %v2102_v45 = vpop.permute.xlu0 %2101  ;;  %v2112_v18 = vmul.f32 %v2067_v5, %v13246_v4  ;;  %v2235_v47 = vmul.f32 %v2067_v5, %v13247_v42  ;;  %v2326_v20 = vmul.f32 %v2067_v5, %v13248_v44  ;;  %v2449_v3 = vmul.f32 %v2067_v5, %v13249_v41  ;;  %9843 = vmatprep.subr.bf16.mxu0 %v9842_v36  ;;  %v13253_v60 = vld [vmem:[#allocation96_spill] sm:$0xff]  ;;  %v13254_v5 = vld [vmem:[#allocation83_spill] sm:$0xff]  ;;  %v13255_v42 = vld [vmem:[#allocation61_spill] sm:$0xff] }
 0x41e   :  { %v2242_v16 = vmul.f32 %v13250_v56, %v2102_v45  ;;  %v2456_v0 = vmul.f32 %v13251_v12, %v2102_v45  ;;  %9907 = vmatprep.subr.bf16.mxu1 %v9906_v2  ;;  %9845 = vmatpush3.bf16.msra.mxu0 %v9842_v36  ;;  %v2115_v4 = vmul.f32 %v13252_v61, %v2082_v32 }
 0x41f   :  { %9909 = vmatpush3.bf16.msra.mxu1 %v9906_v2  ;;  %v9846_v58 = vpack.c.bf16 %v2113_v38, %v2112_v18  ;;  %v9910_v6 = vpack.c.bf16 %v2327_v9, %v2326_v20  ;;  %v11720_v11 = vpack.c.bf16 %v2236_v53, %v2235_v47  ;;  %v2329_v62 = vmul.f32 %v13253_v60, %v2082_v32  ;;  %v13258_v2 = vld [vmem:[#allocation84_spill] sm:$0xff]  ;;  %v13259_v38 = vld [vmem:[#allocation98_spill] sm:$0xff]  ;;  %v13261_v60 = vld [vmem:[#allocation65_spill] sm:$0xff] }
 0x420   :  { %v2077_v43 = vpop.permute.xlu1 %2076  ;;  %v11724_v44 = vpack.c.bf16 %v2450_v26, %v2449_v3  ;;  %v2117_v32 = vmul.f32 %v13258_v2, %v2092_v63  ;;  %v2331_v26 = vmul.f32 %v13259_v38, %v2092_v63  ;;  %v13260_v3 = vld [vmem:[#allocation85_spill] sm:$0xff] }
 0x421   :  { %v2114_v41 = vmul.f32 %v2077_v43, %v13254_v5  ;;  %v2237_v56 = vmul.f32 %v2077_v43, %v13255_v42  ;;  %v2328_v12 = vmul.f32 %v2077_v43, %v13256_v48  ;;  %v2451_v36 = vmul.f32 %v2077_v43, %v13257_v40  ;;  %9847 = vmatprep.subr.bf16.mxu0 %v9846_v58  ;;  %v13262_v5 = vld [vmem:[#allocation99_spill] sm:$0xff]  ;;  %v13267_v2 = vld [vmem:[#allocation69_spill] sm:$0xff] }
 0x422   :  { %9911 = vmatprep.subr.bf16.mxu1 %v9910_v6  ;;  %9849 = vmatpush3.bf16.msra.mxu0 %v9846_v58  ;;  %v13263_v40 = vld [vmem:[#allocation71_spill] sm:$0xff]  ;;  %v13265_v58 = vld [vmem:[#allocation100_spill] sm:$0xff] }
 0x423   :  { %9913 = vmatpush3.bf16.msra.mxu1 %v9910_v6  ;;  %v9850_v47 = vpack.c.bf16 %v2115_v4, %v2114_v41  ;;  %v9914_v9 = vpack.c.bf16 %v2329_v62, %v2328_v12  ;;  %v9882_v53 = vpack.c.bf16 %v2238_v24, %v2237_v56  ;;  %v11732_v20 = vpack.c.bf16 %v2452_v57, %v2451_v36  ;;  %v13264_v12 = vld [vmem:[#allocation86_spill] sm:$0xff]  ;;  %v13266_v62 = vld [vmem:[#allocation87_spill] sm:$0xff] }
 0x424   :  { %v2087_v18 = vpop.permute.xlu1 %2086  ;;  %v2119_v63 = vmul.f32 %v13264_v12, %v2102_v45  ;;  %v2333_v57 = vmul.f32 %v13265_v58, %v2102_v45 }
 0x425   :  { %v2116_v61 = vmul.f32 %v2087_v18, %v13260_v3  ;;  %v2239_v48 = vmul.f32 %v2087_v18, %v13261_v60  ;;  %v2330_v43 = vmul.f32 %v2087_v18, %v13262_v5  ;;  %v2453_v42 = vmul.f32 %v2087_v18, %v13263_v40  ;;  %9851 = vmatprep.subr.bf16.mxu0 %v9850_v47  ;;  %v13268_v3 = vld [vmem:[#allocation101_spill] sm:$0xff] }
 0x426   :  { %9915 = vmatprep.subr.bf16.mxu1 %v9914_v9  ;;  %9853 = vmatpush3.bf16.msra.mxu0 %v9850_v47  ;;  %v13269_v18 = vld [vmem:[#allocation73_spill] sm:$0xff] }
 0x427   :  { %9917 = vmatpush3.bf16.msra.mxu1 %v9914_v9  ;;  %v9854_v41 = vpack.c.bf16 %v2117_v32, %v2116_v61  ;;  %v9918_v24 = vpack.c.bf16 %v2331_v26, %v2330_v43  ;;  %v9886_v56 = vpack.c.bf16 %v2240_v54, %v2239_v48  ;;  %v9950_v4 = vpack.c.bf16 %v2454_v49, %v2453_v42  ;;  %v13274_v26 = vld [vmem:[#allocation49_spill] sm:$0xff]  ;;  %v13276_v43 = vld [vmem:[#allocation66_spill] sm:$0xff] }
 0x428   :  { %v2097_v6 = vpop.permute.xlu1 %2096  ;;  %v2958_v61 = vld [vmem:[%s12867_s19] sm:$0xff] }
 0x429   :  { %v2118_v36 = vmul.f32 %v2097_v6, %v13266_v62  ;;  %v2241_v38 = vmul.f32 %v2097_v6, %v13267_v2  ;;  %v2332_v5 = vmul.f32 %v2097_v6, %v13268_v3  ;;  %v2455_v40 = vmul.f32 %v2097_v6, %v13269_v18  ;;  %9855 = vmatprep.subr.bf16.mxu0 %v9854_v41  ;;  %v7629_v48 = vld [vmem:[%s12866_s18] ss:$0 sm:$0xff] }
 0x42a   :  { %9919 = vmatprep.subr.bf16.mxu1 %v9918_v24  ;;  %9857 = vmatpush3.bf16.msra.mxu0 %v9854_v41  ;;  %v11822_v41 = vadd.f32 %v13276_v43, %v7629_v48  ;;  %v7725_v62 = vld [vmem:[%s12868_s20] ss:$0 sm:$0xff] }
 0x42b   :  { %9921 = vmatpush3.bf16.msra.mxu1 %v9918_v24  ;;  %v9858_v47 = vpack.c.bf16 %v2119_v63, %v2118_v36  ;;  %v9922_v54 = vpack.c.bf16 %v2333_v57, %v2332_v5  ;;  %v9890_v9 = vpack.c.bf16 %v2242_v16, %v2241_v38  ;;  %v9954_v32 = vpack.c.bf16 %v2456_v0, %v2455_v40  ;;  %v2533_v40 = vld [vmem:[%s12861_s13] sm:$0x3]  ;;  %v13278_v24 = vld [vmem:[#allocation67_spill] sm:$0xff] }
 0x42c   :  { %v2783_v0 = vld [vmem:[%s12863_s15] sm:$0x3]  ;;  %13277 = vst [vmem:[#allocation76_spill] sm:$0xff] %v11822_v41 }
 0x42d   :  { %9859 = vmatprep.subr.bf16.mxu0 %v9858_v47  ;;  %9923 = vmatprep.subr.bf16.mxu1 %v9922_v54 }
 0x42e   :  { %9861 = vmatpush3.bf16.msra.mxu0 %v9858_v47 }
 0x42f   :  { %9925 = vmatpush3.bf16.msra.mxu1 %v9922_v54  ;;  %9863 = vmatprep.subr.bf16.mxu0 %v11663_v55 }
 0x430   :  { %9085 = vmatprep.subr.msk.mxu1 %vm154_vm0, %v2533_v40 }
 0x43c   :  { %v11745_v42 = vpop.trf.xlu0 }
 0x43d   :  { %13270 = vst [vmem:[#allocation74_spill] sm:$0xff] %v11745_v42  ;;  %9047 = vmatprep.mubr.f32.mxu1 %v11745_v42 }
 0x440   :  { %v11748_v45 = vpop.trf.xlu0 }
 0x441   :  { %13271 = vst [vmem:[#allocation88_spill] sm:$0xff] %v11748_v45  ;;  %9048 = vmatmul.mubr.f32.vlgmr.msra.gmra.mrb[52].mxu1 %v11748_v45 }
 0x442   :  { %9086 = vmatpush3.msk.msra.mxu1 %vm154_vm0, %v2533_v40  ;;  %v10736_v40 = vld [vmem:[%s13162_s0] sm:$0xff] }
 0x452   :  { %v11751_v49 = vpop.trf.xlu1 }
 0x453   :  { %13272 = vst [vmem:[#allocation75_spill] sm:$0xff] %v11751_v49  ;;  %8977 = vmatprep.mubr.f32.mxu0 %v11751_v49 }
 0x456   :  { %v11754_v16 = vpop.trf.xlu1 }
 0x457   :  { %13273 = vst [vmem:[#allocation89_spill] sm:$0xff] %v11754_v16  ;;  %8978 = vmatmul.mubr.f32.vlgmr.msra.gmra.mrb[48].mxu0 %v11754_v16 }
 0x458   :  { %9865 = vmatpush3.bf16.msra.mxu0 %v11663_v55  ;;  %9012 = vmatprep.mubr.f32.mxu0 %v11751_v49 }
 0x459   :  { %9867 = vmatprep.subr.bf16.mxu0 %v11677_v1 }
 0x45c   :  { %9869 = vmatpush3.bf16.msra.mxu0 %v11677_v1 }
 0x45d   :  { %9871 = vmatprep.subr.bf16.mxu0 %v11692_v51 }
 0x460   :  { %9873 = vmatpush3.bf16.msra.mxu0 %v11692_v51 }
 0x461   :  { %9875 = vmatprep.subr.bf16.mxu0 %v11708_v46 }
 0x464   :  { %9877 = vmatpush3.bf16.msra.mxu0 %v11708_v46  ;;  %v2532_v46 = vld [vmem:[%s12860_s12] sm:$0xff] }
 0x465   :  { %9879 = vmatprep.subr.bf16.mxu0 %v11720_v11  ;;  %9090 = vmatprep.subr.mxu1 %v2532_v46 }
 0x468   :  { %9881 = vmatpush3.bf16.msra.mxu0 %v11720_v11  ;;  %v2870_v11 = vld [vmem:[%s12864_s16] sm:$0xff] }
 0x469   :  { %9883 = vmatprep.subr.bf16.mxu0 %v9882_v53 }
 0x46c   :  { %9885 = vmatpush3.bf16.msra.mxu0 %v9882_v53 }
 0x46d   :  { %9887 = vmatprep.subr.bf16.mxu0 %v9886_v56 }
 0x470   :  { %9889 = vmatpush3.bf16.msra.mxu0 %v9886_v56  ;;  %v11825_v56 = vadd.f32 %v7629_v48, %v13278_v24 }
 0x471   :  { %9891 = vmatprep.subr.bf16.mxu0 %v9890_v9 }
 0x472   :  { %13279 = vst [vmem:[#allocation90_spill] sm:$0xff] %v11825_v56 }
 0x474   :  { %9893 = vmatpush3.bf16.msra.mxu0 %v9890_v9 }
 0x475   :  { %9927 = vmatprep.subr.bf16.mxu0 %v11665_v59 }
 0x477   :  { %9013 = vmatmul.mubr.f32.vlgmr.msra.gmra.mrb[50].mxu0 %v11754_v16 }
 0x478   :  { %9929 = vmatpush3.bf16.msra.mxu0 %v11665_v59  ;;  %9082 = vmatprep.mubr.f32.mxu0 %v11745_v42 }
 0x479   :  { %9931 = vmatprep.subr.bf16.mxu0 %v11679_v30 }
 0x47c   :  { %9933 = vmatpush3.bf16.msra.mxu0 %v11679_v30 }
 0x47d   :  { %9935 = vmatprep.subr.bf16.mxu0 %v11694_v52 }
 0x480   :  { %9937 = vmatpush3.bf16.msra.mxu0 %v11694_v52 }
 0x481   :  { %9939 = vmatprep.subr.bf16.mxu0 %v11710_v50 }
 0x484   :  { %9941 = vmatpush3.bf16.msra.mxu0 %v11710_v50  ;;  %v2699_v50 = vld [vmem:[%s12862_s14] sm:$0xff] }
 0x485   :  { %9943 = vmatprep.subr.bf16.mxu0 %v11724_v44 }
 0x488   :  { %9945 = vmatpush3.bf16.msra.mxu0 %v11724_v44 }
 0x489   :  { %9947 = vmatprep.subr.bf16.mxu0 %v11732_v20 }
 0x48c   :  { %9949 = vmatpush3.bf16.msra.mxu0 %v11732_v20  ;;  %v13275_v20 = vld [vmem:[#allocation47_spill] sm:$0xff] }
 0x48d   :  { %9951 = vmatprep.subr.bf16.mxu0 %v9950_v4 }
 0x490   :  { %9953 = vmatpush3.bf16.msra.mxu0 %v9950_v4 }
 0x491   :  { %9955 = vmatprep.subr.bf16.mxu0 %v9954_v32 }
 0x494   :  { %9957 = vmatpush3.bf16.msra.mxu0 %v9954_v32  ;;  %v10735_v32 = vld [vmem:[%s12855_s7] sm:$0xff] }
 0x495   :  { %9110 = vmatprep.subr.mxu0 %v2958_v61 }
 0x497   :  { %9083 = vmatmul.mubr.f32.vlgmr.msra.gmra.mrb[52].mxu0 %v11748_v45 }
 0x498   :  { %9111 = vmatpush3.msra.mxu0 %v2958_v61 }
 0x514   :  { %v9049_v1 = vpop.f32.mrb[52].mxu1 }
 0x515   :  { %v2432_v51 = vpop.f32.mrb[53].mxu1 }
 0x52a   :  { %v8979_v55 = vpop.f32.mrb[48].mxu0 }
 0x52b   :  { %v2218_v59 = vpop.f32.mrb[49].mxu0 }
 0x54a   :  { %v9014_v30 = vpop.f32.mrb[50].mxu0 }
 0x54b   :  { %v2309_v52 = vpop.f32.mrb[51].mxu0 }
 0x54c   :  { %9087 = vmatprep.mubr.msk.f32.mxu1 %vm147_vm1, %v2309_v52  ;;  %v13286_v52 = vld [vmem:[#allocation35_spill] sm:$0xff] }
 0x54d   :  { %9088 = vmatmul.mubr.msk.f32.vlgmr.msra.gmra.mrb[54].mxu1 %vm147_vm1, %v9014_v30  ;;  %v13285_v30 = vld [vmem:[#allocation31_spill] sm:$0xff] }
 0x54e   :  { %9092 = vmatprep.mubr.msk.f32.mxu1 %vm1417_vm3, %v2218_v59  ;;  %9091 = vmatpush3.msra.mxu1 %v2532_v46  ;;  %v13280_v46 = vld [vmem:[#allocation27_spill] sm:$0xff]  ;;  %v13284_v59 = vld [vmem:[#allocation34_spill] sm:$0xff] }
 0x54f   :  { %9095 = vmatprep.subr.mxu1 %v2699_v50 }
 0x555   :  { %9093 = vmatmul.mubr.msk.f32.vlgmr.msra.gmra.mrb[54].mxu1 %vm1417_vm3, %v8979_v55  ;;  %v13283_v55 = vld [vmem:[#allocation29_spill] sm:$0xff] }
 0x556   :  { %9096 = vmatpush3.msra.mxu1 %v2699_v50  ;;  %9097 = vmatprep.mubr.msk.f32.mxu1 %vm1417_vm3, %v2432_v51  ;;  %v13282_v51 = vld [vmem:[#allocation30_spill] sm:$0xff]  ;;  %v13287_v50 = vld [vmem:[#allocation32_spill] sm:$0xff] }
 0x557   :  { %9100 = vmatprep.subr.msk.mxu1 %vm154_vm0, %v2783_v0 }
 0x55d   :  { %9098 = vmatmul.mubr.msk.f32.vlgmr.msra.gmra.mrb[54].mxu1 %vm1417_vm3, %v9049_v1  ;;  %v13281_v1 = vld [vmem:[#allocation28_spill] sm:$0xff] }
 0x55e   :  { %9101 = vmatpush3.msk.msra.mxu1 %vm154_vm0, %v2783_v0  ;;  %v13288_v0 = vld [vmem:[#allocation36_spill] sm:$0xff] }
 0x55f   :  { %9105 = vmatprep.subr.mxu1 %v2870_v11 }
 0x56a   :  { %v9084_v44 = vpop.f32.mrb[52].mxu0 }
 0x56b   :  { %v2523_v53 = vpop.f32.mrb[53].mxu0 }
 0x56c   :  { %9102 = vmatprep.mubr.msk.f32.mxu1 %vm147_vm1, %v2523_v53 }
 0x56d   :  { %9103 = vmatmul.mubr.msk.f32.vlgmr.msra.gmra.mrb[54].mxu1 %vm147_vm1, %v9084_v44  ;;  %v13290_v44 = vld [vmem:[#allocation37_spill] sm:$0xff] }
 0x56e   :  { %9106 = vmatpush3.msra.mxu1 %v2870_v11  ;;  %9107 = vmatprep.mubr.msk.f32.mxu1 %vm1417_vm3, %v13274_v26  ;;  %v13289_v11 = vld [vmem:[#allocation33_spill] sm:$0xff] }
 0x575   :  { %9108 = vmatmul.mubr.msk.f32.vlgmr.msra.gmra.mrb[54].mxu1 %vm1417_vm3, %v13275_v20 }
 0x576   :  { %9147 = vmatprep.mubr.msk.f32.mxu1 %vm235_vm2, %v10945_v13 }
 0x648   :  { %v9109_v12 = vpop.f32.mrb[54].mxu1 }
 0x649   :  { %v2955_v63 = vadd.f32 %v9109_v12, %v11822_v41  ;;  %v2943_v58 = vpop.f32.mrb[55].mxu1 }
 0x64a   :  { %v2954_v57 = vadd.f32 %v2943_v58, %v11825_v56 }
 0x64c   :  { %10483 = vtanh.f32 %v2954_v57 }
 0x64d   :  { %10485 = vtanh.f32 %v2955_v63 }
 0x656   :  { %v10484_v6 = vpop.eup %10483 }
 0x657   :  { %v10486_v4 = vpop.eup %10485  ;;  %9112 = vmatprep.mubr.msk.f32.mxu0 %vm1417_vm3, %v10484_v6 }
 0x658   :  { %9113 = vmatmul.mubr.msk.f32.vlgmr.msra.gmra.mrb[54].mxu0 %vm1417_vm3, %v10486_v4 }
 0x659   :  { %9119 = vmatprep.mubr.msk.f32.mxu0 %vm235_vm2, %v10926_v7 }
 0x72b   :  { %v9114_v36 = vpop.f32.mrb[54].mxu0 }
 0x72c   :  { %v3044_v38 = vadd.f32 %v9114_v36, %v7725_v62  ;;  %v3038_v3 = vpop.f32.mrb[55].mxu0 }
 0x72d   :  { %v3039_v5 = vadd.f32 %v7725_v62, %v3038_v3 }
 0x72e   :  { %10487 = vtanh.f32 %v3044_v38 }
 0x72f   :  { %10489 = vtanh.f32 %v3039_v5 }
 0x738   :  { %v11836_v47 = vpop.eup %10487 }
 0x739   :  { %v11838_v54 = vpop.eup %10489 }
 0x73a   :  { %v9958_v9 = vpack.c.bf16 %v11836_v47, %v11838_v54 }
 0x73c   :  { %9959 = vmatprep.subr.bf16.mxu0 %v9958_v9  ;;  %9963 = vmatprep.subr.bf16.mxu1 %v9958_v9 }
 0x73d   :  { %9961 = vmatpush3.bf16.msra.mxu0 %v9958_v9  ;;  %9965 = vmatpush3.bf16.msra.mxu1 %v9958_v9 }
 0x73e   :  { %9171 = vmatprep.subr.mxu0 %v10735_v32 }
 0x740   :  { %9120 = vmatmul.mubr.msk.f32.vlgmr.msra.gmra.mrb[56].mxu0 %vm235_vm2, %v10930_v8  ;;  %9148 = vmatmul.mubr.msk.f32.vlgmr.msra.gmra.mrb[56].mxu1 %vm235_vm2, %v10947_v14  ;;  %v13299_v8 = vld [vmem:[#allocation109_spill] sm:$0xff] }
 0x741   :  { %9122 = vmatprep.mubr.msk.f32.mxu0 %vm235_vm2, %v10937_v10  ;;  %9150 = vmatprep.mubr.msk.f32.mxu1 %vm235_vm2, %v10949_v15  ;;  %v13296_v10 = vld [vmem:[#allocation108_spill] sm:$0xff] }
 0x742   :  { %9172 = vmatpush3.msra.mxu0 %v10735_v32 }
 0x743   :  { %9197 = vmatprep.subr.mxu0 %v10736_v40 }
 0x744   :  { %9123 = vmatmul.mubr.msk.f32.gmra.mrb[58].mxu0 %vm235_vm2, %v10956_v17  ;;  %9151 = vmatmul.mubr.msk.f32.gmra.mrb[58].mxu1 %vm235_vm2, %v10973_v21  ;;  %v13295_v21 = vld [vmem:[#allocation107_spill] sm:$0xff] }
 0x745   :  { %9125 = vmatprep.mubr.msk.f32.mxu0 %vm235_vm2, %v10964_v19  ;;  %9153 = vmatprep.mubr.msk.f32.mxu1 %vm235_vm2, %v10977_v22 }
 0x748   :  { %9126 = vmatmul.mubr.msk.f32.gmra.mrb[60].mxu0 %vm235_vm2, %v10982_v23  ;;  %9154 = vmatmul.mubr.msk.f32.gmra.mrb[60].mxu1 %vm235_vm2, %v10996_v27  ;;  %v13294_v23 = vld [vmem:[#allocation106_spill] sm:$0xff] }
 0x749   :  { %9128 = vmatprep.mubr.msk.f32.mxu0 %vm235_vm2, %v10989_v25  ;;  %9156 = vmatprep.mubr.msk.f32.mxu1 %vm235_vm2, %v11000_v28  ;;  %v13293_v28 = vld [vmem:[#allocation104_spill] sm:$0xff] }
 0x74c   :  { %9129 = vmatmul.mubr.msk.f32.gmra.mrb[62].mxu0 %vm235_vm2, %v11004_v29  ;;  %9157 = vmatmul.mubr.msk.f32.gmra.mrb[62].mxu1 %vm235_vm2, %v11018_v33 }
 0x74d   :  { %9131 = vmatprep.mubr.msk.f32.mxu0 %vm235_vm2, %v11011_v31  ;;  %9159 = vmatprep.mubr.msk.f32.mxu1 %vm235_vm2, %v11022_v34  ;;  %v13292_v31 = vld [vmem:[#allocation103_spill] sm:$0xff] }
 0x750   :  { %9132 = vmatmul.mubr.msk.f32.gmra.mrb[64].mxu0 %vm235_vm2, %v11026_v35  ;;  %9160 = vmatmul.mubr.msk.f32.gmra.mrb[64].mxu1 %vm235_vm2, %v11040_v39  ;;  %v13291_v39 = vld [vmem:[#allocation102_spill] sm:$0xff] }
 0x751   :  { %9134 = vmatprep.mubr.msk.f32.mxu0 %vm235_vm2, %v11033_v37  ;;  %9162 = vmatprep.mubr.msk.f32.mxu1 %vm235_vm2, %v13280_v46 }
 0x754   :  { %9135 = vmatmul.mubr.msk.f32.gmra.mrb[66].mxu0 %vm235_vm2, %v13281_v1  ;;  %9163 = vmatmul.mubr.msk.f32.gmra.mrb[66].mxu1 %vm235_vm2, %v13282_v51 }
 0x755   :  { %9137 = vmatprep.mubr.msk.f32.mxu0 %vm235_vm2, %v13283_v55  ;;  %9165 = vmatprep.mubr.msk.f32.mxu1 %vm235_vm2, %v13284_v59 }
 0x758   :  { %9138 = vmatmul.mubr.msk.f32.gmra.mrb[68].mxu0 %vm235_vm2, %v13285_v30  ;;  %9166 = vmatmul.mubr.msk.f32.gmra.mrb[68].mxu1 %vm235_vm2, %v13286_v52 }
 0x759   :  { %9140 = vmatprep.mubr.msk.f32.mxu0 %vm235_vm2, %v13287_v50  ;;  %9168 = vmatprep.mubr.msk.f32.mxu1 %vm235_vm2, %v13288_v0 }
 0x75c   :  { %9141 = vmatmul.mubr.msk.f32.gmra.mrb[70].mxu0 %vm235_vm2, %v13289_v11  ;;  %9169 = vmatmul.mubr.msk.f32.gmra.mrb[70].mxu1 %vm235_vm2, %v13290_v44 }
 0x75d   :  { %9255 = vmatprep.mubr.f32.mxu1 %v11751_v49 }
 0x813   :  { %v11909_v53 = vpop.f32.mrb[56].mxu0  ;;  %v11911_v26 = vpop.f32.mrb[56].mxu1 }
 0x814   :  { %v11913_v20 = vpop.f32.mrb[57].mxu0  ;;  %v11915_v61 = vpop.f32.mrb[57].mxu1 }
 0x815   :  { %9173 = vmatprep.mubr.msk.f32.mxu0 %vm1417_vm3, %v11913_v20 }
 0x816   :  { %9174 = vmatmul.mubr.msk.f32.vlgmr.msra.gmra.mrb[72].mxu0 %vm1417_vm3, %v11909_v53 }
 0x817   :  { %v11921_v48 = vpop.f32.mrb[58].mxu0  ;;  %9198 = vmatpush3.msra.mxu0 %v10736_v40  ;;  %v11923_v43 = vpop.f32.mrb[58].mxu1 }
 0x818   :  { %v11925_v24 = vpop.f32.mrb[59].mxu0  ;;  %v11927_v12 = vpop.f32.mrb[59].mxu1 }
 0x819   :  { %9176 = vmatprep.mubr.msk.f32.mxu0 %vm1417_vm3, %v11925_v24 }
 0x81a   :  { %9177 = vmatmul.mubr.msk.f32.gmra.mrb[74].mxu0 %vm1417_vm3, %v11921_v48 }
 0x81b   :  { %v11933_v63 = vpop.f32.mrb[60].mxu0  ;;  %v11935_v58 = vpop.f32.mrb[60].mxu1 }
 0x81c   :  { %v11937_v57 = vpop.f32.mrb[61].mxu0  ;;  %v11939_v6 = vpop.f32.mrb[61].mxu1 }
 0x81d   :  { %9179 = vmatprep.mubr.msk.f32.mxu0 %vm1417_vm3, %v11937_v57 }
 0x81e   :  { %9180 = vmatmul.mubr.msk.f32.gmra.mrb[76].mxu0 %vm1417_vm3, %v11933_v63 }
 0x81f   :  { %v11945_v4 = vpop.f32.mrb[62].mxu0  ;;  %v11947_v62 = vpop.f32.mrb[62].mxu1 }
 0x820   :  { %v11949_v36 = vpop.f32.mrb[63].mxu0  ;;  %v11951_v38 = vpop.f32.mrb[63].mxu1 }
 0x821   :  { %9182 = vmatprep.mubr.msk.f32.mxu0 %vm1417_vm3, %v11949_v36 }
 0x822   :  { %9183 = vmatmul.mubr.msk.f32.gmra.mrb[78].mxu0 %vm1417_vm3, %v11945_v4 }
 0x823   :  { %v11957_v3 = vpop.f32.mrb[64].mxu0  ;;  %v11959_v5 = vpop.f32.mrb[64].mxu1 }
 0x824   :  { %v11961_v9 = vpop.f32.mrb[65].mxu0  ;;  %v11963_v32 = vpop.f32.mrb[65].mxu1 }
 0x825   :  { %9185 = vmatprep.mubr.msk.f32.mxu0 %vm1417_vm3, %v11961_v9 }
 0x826   :  { %9186 = vmatmul.mubr.msk.f32.gmra.mrb[80].mxu0 %vm1417_vm3, %v11957_v3 }
 0x827   :  { %v11969_v40 = vpop.f32.mrb[66].mxu0  ;;  %v11971_v44 = vpop.f32.mrb[66].mxu1 }
 0x828   :  { %v11973_v11 = vpop.f32.mrb[67].mxu0  ;;  %v11975_v0 = vpop.f32.mrb[67].mxu1 }
 0x829   :  { %9188 = vmatprep.mubr.msk.f32.mxu0 %vm1417_vm3, %v11973_v11 }
 0x82a   :  { %9189 = vmatmul.mubr.msk.f32.gmra.mrb[82].mxu0 %vm1417_vm3, %v11969_v40 }
 0x82b   :  { %v11981_v50 = vpop.f32.mrb[68].mxu0  ;;  %v11983_v52 = vpop.f32.mrb[68].mxu1 }
 0x82c   :  { %v11985_v30 = vpop.f32.mrb[69].mxu0  ;;  %v11987_v59 = vpop.f32.mrb[69].mxu1 }
 0x82d   :  { %9191 = vmatprep.mubr.msk.f32.mxu0 %vm1417_vm3, %v11985_v30 }
 0x82e   :  { %9192 = vmatmul.mubr.msk.f32.gmra.mrb[84].mxu0 %vm1417_vm3, %v11981_v50 }
 0x82f   :  { %v11993_v55 = vpop.f32.mrb[70].mxu0  ;;  %v11995_v51 = vpop.f32.mrb[70].mxu1 }
 0x830   :  { %v11997_v1 = vpop.f32.mrb[71].mxu0  ;;  %v11999_v46 = vpop.f32.mrb[71].mxu1 }
 0x831   :  { %9194 = vmatprep.mubr.msk.f32.mxu0 %vm1417_vm3, %v11997_v1 }
 0x832   :  { %9195 = vmatmul.mubr.msk.f32.gmra.mrb[86].mxu0 %vm1417_vm3, %v11993_v55 }
 0x833   :  { %9199 = vmatprep.mubr.msk.f32.mxu0 %vm1417_vm3, %v11915_v61 }
 0x836   :  { %9200 = vmatmul.mubr.msk.f32.vlgmr.msra.gmra.mrb[72].mxu0 %vm1417_vm3, %v11911_v26 }
 0x837   :  { %9202 = vmatprep.mubr.msk.f32.mxu0 %vm1417_vm3, %v11927_v12 }
 0x83a   :  { %9203 = vmatmul.mubr.msk.f32.gmra.mrb[74].mxu0 %vm1417_vm3, %v11923_v43 }
 0x83b   :  { %9205 = vmatprep.mubr.msk.f32.mxu0 %vm1417_vm3, %v11939_v6 }
 0x83e   :  { %9206 = vmatmul.mubr.msk.f32.gmra.mrb[76].mxu0 %vm1417_vm3, %v11935_v58 }
 0x83f   :  { %9208 = vmatprep.mubr.msk.f32.mxu0 %vm1417_vm3, %v11951_v38 }
 0x842   :  { %9209 = vmatmul.mubr.msk.f32.gmra.mrb[78].mxu0 %vm1417_vm3, %v11947_v62 }
 0x843   :  { %9211 = vmatprep.mubr.msk.f32.mxu0 %vm1417_vm3, %v11963_v32 }
 0x846   :  { %9212 = vmatmul.mubr.msk.f32.gmra.mrb[80].mxu0 %vm1417_vm3, %v11959_v5 }
 0x847   :  { %9214 = vmatprep.mubr.msk.f32.mxu0 %vm1417_vm3, %v11975_v0 }
 0x84a   :  { %9215 = vmatmul.mubr.msk.f32.gmra.mrb[82].mxu0 %vm1417_vm3, %v11971_v44 }
 0x84b   :  { %9217 = vmatprep.mubr.msk.f32.mxu0 %vm1417_vm3, %v11987_v59 }
 0x84e   :  { %9218 = vmatmul.mubr.msk.f32.gmra.mrb[84].mxu0 %vm1417_vm3, %v11983_v52 }
 0x84f   :  { %9220 = vmatprep.mubr.msk.f32.mxu0 %vm1417_vm3, %v11999_v46 }
 0x852   :  { %9221 = vmatmul.mubr.msk.f32.gmra.mrb[86].mxu0 %vm1417_vm3, %v11995_v51 }
 0x853   :  { %9325 = vmatprep.mubr.f32.mxu0 %v11745_v42 }
 0x909   :  { %v9201_v37 = vpop.f32.mrb[72].mxu0 }
 0x90a   :  { %v3726_v35 = vadd.f32 %v9201_v37, %v13291_v39  ;;  %v3646_v34 = vpop.f32.mrb[73].mxu0 }
 0x90b   :  { %v3725_v33 = vadd.f32 %v3646_v34, %v13292_v31 }
 0x90c   :  { %10491 = vtanh.f32 %v3726_v35  ;;  %v13297_v35 = vld [vmem:[#allocation110_spill] sm:$0xff] }
 0x90d   :  { %10493 = vtanh.f32 %v3725_v33  ;;  %v9204_v29 = vpop.f32.mrb[74].mxu0 }
 0x90e   :  { %v3728_v25 = vadd.f32 %v9204_v29, %v13293_v28  ;;  %v3656_v27 = vpop.f32.mrb[75].mxu0  ;;  %v13298_v29 = vld [vmem:[#allocation111_spill] sm:$0xff] }
 0x90f   :  { %v3727_v22 = vadd.f32 %v3656_v27, %v13294_v23 }
 0x910   :  { %10495 = vtanh.f32 %v3728_v25 }
 0x911   :  { %10497 = vtanh.f32 %v3727_v22  ;;  %v9207_v19 = vpop.f32.mrb[76].mxu0 }
 0x912   :  { %v3730_v17 = vadd.f32 %v9207_v19, %v13295_v21  ;;  %v3666_v15 = vpop.f32.mrb[77].mxu0  ;;  %v13301_v21 = vld [vmem:[#allocation113_spill] sm:$0xff] }
 0x913   :  { %v3729_v14 = vadd.f32 %v3666_v15, %v13296_v10 }
 0x914   :  { %10499 = vtanh.f32 %v3730_v17  ;;  %v13300_v17 = vld [vmem:[#allocation112_spill] sm:$0xff] }
 0x915   :  { %10501 = vtanh.f32 %v3729_v14  ;;  %v9210_v37 = vpop.f32.mrb[78].mxu0 }
 0x916   :  { %v10492_v34 = vpop.eup %10491  ;;  %v3732_v33 = vadd.f32 %v9210_v37, %v13297_v35  ;;  %v3676_v31 = vpop.f32.mrb[79].mxu0 }
 0x917   :  { %v10494_v39 = vpop.eup %10493  ;;  %v3731_v28 = vadd.f32 %v3676_v31, %v13298_v29  ;;  %v3758_v27 = vmul.f32 %v13299_v8, %v10492_v34  ;;  %v13303_v29 = vld [vmem:[#allocation115_spill] sm:$0xff] }
 0x918   :  { %10503 = vtanh.f32 %v3732_v33  ;;  %v3757_v22 = vmul.f32 %v13299_v8, %v10494_v39 }
 0x919   :  { %10505 = vtanh.f32 %v3731_v28  ;;  %v9213_v19 = vpop.f32.mrb[80].mxu0  ;;  %v3776_v25 = vsel %vm1417_vm3, %v3758_v27, 0.0  ;;  %v13302_v27 = vld [vmem:[#allocation114_spill] sm:$0xff] }
 0x91a   :  { %v10496_v15 = vpop.eup %10495  ;;  %v3734_v14 = vadd.f32 %v9213_v19, %v13300_v17  ;;  %3777 = vadd.xlane.f32.xlu1 %v3776_v25  ;;  %v3686_v10 = vpop.f32.mrb[81].mxu0  ;;  %v3773_v37 = vsel %vm1417_vm3, %v3757_v22, 0.0 }
 0x91b   :  { %v10498_v35 = vpop.eup %10497  ;;  %v3733_v23 = vadd.f32 %v3686_v10, %v13301_v21  ;;  %3774 = vadd.xlane.f32.xlu0 %v3773_v37  ;;  %v3760_v31 = vmul.f32 %v13299_v8, %v10496_v15  ;;  %v13305_v21 = vld [vmem:[#allocation117_spill] sm:$0xff] }
 0x91c   :  { %10507 = vtanh.f32 %v3734_v14  ;;  %v3759_v39 = vmul.f32 %v13299_v8, %v10498_v35 }
 0x91d   :  { %10509 = vtanh.f32 %v3733_v23  ;;  %v9216_v28 = vpop.f32.mrb[82].mxu0  ;;  %v3782_v34 = vsel %vm1417_vm3, %v3760_v31, 0.0  ;;  %v13304_v31 = vld [vmem:[#allocation116_spill] sm:$0xff] }
 0x91e   :  { %v10500_v33 = vpop.eup %10499  ;;  %v3736_v19 = vadd.f32 %v9216_v28, %v13302_v27  ;;  %3783 = vadd.xlane.f32.xlu1 %v3782_v34  ;;  %v3696_v25 = vpop.f32.mrb[83].mxu0  ;;  %v3779_v22 = vsel %vm1417_vm3, %v3759_v39, 0.0 }
 0x91f   :  { %v10502_v17 = vpop.eup %10501  ;;  %v3735_v10 = vadd.f32 %v3696_v25, %v13303_v29  ;;  %3780 = vadd.xlane.f32.xlu0 %v3779_v22  ;;  %v3762_v15 = vmul.f32 %v13299_v8, %v10500_v33  ;;  %v13307_v29 = vld [vmem:[#allocation119_spill] sm:$0xff] }
 0x920   :  { %10511 = vtanh.f32 %v3736_v19  ;;  %v3761_v35 = vmul.f32 %v13299_v8, %v10502_v17 }
 0x921   :  { %10513 = vtanh.f32 %v3735_v10  ;;  %v9219_v23 = vpop.f32.mrb[84].mxu0  ;;  %v3788_v14 = vsel %vm1417_vm3, %v3762_v15, 0.0  ;;  %v13306_v15 = vld [vmem:[#allocation118_spill] sm:$0xff] }
 0x922   :  { %v10504_v37 = vpop.eup %10503  ;;  %v3738_v28 = vadd.f32 %v9219_v23, %v13304_v31  ;;  %3789 = vadd.xlane.f32.xlu1 %v3788_v14  ;;  %v3706_v34 = vpop.f32.mrb[85].mxu0  ;;  %v3785_v39 = vsel %vm1417_vm3, %v3761_v35, 0.0 }
 0x923   :  { %v10506_v27 = vpop.eup %10505  ;;  %v3737_v25 = vadd.f32 %v3706_v34, %v13305_v21  ;;  %3786 = vadd.xlane.f32.xlu0 %v3785_v39  ;;  %v3764_v33 = vmul.f32 %v13299_v8, %v10504_v37 }
 0x924   :  { %10515 = vtanh.f32 %v3738_v28  ;;  %v3763_v17 = vmul.f32 %v13299_v8, %v10506_v27 }
 0x925   :  { %10517 = vtanh.f32 %v3737_v25  ;;  %v9222_v19 = vpop.f32.mrb[86].mxu0  ;;  %v3794_v22 = vsel %vm1417_vm3, %v3764_v33, 0.0 }
 0x926   :  { %v10508_v10 = vpop.eup %10507  ;;  %v3740_v23 = vadd.f32 %v9222_v19, %v13306_v15  ;;  %3795 = vadd.xlane.f32.xlu1 %v3794_v22  ;;  %v3716_v14 = vpop.f32.mrb[87].mxu0  ;;  %v3791_v35 = vsel %vm1417_vm3, %v3763_v17, 0.0 }
 0x927   :  { %v10510_v31 = vpop.eup %10509  ;;  %v3739_v34 = vadd.f32 %v3716_v14, %v13307_v29  ;;  %3792 = vadd.xlane.f32.xlu0 %v3791_v35  ;;  %v3766_v37 = vmul.f32 %v13299_v8, %v10508_v10 }
 0x928   :  { %10519 = vtanh.f32 %v3740_v23  ;;  %v3765_v27 = vmul.f32 %v13299_v8, %v10510_v31 }
 0x929   :  { %10521 = vtanh.f32 %v3739_v34  ;;  %v3800_v28 = vsel %vm1417_vm3, %v3766_v37, 0.0 }
 0x92a   :  { %v10512_v39 = vpop.eup %10511  ;;  %3801 = vadd.xlane.f32.xlu1 %v3800_v28  ;;  %v3797_v25 = vsel %vm1417_vm3, %v3765_v27, 0.0 }
 0x92b   :  { %v10514_v33 = vpop.eup %10513  ;;  %3798 = vadd.xlane.f32.xlu0 %v3797_v25  ;;  %v3768_v17 = vmul.f32 %v13299_v8, %v10512_v39 }
 0x92c   :  { %v3767_v19 = vmul.f32 %v13299_v8, %v10514_v33 }
 0x92d   :  { %v3806_v22 = vsel %vm1417_vm3, %v3768_v17, 0.0 }
 0x92e   :  { %v10516_v14 = vpop.eup %10515  ;;  %3807 = vadd.xlane.f32.xlu1 %v3806_v22  ;;  %v3803_v10 = vsel %vm1417_vm3, %v3767_v19, 0.0  ;;  %v13308_v22 = vld [vmem:[#allocation120_spill] sm:$0xff] }
 0x92f   :  { %v10518_v31 = vpop.eup %10517  ;;  %3804 = vadd.xlane.f32.xlu0 %v3803_v10  ;;  %v3770_v23 = vmul.f32 %v13299_v8, %v10516_v14 }
 0x930   :  { %v3769_v35 = vmul.f32 %v13299_v8, %v10518_v31 }
 0x931   :  { %v3812_v34 = vsel %vm1417_vm3, %v3770_v23, 0.0 }
 0x932   :  { %v10520_v37 = vpop.eup %10519  ;;  %3813 = vadd.xlane.f32.xlu1 %v3812_v34  ;;  %v3809_v27 = vsel %vm1417_vm3, %v3769_v35, 0.0 }
 0x933   :  { %v10522_v28 = vpop.eup %10521  ;;  %3810 = vadd.xlane.f32.xlu0 %v3809_v27  ;;  %v3772_v39 = vmul.f32 %v13299_v8, %v10520_v37 }
 0x934   :  { %v3771_v25 = vmul.f32 %v13299_v8, %v10522_v28 }
 0x935   :  { %v3818_v33 = vsel %vm1417_vm3, %v3772_v39, 0.0 }
 0x936   :  { %3819 = vadd.xlane.f32.xlu1 %v3818_v33  ;;  %v3815_v17 = vsel %vm1417_vm3, %v3771_v25, 0.0 }
 0x937   :  { %3816 = vadd.xlane.f32.xlu0 %v3815_v17 }
 0x9a7   :  { %v3778_v19 = vpop.xlane.xlu1 %3777 }
 0x9a8   :  { %v3822_v14 = vadd.f32 %v13308_v22, %v3778_v19  ;;  %v3775_v10 = vpop.xlane.xlu0 %3774 }
 0x9a9   :  { %v3821_v31 = vadd.f32 %v13308_v22, %v3775_v10 }
 0x9aa   :  { %v7793_v23 = vmul.f32 -1.442695, %v3822_v14 }
 0x9ab   :  { %v7792_v35 = vmul.f32 -1.442695, %v3821_v31  ;;  %v3784_v34 = vpop.xlane.xlu1 %3783 }
 0x9ac   :  { %10523 = vpow2.f32 %v7793_v23  ;;  %v3824_v37 = vadd.f32 %v13308_v22, %v3784_v34  ;;  %v3781_v27 = vpop.xlane.xlu0 %3780 }
 0x9ad   :  { %10525 = vpow2.f32 %v7792_v35  ;;  %v3823_v28 = vadd.f32 %v13308_v22, %v3781_v27 }
 0x9ae   :  { %v7795_v39 = vmul.f32 -1.442695, %v3824_v37 }
 0x9af   :  { %v7794_v33 = vmul.f32 -1.442695, %v3823_v28  ;;  %v3790_v25 = vpop.xlane.xlu1 %3789 }
 0x9b0   :  { %10527 = vpow2.f32 %v7795_v39  ;;  %v3826_v17 = vadd.f32 %v13308_v22, %v3790_v25  ;;  %v3787_v19 = vpop.xlane.xlu0 %3786 }
 0x9b1   :  { %10529 = vpow2.f32 %v7794_v33  ;;  %v3825_v10 = vadd.f32 %v13308_v22, %v3787_v19 }
 0x9b2   :  { %v7797_v14 = vmul.f32 -1.442695, %v3826_v17 }
 0x9b3   :  { %v7796_v31 = vmul.f32 -1.442695, %v3825_v10  ;;  %v3796_v29 = vpop.xlane.xlu1 %3795 }
 0x9b4   :  { %10531 = vpow2.f32 %v7797_v14  ;;  %v3828_v23 = vadd.f32 %v13308_v22, %v3796_v29  ;;  %v3793_v34 = vpop.xlane.xlu0 %3792 }
 0x9b5   :  { %10533 = vpow2.f32 %v7796_v31  ;;  %v3827_v35 = vadd.f32 %v13308_v22, %v3793_v34 }
 0x9b6   :  { %v10524_v37 = vpop.eup %10523  ;;  %v7799_v27 = vmul.f32 -1.442695, %v3828_v23 }
 0x9b7   :  { %v10526_v28 = vpop.eup %10525  ;;  %v3886_v39 = vadd.f32 1.0, %v10524_v37  ;;  %v7798_v15 = vmul.f32 -1.442695, %v3827_v35  ;;  %v3802_v25 = vpop.xlane.xlu1 %3801 }
 0x9b8   :  { %v3885_v21 = vadd.f32 1.0, %v10526_v28  ;;  %10535 = vpow2.f32 %v7799_v27  ;;  %v3830_v33 = vadd.f32 %v13308_v22, %v3802_v25  ;;  %v3799_v17 = vpop.xlane.xlu0 %3798 }
 0x9b9   :  { %10537 = vrcp.f32 %v3886_v39  ;;  %v3829_v19 = vadd.f32 %v13308_v22, %v3799_v17 }
 0x9ba   :  { %v10528_v10 = vpop.eup %10527  ;;  %10539 = vrcp.f32 %v3885_v21  ;;  %v7801_v29 = vmul.f32 -1.442695, %v3830_v33 }
 0x9bb   :  { %v10530_v14 = vpop.eup %10529  ;;  %v3888_v31 = vadd.f32 1.0, %v10528_v10  ;;  %10541 = vpow2.f32 %v7798_v15  ;;  %v7800_v34 = vmul.f32 -1.442695, %v3829_v19  ;;  %v3808_v23 = vpop.xlane.xlu1 %3807 }
 0x9bc   :  { %v3887_v8 = vadd.f32 1.0, %v10530_v14  ;;  %10543 = vpow2.f32 %v7801_v29  ;;  %v3832_v35 = vadd.f32 %v13308_v22, %v3808_v23  ;;  %v3805_v37 = vpop.xlane.xlu0 %3804 }
 0x9bd   :  { %10545 = vrcp.f32 %v3888_v31  ;;  %v3831_v27 = vadd.f32 %v13308_v22, %v3805_v37 }
 0x9be   :  { %v10532_v28 = vpop.eup %10531  ;;  %10547 = vrcp.f32 %v3887_v8  ;;  %v7803_v39 = vmul.f32 -1.442695, %v3832_v35 }
 0x9bf   :  { %v10534_v25 = vpop.eup %10533  ;;  %v3890_v17 = vadd.f32 1.0, %v10532_v28  ;;  %10549 = vpow2.f32 %v7800_v34  ;;  %v7802_v21 = vmul.f32 -1.442695, %v3831_v27  ;;  %v3814_v33 = vpop.xlane.xlu1 %3813 }
 0x9c0   :  { %v3889_v10 = vadd.f32 1.0, %v10534_v25  ;;  %10551 = vpow2.f32 %v7803_v39  ;;  %v3834_v15 = vadd.f32 %v13308_v22, %v3814_v33  ;;  %v3811_v19 = vpop.xlane.xlu0 %3810 }
 0x9c1   :  { %10553 = vrcp.f32 %v3890_v17  ;;  %v3833_v29 = vadd.f32 %v13308_v22, %v3811_v19 }
 0x9c2   :  { %v10536_v14 = vpop.eup %10535  ;;  %10555 = vrcp.f32 %v3889_v10  ;;  %v7805_v31 = vmul.f32 -1.442695, %v3834_v15 }
 0x9c3   :  { %v10538_v23 = vpop.eup %10537  ;;  %v3892_v37 = vadd.f32 1.0, %v10536_v14  ;;  %10557 = vpow2.f32 %v7802_v21  ;;  %v7804_v8 = vmul.f32 -1.442695, %v3833_v29  ;;  %v3820_v35 = vpop.xlane.xlu1 %3819 }
 0x9c4   :  { %v10540_v28 = vpop.eup %10539  ;;  %10559 = vpow2.f32 %v7805_v31  ;;  %v3836_v34 = vadd.f32 %v13308_v22, %v3820_v35  ;;  %3940 = vperm.xlu1 %10382, %v10538_v23   ;;  %v3817_v27 = vpop.xlane.xlu0 %3816 }
 0x9c5   :  { %v10542_v39 = vpop.eup %10541  ;;  %10561 = vrcp.f32 %v3892_v37  ;;  %v3835_v25 = vadd.f32 %v13308_v22, %v3817_v27  ;;  %3935 = vperm.xlu0 %10381, %v10540_v28   ;;  %v13314_v22 = vld [vmem:[#allocation45_spill] sm:$0xff] }
 0x9c6   :  { %v10544_v17 = vpop.eup %10543  ;;  %v3891_v33 = vadd.f32 1.0, %v10542_v39  ;;  %10563 = vpow2.f32 %v7804_v8  ;;  %v7807_v10 = vmul.f32 -1.442695, %v3836_v34 }
 0x9c7   :  { %v10546_v15 = vpop.eup %10545  ;;  %v3894_v19 = vadd.f32 1.0, %v10544_v17  ;;  %v7806_v21 = vmul.f32 -1.442695, %v3835_v25 }
 0x9c8   :  { %v10548_v29 = vpop.eup %10547  ;;  %10565 = vrcp.f32 %v3891_v33 }
 0x9c9   :  { %v10550_v14 = vpop.eup %10549  ;;  %10567 = vrcp.f32 %v3894_v19  ;;  %3945 = vperm.xlu1 %10382, %v10548_v29   ;;  %3950 = vperm.xlu0 %10381, %v10546_v15  }
 0x9ca   :  { %v10552_v31 = vpop.eup %10551  ;;  %v3893_v23 = vadd.f32 1.0, %v10550_v14  ;;  %10569 = vpow2.f32 %v7807_v10 }
 0x9cb   :  { %v10554_v37 = vpop.eup %10553  ;;  %v3896_v35 = vadd.f32 1.0, %v10552_v31  ;;  %10571 = vpow2.f32 %v7806_v21 }
 0x9cc   :  { %v10556_v28 = vpop.eup %10555  ;;  %10573 = vrcp.f32 %v3893_v23 }
 0x9cd   :  { %v10558_v27 = vpop.eup %10557  ;;  %10575 = vrcp.f32 %v3896_v35  ;;  %3955 = vperm.xlu1 %10382, %v10556_v28   ;;  %3960 = vperm.xlu0 %10381, %v10554_v37  }
 0x9ce   :  { %v10560_v8 = vpop.eup %10559  ;;  %v3895_v34 = vadd.f32 1.0, %v10558_v27 }
 0x9cf   :  { %v10562_v39 = vpop.eup %10561  ;;  %v3898_v25 = vadd.f32 1.0, %v10560_v8 }
 0x9d0   :  { %v10564_v17 = vpop.eup %10563  ;;  %10577 = vrcp.f32 %v3895_v34 }
 0x9d1   :  { %10579 = vrcp.f32 %v3898_v25  ;;  %v3897_v33 = vadd.f32 1.0, %v10564_v17  ;;  %3970 = vperm.xlu0 %10381, %v10562_v39   ;;  %v13309_v25 = vld [vmem:[#allocation38_spill] sm:$0xff] }
 0x9d2   :  { %v10566_v15 = vpop.eup %10565 }
 0x9d3   :  { %v10568_v10 = vpop.eup %10567  ;;  %10581 = vrcp.f32 %v3897_v33  ;;  %3965 = vperm.xlu1 %10382, %v10566_v15   ;;  %v13310_v15 = vld [vmem:[#allocation40_spill] sm:$0xff] }
 0x9d4   :  { %v10570_v19 = vpop.eup %10569 }
 0x9d5   :  { %v10572_v21 = vpop.eup %10571  ;;  %v3900_v29 = vadd.f32 1.0, %v10570_v19  ;;  %3980 = vperm.xlu0 %10381, %v10568_v10  }
 0x9d6   :  { %v10574_v14 = vpop.eup %10573  ;;  %v3899_v31 = vadd.f32 1.0, %v10572_v21 }
 0x9d7   :  { %v10576_v23 = vpop.eup %10575  ;;  %10583 = vrcp.f32 %v3900_v29  ;;  %3975 = vperm.xlu1 %10382, %v10574_v14   ;;  %v13311_v29 = vld [vmem:[#allocation39_spill] sm:$0xff] }
 0x9d8   :  { %10585 = vrcp.f32 %v3899_v31 }
 0x9d9   :  { %3990 = vperm.xlu0 %10381, %v10576_v23   ;;  %v13312_v23 = vld [vmem:[#allocation41_spill] sm:$0xff] }
 0x9da   :  { %v10578_v37 = vpop.eup %10577 }
 0x9db   :  { %v10580_v35 = vpop.eup %10579  ;;  %3985 = vperm.xlu1 %10382, %v10578_v37  }
 0x9dd   :  { %v10582_v28 = vpop.eup %10581  ;;  %4000 = vperm.xlu0 %10381, %v10580_v35  }
 0x9df   :  { %3995 = vperm.xlu1 %10382, %v10582_v28  }
 0x9e1   :  { %v10584_v27 = vpop.eup %10583 }
 0x9e2   :  { %v10586_v8 = vpop.eup %10585  ;;  %4010 = vperm.xlu0 %10381, %v10584_v27  }
 0x9e3   :  { %4005 = vperm.xlu1 %10382, %v10586_v8  }
 0xa43   :  { %v3941_v34 = vpop.permute.xlu1 %3940 }
 0xa44   :  { %v4014_v39 = vmul.f32 %v11909_v53, %v3941_v34  ;;  %v4105_v17 = vmul.f32 %v13309_v25, %v3941_v34  ;;  %v4196_v33 = vmul.f32 %v11911_v26, %v3941_v34  ;;  %v4287_v10 = vmul.f32 %v13310_v15, %v3941_v34  ;;  %v3936_v19 = vpop.permute.xlu0 %3935  ;;  %v13313_v34 = vld [vmem:[#allocation43_spill] sm:$0xff] }
 0xa45   :  { %v4013_v21 = vmul.f32 %v3936_v19, %v11913_v20  ;;  %v4104_v14 = vmul.f32 %v3936_v19, %v13311_v29  ;;  %v4195_v31 = vmul.f32 %v3936_v19, %v11915_v61  ;;  %v4286_v37 = vmul.f32 %v3936_v19, %v13312_v23  ;;  %v13315_v19 = vld [vmem:[#allocation42_spill] sm:$0xff] }
 0xa47   :  { %v9966_v35 = vpack.c.bf16 %v4014_v39, %v4013_v21  ;;  %v10030_v28 = vpack.c.bf16 %v4196_v33, %v4195_v31  ;;  %v12110_v27 = vpack.c.bf16 %v4105_v17, %v4104_v14  ;;  %v12112_v53 = vpack.c.bf16 %v4287_v10, %v4286_v37  ;;  %v13316_v33 = vld [vmem:[#allocation44_spill] sm:$0xff] }
 0xa48   :  { %v3946_v8 = vpop.permute.xlu1 %3945  ;;  %v3951_v25 = vpop.permute.xlu0 %3950 }
 0xa49   :  { %v4015_v26 = vmul.f32 %v3946_v8, %v11925_v24  ;;  %v4106_v15 = vmul.f32 %v3946_v8, %v13313_v34  ;;  %v4197_v20 = vmul.f32 %v3946_v8, %v11927_v12  ;;  %v4288_v29 = vmul.f32 %v3946_v8, %v13314_v22  ;;  %9967 = vmatprep.subr.bf16.mxu1 %v9966_v35 }
 0xa4a   :  { %v4016_v61 = vmul.f32 %v11921_v48, %v3951_v25  ;;  %v4107_v39 = vmul.f32 %v13315_v19, %v3951_v25  ;;  %v4198_v17 = vmul.f32 %v11923_v43, %v3951_v25  ;;  %v4289_v10 = vmul.f32 %v13316_v33, %v3951_v25  ;;  %10031 = vmatprep.subr.bf16.mxu0 %v10030_v28  ;;  %v13317_v48 = vld [vmem:[#allocation48_spill] sm:$0xff]  ;;  %v13318_v43 = vld [vmem:[#allocation51_spill] sm:$0xff] }
 0xa4b   :  { %9969 = vmatpush3.bf16.msra.mxu1 %v9966_v35  ;;  %10033 = vmatpush3.bf16.msra.mxu0 %v10030_v28  ;;  %v13319_v35 = vld [vmem:[#allocation46_spill] sm:$0xff] }
 0xa4c   :  { %v3956_v21 = vpop.permute.xlu1 %3955  ;;  %v3961_v24 = vpop.permute.xlu0 %3960  ;;  %v9970_v14 = vpack.c.bf16 %v4016_v61, %v4015_v26  ;;  %v10034_v31 = vpack.c.bf16 %v4198_v17, %v4197_v20  ;;  %v12122_v37 = vpack.c.bf16 %v4107_v39, %v4106_v15  ;;  %v12124_v12 = vpack.c.bf16 %v4289_v10, %v4288_v29  ;;  %v13320_v26 = vld [vmem:[#allocation50_spill] sm:$0xff]  ;;  %v13321_v17 = vld [vmem:[#allocation52_spill] sm:$0xff] }
 0xa4d   :  { %v4017_v8 = vmul.f32 %v3956_v21, %v11937_v57  ;;  %v4108_v22 = vmul.f32 %v3956_v21, %v13317_v48  ;;  %v4199_v34 = vmul.f32 %v3956_v21, %v11939_v6  ;;  %v4290_v19 = vmul.f32 %v3956_v21, %v13318_v43  ;;  %v13322_v21 = vld [vmem:[#allocation54_spill] sm:$0xff] }
 0xa4e   :  { %v4018_v25 = vmul.f32 %v11933_v63, %v3961_v24  ;;  %v4109_v28 = vmul.f32 %v13319_v35, %v3961_v24  ;;  %v4200_v33 = vmul.f32 %v11935_v58, %v3961_v24  ;;  %v4291_v20 = vmul.f32 %v13320_v26, %v3961_v24  ;;  %9971 = vmatprep.subr.bf16.mxu1 %v9970_v14 }
 0xa4f   :  { %10035 = vmatprep.subr.bf16.mxu0 %v10034_v31  ;;  %9973 = vmatpush3.bf16.msra.mxu1 %v9970_v14 }
 0xa50   :  { %10037 = vmatpush3.bf16.msra.mxu0 %v10034_v31  ;;  %v3971_v15 = vpop.permute.xlu0 %3970  ;;  %v9974_v57 = vpack.c.bf16 %v4018_v25, %v4017_v8  ;;  %v10038_v29 = vpack.c.bf16 %v4200_v33, %v4199_v34  ;;  %v12134_v61 = vpack.c.bf16 %v4109_v28, %v4108_v22  ;;  %v12136_v6 = vpack.c.bf16 %v4291_v20, %v4290_v19  ;;  %v13323_v31 = vld [vmem:[#allocation53_spill] sm:$0xff]  ;;  %v13324_v34 = vld [vmem:[#allocation55_spill] sm:$0xff]  ;;  %v13325_v25 = vld [vmem:[#allocation56_spill] sm:$0xff] }
 0xa51   :  { %v4020_v39 = vmul.f32 %v11945_v4, %v3971_v15  ;;  %v4111_v10 = vmul.f32 %v13321_v17, %v3971_v15  ;;  %v4202_v58 = vmul.f32 %v11947_v62, %v3971_v15  ;;  %v4293_v24 = vmul.f32 %v13322_v21, %v3971_v15 }
 0xa52   :  { %v3966_v63 = vpop.permute.xlu1 %3965  ;;  %9975 = vmatprep.subr.bf16.mxu1 %v9974_v57  ;;  %10039 = vmatprep.subr.bf16.mxu0 %v10038_v29 }
 0xa53   :  { %v4019_v14 = vmul.f32 %v3966_v63, %v11949_v36  ;;  %v4110_v8 = vmul.f32 %v3966_v63, %v13323_v31  ;;  %v4201_v22 = vmul.f32 %v3966_v63, %v11951_v38  ;;  %v4292_v19 = vmul.f32 %v3966_v63, %v13324_v34  ;;  %9977 = vmatpush3.bf16.msra.mxu1 %v9974_v57  ;;  %v13326_v31 = vld [vmem:[#allocation57_spill] sm:$0xff] }
 0xa54   :  { %10041 = vmatpush3.bf16.msra.mxu0 %v10038_v29  ;;  %v3981_v4 = vpop.permute.xlu0 %3980  ;;  %v13327_v29 = vld [vmem:[#allocation59_spill] sm:$0xff] }
 0xa55   :  { %v4022_v33 = vmul.f32 %v11957_v3, %v3981_v4  ;;  %v4113_v28 = vmul.f32 %v13325_v25, %v3981_v4  ;;  %v4204_v62 = vmul.f32 %v11959_v5, %v3981_v4  ;;  %v9978_v15 = vpack.c.bf16 %v4020_v39, %v4019_v14  ;;  %v13328_v3 = vld [vmem:[#allocation58_spill] sm:$0xff] }
 0xa56   :  { %v3976_v20 = vpop.permute.xlu1 %3975  ;;  %v10042_v21 = vpack.c.bf16 %v4202_v58, %v4201_v22  ;;  %v12149_v17 = vpack.c.bf16 %v4111_v10, %v4110_v8  ;;  %v12151_v36 = vpack.c.bf16 %v4293_v24, %v4292_v19  ;;  %v4295_v43 = vmul.f32 %v13328_v3, %v3981_v4  ;;  %v13329_v10 = vld [vmem:[#allocation60_spill] sm:$0xff]  ;;  %v13330_v19 = vld [vmem:[#allocation61_spill] sm:$0xff] }
 0xa57   :  { %v4021_v38 = vmul.f32 %v3976_v20, %v11961_v9  ;;  %v4112_v63 = vmul.f32 %v3976_v20, %v13326_v31  ;;  %v4203_v57 = vmul.f32 %v3976_v20, %v11963_v32  ;;  %v4294_v34 = vmul.f32 %v3976_v20, %v13327_v29  ;;  %9979 = vmatprep.subr.bf16.mxu1 %v9978_v15  ;;  %v13331_v29 = vld [vmem:[#allocation63_spill] sm:$0xff] }
 0xa58   :  { %10043 = vmatprep.subr.bf16.mxu0 %v10042_v21  ;;  %v3991_v5 = vpop.permute.xlu0 %3990  ;;  %9981 = vmatpush3.bf16.msra.mxu1 %v9978_v15 }
 0xa59   :  { %10045 = vmatpush3.bf16.msra.mxu0 %v10042_v21  ;;  %v4024_v39 = vmul.f32 %v11969_v40, %v3991_v5  ;;  %v4115_v58 = vmul.f32 %v13329_v10, %v3991_v5  ;;  %v4206_v9 = vmul.f32 %v11971_v44, %v3991_v5  ;;  %v9982_v14 = vpack.c.bf16 %v4022_v33, %v4021_v38  ;;  %v13332_v21 = vld [vmem:[#allocation62_spill] sm:$0xff]  ;;  %v13333_v33 = vld [vmem:[#allocation64_spill] sm:$0xff] }
 0xa5a   :  { %v3986_v24 = vpop.permute.xlu1 %3985  ;;  %v10046_v8 = vpack.c.bf16 %v4204_v62, %v4203_v57  ;;  %v12161_v22 = vpack.c.bf16 %v4113_v28, %v4112_v63  ;;  %v4297_v31 = vmul.f32 %v13332_v21, %v3991_v5  ;;  %v12168_v10 = vpack.c.bf16 %v4295_v43, %v4294_v34  ;;  %v13334_v43 = vld [vmem:[#allocation71_spill] sm:$0xff] }
 0xa5b   :  { %v4023_v32 = vmul.f32 %v3986_v24, %v11973_v11  ;;  %v4114_v4 = vmul.f32 %v3986_v24, %v13330_v19  ;;  %v4205_v20 = vmul.f32 %v3986_v24, %v11975_v0  ;;  %v4296_v15 = vmul.f32 %v3986_v24, %v13331_v29  ;;  %9983 = vmatprep.subr.bf16.mxu1 %v9982_v14 }
 0xa5c   :  { %10047 = vmatprep.subr.bf16.mxu0 %v10046_v8  ;;  %v4001_v40 = vpop.permute.xlu0 %4000  ;;  %9985 = vmatpush3.bf16.msra.mxu1 %v9982_v14  ;;  %v13335_v14 = vld [vmem:[#allocation70_spill] sm:$0xff] }
 0xa5d   :  { %10049 = vmatpush3.bf16.msra.mxu0 %v10046_v8  ;;  %v4026_v44 = vmul.f32 %v11981_v50, %v4001_v40  ;;  %v4117_v28 = vmul.f32 %v13333_v33, %v4001_v40  ;;  %v4208_v11 = vmul.f32 %v11983_v52, %v4001_v40  ;;  %v9986_v38 = vpack.c.bf16 %v4024_v39, %v4023_v32 }
 0xa5e   :  { %v3996_v62 = vpop.permute.xlu1 %3995  ;;  %v10050_v0 = vpack.c.bf16 %v4206_v9, %v4205_v20  ;;  %v10018_v63 = vpack.c.bf16 %v4115_v58, %v4114_v4  ;;  %v4299_v8 = vmul.f32 %v13335_v14, %v4001_v40  ;;  %v12178_v50 = vpack.c.bf16 %v4297_v31, %v4296_v15  ;;  %v13336_v4 = vld [vmem:[#allocation68_spill] sm:$0xff] }
 0xa5f   :  { %v4025_v57 = vmul.f32 %v3996_v62, %v11985_v30  ;;  %v4116_v5 = vmul.f32 %v3996_v62, %v13261_v60  ;;  %v4207_v24 = vmul.f32 %v3996_v62, %v11987_v59  ;;  %v4298_v34 = vmul.f32 %v3996_v62, %v13334_v43  ;;  %9987 = vmatprep.subr.bf16.mxu1 %v9986_v38  ;;  %v13337_v62 = vld [vmem:[#allocation72_spill] sm:$0xff] }
 0xa60   :  { %10051 = vmatprep.subr.bf16.mxu0 %v10050_v0  ;;  %9989 = vmatpush3.bf16.msra.mxu1 %v9986_v38 }
 0xa61   :  { %10053 = vmatpush3.bf16.msra.mxu0 %v10050_v0  ;;  %v4011_v52 = vpop.permute.xlu0 %4010  ;;  %v9990_v39 = vpack.c.bf16 %v4026_v44, %v4025_v57  ;;  %v10054_v9 = vpack.c.bf16 %v4208_v11, %v4207_v24  ;;  %v10022_v58 = vpack.c.bf16 %v4117_v28, %v4116_v5  ;;  %v10086_v44 = vpack.c.bf16 %v4299_v8, %v4298_v34 }
 0xa62   :  { %v4006_v32 = vpop.permute.xlu1 %4005  ;;  %v4028_v30 = vmul.f32 %v11993_v55, %v4011_v52  ;;  %v4119_v20 = vmul.f32 %v13336_v4, %v4011_v52  ;;  %v4210_v59 = vmul.f32 %v11995_v51, %v4011_v52  ;;  %v4301_v43 = vmul.f32 %v13337_v62, %v4011_v52  ;;  %v10739_v51 = vld [vmem:[%s12867_s19] sm:$0xff] }
 0xa63   :  { %v4027_v40 = vmul.f32 %v4006_v32, %v11997_v1  ;;  %v4118_v31 = vmul.f32 %v4006_v32, %v13267_v2  ;;  %v4209_v15 = vmul.f32 %v4006_v32, %v11999_v46  ;;  %v4300_v38 = vmul.f32 %v4006_v32, %v13269_v18  ;;  %9991 = vmatprep.subr.bf16.mxu1 %v9990_v39  ;;  %v10737_v46 = vld [vmem:[%s12861_s13] sm:$0x3]  ;;  %v13377_v18 = vld [vmem:[#allocation108_spill] sm:$0xff] }
 0xa64   :  { %10055 = vmatprep.subr.bf16.mxu0 %v10054_v9  ;;  %9993 = vmatpush3.bf16.msra.mxu1 %v9990_v39  ;;  %v10738_v1 = vld [vmem:[%s12860_s12] sm:$0xff] }
 0xa65   :  { %10057 = vmatpush3.bf16.msra.mxu0 %v10054_v9  ;;  %v9994_v55 = vpack.c.bf16 %v4028_v30, %v4027_v40  ;;  %v10058_v28 = vpack.c.bf16 %v4210_v59, %v4209_v15  ;;  %v10026_v11 = vpack.c.bf16 %v4119_v20, %v4118_v31  ;;  %v10090_v0 = vpack.c.bf16 %v4301_v43, %v4300_v38  ;;  %v10744_v30 = vld [vmem:[%s12855_s7] sm:$0xff]  ;;  %v13340_v20 = vld [vmem:[#allocation7_spill] sm:$0xff]  ;;  %v13342_v40 = vld [vmem:[#allocation8_spill] sm:$0xff] }
 0xa66   :  { %v13341_v59 = vld [vmem:[#allocation10_spill] sm:$0xff]  ;;  %v13343_v31 = vld [vmem:[#allocation11_spill] sm:$0xff]  ;;  %v13344_v38 = vld [vmem:[#allocation12_spill] sm:$0xff] }
 0xa67   :  { %9995 = vmatprep.subr.bf16.mxu1 %v9994_v55  ;;  %10059 = vmatprep.subr.bf16.mxu0 %v10058_v28  ;;  %v10745_v15 = vld [vmem:[%s13162_s0] sm:$0xff] }
 0xa68   :  { %9997 = vmatpush3.bf16.msra.mxu1 %v9994_v55  ;;  %v13346_v55 = vld [vmem:[#allocation13_spill] sm:$0xff] }
 0xa69   :  { %10061 = vmatpush3.bf16.msra.mxu0 %v10058_v28  ;;  %9999 = vmatprep.subr.bf16.mxu1 %v12110_v27  ;;  %v13347_v28 = vld [vmem:[#allocation15_spill] sm:$0xff]  ;;  %v13380_v2 = vld [vmem:[#allocation109_spill] sm:$0xff] }
 0xa6a   :  { %9363 = vmatprep.subr.msk.mxu0 %vm154_vm0, %v10737_v46 }
 0xa6b   :  { %9256 = vmatmul.mubr.f32.vlgmr.msra.gmra.mrb[72].mxu1 %v11754_v16 }
 0xa6c   :  { %9326 = vmatmul.mubr.f32.vlgmr.msra.gmra.mrb[88].mxu0 %v11748_v45  ;;  %10001 = vmatpush3.bf16.msra.mxu1 %v12110_v27 }
 0xa6d   :  { %9290 = vmatprep.mubr.f32.mxu1 %v11751_v49  ;;  %10003 = vmatprep.subr.bf16.mxu1 %v12122_v37 }
 0xa6e   :  { %9364 = vmatpush3.msk.msra.mxu0 %vm154_vm0, %v10737_v46  ;;  %v13350_v46 = vld [vmem:[#allocation17_spill] sm:$0xff] }
 0xa6f   :  { %9368 = vmatprep.subr.mxu0 %v10738_v1 }
 0xa70   :  { %10005 = vmatpush3.bf16.msra.mxu1 %v12122_v37 }
 0xa71   :  { %10007 = vmatprep.subr.bf16.mxu1 %v12134_v61 }
 0xa74   :  { %10009 = vmatpush3.bf16.msra.mxu1 %v12134_v61 }
 0xa75   :  { %10011 = vmatprep.subr.bf16.mxu1 %v12149_v17 }
 0xa78   :  { %10013 = vmatpush3.bf16.msra.mxu1 %v12149_v17  ;;  %v10740_v17 = vld [vmem:[%s12862_s14] sm:$0xff] }
 0xa79   :  { %10015 = vmatprep.subr.bf16.mxu1 %v12161_v22 }
 0xa7c   :  { %10017 = vmatpush3.bf16.msra.mxu1 %v12161_v22 }
 0xa7d   :  { %10019 = vmatprep.subr.bf16.mxu1 %v10018_v63 }
 0xa80   :  { %10021 = vmatpush3.bf16.msra.mxu1 %v10018_v63 }
 0xa81   :  { %10023 = vmatprep.subr.bf16.mxu1 %v10022_v58 }
 0xa84   :  { %10025 = vmatpush3.bf16.msra.mxu1 %v10022_v58 }
 0xa85   :  { %10027 = vmatprep.subr.bf16.mxu1 %v10026_v11 }
 0xa88   :  { %10029 = vmatpush3.bf16.msra.mxu1 %v10026_v11  ;;  %v13348_v11 = vld [vmem:[#allocation16_spill] sm:$0xff] }
 0xa89   :  { %10063 = vmatprep.subr.bf16.mxu1 %v12112_v53 }
 0xa8b   :  { %9291 = vmatmul.mubr.f32.vlgmr.msra.gmra.mrb[74].mxu1 %v11754_v16 }
 0xa8c   :  { %10065 = vmatpush3.bf16.msra.mxu1 %v12112_v53  ;;  %9360 = vmatprep.mubr.f32.mxu1 %v11745_v42 }
 0xa8d   :  { %10067 = vmatprep.subr.bf16.mxu1 %v12124_v12 }
 0xa90   :  { %10069 = vmatpush3.bf16.msra.mxu1 %v12124_v12 }
 0xa91   :  { %10071 = vmatprep.subr.bf16.mxu1 %v12136_v6 }
 0xa94   :  { %10073 = vmatpush3.bf16.msra.mxu1 %v12136_v6 }
 0xa95   :  { %10075 = vmatprep.subr.bf16.mxu1 %v12151_v36 }
 0xa98   :  { %10077 = vmatpush3.bf16.msra.mxu1 %v12151_v36  ;;  %v10741_v36 = vld [vmem:[%s12863_s15] sm:$0x3] }
 0xa99   :  { %10079 = vmatprep.subr.bf16.mxu1 %v12168_v10 }
 0xa9c   :  { %10081 = vmatpush3.bf16.msra.mxu1 %v12168_v10  ;;  %v10742_v10 = vld [vmem:[%s12864_s16] sm:$0xff] }
 0xa9d   :  { %10083 = vmatprep.subr.bf16.mxu1 %v12178_v50 }
 0xaa0   :  { %10085 = vmatpush3.bf16.msra.mxu1 %v12178_v50 }
 0xaa1   :  { %10087 = vmatprep.subr.bf16.mxu1 %v10086_v44 }
 0xaa4   :  { %10089 = vmatpush3.bf16.msra.mxu1 %v10086_v44  ;;  %v13345_v44 = vld [vmem:[#allocation14_spill] sm:$0xff] }
 0xaa5   :  { %10091 = vmatprep.subr.bf16.mxu1 %v10090_v0 }
 0xaa8   :  { %10093 = vmatpush3.bf16.msra.mxu1 %v10090_v0  ;;  %v13349_v0 = vld [vmem:[#allocation18_spill] sm:$0xff] }
 0xaa9   :  { %9388 = vmatprep.subr.mxu1 %v10739_v51 }
 0xaab   :  { %9361 = vmatmul.mubr.f32.vlgmr.msra.gmra.mrb[76].mxu1 %v11748_v45  ;;  %v13376_v45 = vld [vmem:[#allocation107_spill] sm:$0xff] }
 0xaac   :  { %9389 = vmatpush3.msra.mxu1 %v10739_v51  ;;  %v13352_v51 = vld [vmem:[#allocation20_spill] sm:$0xff] }
 0xb3e   :  { %v9257_v27 = vpop.f32.mrb[72].mxu1 }
 0xb3f   :  { %v9327_v53 = vpop.f32.mrb[88].mxu0  ;;  %v4095_v37 = vpop.f32.mrb[73].mxu1 }
 0xb40   :  { %v4277_v12 = vpop.f32.mrb[89].mxu0 }
 0xb5e   :  { %v9292_v61 = vpop.f32.mrb[74].mxu1 }
 0xb5f   :  { %v4186_v6 = vpop.f32.mrb[75].mxu1 }
 0xb60   :  { %9365 = vmatprep.mubr.msk.f32.mxu0 %vm147_vm1, %v4186_v6  ;;  %v13358_v6 = vld [vmem:[#allocation25_spill] sm:$0xff] }
 0xb61   :  { %9366 = vmatmul.mubr.msk.f32.vlgmr.msra.gmra.mrb[90].mxu0 %vm147_vm1, %v9292_v61  ;;  %v13357_v61 = vld [vmem:[#allocation26_spill] sm:$0xff] }
 0xb62   :  { %9370 = vmatprep.mubr.msk.f32.mxu0 %vm1417_vm3, %v4095_v37  ;;  %9369 = vmatpush3.msra.mxu0 %v10738_v1  ;;  %v13351_v1 = vld [vmem:[#allocation19_spill] sm:$0xff] }
 0xb63   :  { %9373 = vmatprep.subr.mxu0 %v10740_v17  ;;  %v13355_v37 = vld [vmem:[#allocation23_spill] sm:$0xff] }
 0xb69   :  { %9371 = vmatmul.mubr.msk.f32.vlgmr.msra.gmra.mrb[90].mxu0 %vm1417_vm3, %v9257_v27  ;;  %v13353_v27 = vld [vmem:[#allocation22_spill] sm:$0xff] }
 0xb6a   :  { %9375 = vmatprep.mubr.msk.f32.mxu0 %vm1417_vm3, %v4277_v12  ;;  %9374 = vmatpush3.msra.mxu0 %v10740_v17  ;;  %v13356_v12 = vld [vmem:[#allocation24_spill] sm:$0xff]  ;;  %v13359_v17 = vld [vmem:[#allocation27_spill] sm:$0xff] }
 0xb6b   :  { %9378 = vmatprep.subr.msk.mxu0 %vm154_vm0, %v10741_v36 }
 0xb71   :  { %9376 = vmatmul.mubr.msk.f32.vlgmr.msra.gmra.mrb[90].mxu0 %vm1417_vm3, %v9327_v53  ;;  %v13354_v53 = vld [vmem:[#allocation21_spill] sm:$0xff] }
 0xb72   :  { %9379 = vmatpush3.msk.msra.mxu0 %vm154_vm0, %v10741_v36  ;;  %v13360_v36 = vld [vmem:[#allocation28_spill] sm:$0xff] }
 0xb73   :  { %9383 = vmatprep.subr.mxu0 %v10742_v10 }
 0xb7e   :  { %v9362_v22 = vpop.f32.mrb[76].mxu1 }
 0xb7f   :  { %v4368_v63 = vpop.f32.mrb[77].mxu1 }
 0xb80   :  { %9380 = vmatprep.mubr.msk.f32.mxu0 %vm147_vm1, %v4368_v63  ;;  %v13363_v63 = vld [vmem:[#allocation34_spill] sm:$0xff] }
 0xb81   :  { %9381 = vmatmul.mubr.msk.f32.vlgmr.msra.gmra.mrb[90].mxu0 %vm147_vm1, %v9362_v22  ;;  %v13362_v22 = vld [vmem:[#allocation29_spill] sm:$0xff] }
 0xb82   :  { %9384 = vmatpush3.msra.mxu0 %v10742_v10  ;;  %9385 = vmatprep.mubr.msk.f32.mxu0 %vm1417_vm3, %v11838_v54  ;;  %v10743_v54 = vld [vmem:[%s12868_s20] ss:$0 sm:$0xff]  ;;  %v13361_v10 = vld [vmem:[#allocation30_spill] sm:$0xff] }
 0xb89   :  { %9386 = vmatmul.mubr.msk.f32.vlgmr.msra.gmra.mrb[90].mxu0 %vm1417_vm3, %v11836_v47 }
 0xb8a   :  { %9425 = vmatprep.mubr.msk.f32.mxu0 %vm235_vm2, %v10945_v13 }
 0xc5c   :  { %v9387_v57 = vpop.f32.mrb[90].mxu0 }
 0xc5d   :  { %v4789_v5 = vadd.f32 %v9387_v57, %v11822_v41  ;;  %v4777_v24 = vpop.f32.mrb[91].mxu0  ;;  %v13364_v57 = vld [vmem:[#allocation31_spill] sm:$0xff] }
 0xc5e   :  { %v4788_v43 = vadd.f32 %v4777_v24, %v11825_v56  ;;  %v13366_v24 = vld [vmem:[#allocation32_spill] sm:$0xff] }
 0xc5f   :  { %v13374_v56 = vld [vmem:[#allocation104_spill] sm:$0xff] }
 0xc60   :  { %10587 = vtanh.f32 %v4788_v43  ;;  %v13367_v43 = vld [vmem:[#allocation36_spill] sm:$0xff] }
 0xc61   :  { %10589 = vtanh.f32 %v4789_v5  ;;  %v13365_v5 = vld [vmem:[#allocation35_spill] sm:$0xff] }
 0xc6a   :  { %v10588_v34 = vpop.eup %10587 }
 0xc6b   :  { %v10590_v8 = vpop.eup %10589  ;;  %9390 = vmatprep.mubr.msk.f32.mxu1 %vm1417_vm3, %v10588_v34  ;;  %v13368_v34 = vld [vmem:[#allocation33_spill] sm:$0xff] }
 0xc6c   :  { %9391 = vmatmul.mubr.msk.f32.vlgmr.msra.gmra.mrb[78].mxu1 %vm1417_vm3, %v10590_v8  ;;  %v13369_v8 = vld [vmem:[#allocation37_spill] sm:$0xff] }
 0xc6d   :  { %9397 = vmatprep.mubr.msk.f32.mxu1 %vm235_vm2, %v10926_v7 }
 0xd3f   :  { %v9392_v47 = vpop.f32.mrb[78].mxu1 }
 0xd40   :  { %v4870_v50 = vadd.f32 %v10743_v54, %v9392_v47  ;;  %v4864_v52 = vpop.f32.mrb[79].mxu1 }
 0xd41   :  { %v4865_v39 = vadd.f32 %v10743_v54, %v4864_v52 }
 0xd42   :  { %10591 = vtanh.f32 %v4870_v50 }
 0xd43   :  { %10593 = vtanh.f32 %v4865_v39 }
 0xd4c   :  { %v12261_v9 = vpop.eup %10591 }
 0xd4d   :  { %13338 = vst [vmem:[#allocation77_spill] sm:$0xff] %v12261_v9  ;;  %v12263_v58 = vpop.eup %10593 }
 0xd4e   :  { %13339 = vst [vmem:[#allocation91_spill] sm:$0xff] %v12263_v58  ;;  %v10094_v32 = vpack.c.bf16 %v12261_v9, %v12263_v58  ;;  %v13375_v9 = vld [vmem:[#allocation106_spill] sm:$0xff] }
 0xd50   :  { %10095 = vmatprep.subr.bf16.mxu1 %v10094_v32  ;;  %10099 = vmatprep.subr.bf16.mxu0 %v10094_v32 }
 0xd51   :  { %10097 = vmatpush3.bf16.msra.mxu1 %v10094_v32  ;;  %10101 = vmatpush3.bf16.msra.mxu0 %v10094_v32 }
 0xd52   :  { %9449 = vmatprep.subr.mxu1 %v10744_v30 }
 0xd54   :  { %9398 = vmatmul.mubr.msk.f32.vlgmr.msra.gmra.mrb[80].mxu1 %vm235_vm2, %v13340_v20  ;;  %9426 = vmatmul.mubr.msk.f32.vlgmr.msra.gmra.mrb[92].mxu0 %vm235_vm2, %v13341_v59  ;;  %v13373_v59 = vld [vmem:[#allocation103_spill] sm:$0xff] }
 0xd55   :  { %9400 = vmatprep.mubr.msk.f32.mxu1 %vm235_vm2, %v13342_v40  ;;  %9428 = vmatprep.mubr.msk.f32.mxu0 %vm235_vm2, %v13343_v31 }
 0xd56   :  { %9450 = vmatpush3.msra.mxu1 %v10744_v30 }
 0xd57   :  { %9475 = vmatprep.subr.mxu1 %v10745_v15 }
 0xd58   :  { %9401 = vmatmul.mubr.msk.f32.gmra.mrb[82].mxu1 %vm235_vm2, %v13344_v38  ;;  %9429 = vmatmul.mubr.msk.f32.gmra.mrb[94].mxu0 %vm235_vm2, %v13345_v44  ;;  %v13372_v38 = vld [vmem:[#allocation102_spill] sm:$0xff] }
 0xd59   :  { %9403 = vmatprep.mubr.msk.f32.mxu1 %vm235_vm2, %v13346_v55  ;;  %9431 = vmatprep.mubr.msk.f32.mxu0 %vm235_vm2, %v13347_v28 }
 0xd5c   :  { %9404 = vmatmul.mubr.msk.f32.gmra.mrb[84].mxu1 %vm235_vm2, %v13348_v11  ;;  %9432 = vmatmul.mubr.msk.f32.gmra.mrb[96].mxu0 %vm235_vm2, %v13349_v0 }
 0xd5d   :  { %9406 = vmatprep.mubr.msk.f32.mxu1 %vm235_vm2, %v13350_v46  ;;  %9434 = vmatprep.mubr.msk.f32.mxu0 %vm235_vm2, %v13351_v1 }
 0xd60   :  { %9407 = vmatmul.mubr.msk.f32.gmra.mrb[86].mxu1 %vm235_vm2, %v13352_v51  ;;  %9435 = vmatmul.mubr.msk.f32.gmra.mrb[98].mxu0 %vm235_vm2, %v13353_v27 }
 0xd61   :  { %9409 = vmatprep.mubr.msk.f32.mxu1 %vm235_vm2, %v13354_v53  ;;  %9437 = vmatprep.mubr.msk.f32.mxu0 %vm235_vm2, %v13355_v37 }
 0xd64   :  { %9410 = vmatmul.mubr.msk.f32.gmra.mrb[88].mxu1 %vm235_vm2, %v13356_v12  ;;  %9438 = vmatmul.mubr.msk.f32.gmra.mrb[100].mxu0 %vm235_vm2, %v13357_v61 }
 0xd65   :  { %9412 = vmatprep.mubr.msk.f32.mxu1 %vm235_vm2, %v13358_v6  ;;  %9440 = vmatprep.mubr.msk.f32.mxu0 %vm235_vm2, %v13359_v17 }
 0xd68   :  { %9413 = vmatmul.mubr.msk.f32.gmra.mrb[90].mxu1 %vm235_vm2, %v13360_v36  ;;  %9441 = vmatmul.mubr.msk.f32.gmra.mrb[102].mxu0 %vm235_vm2, %v13361_v10 }
 0xd69   :  { %9415 = vmatprep.mubr.msk.f32.mxu1 %vm235_vm2, %v13362_v22  ;;  %9443 = vmatprep.mubr.msk.f32.mxu0 %vm235_vm2, %v13363_v63 }
 0xd6c   :  { %9416 = vmatmul.mubr.msk.f32.gmra.mrb[92].mxu1 %vm235_vm2, %v13364_v57  ;;  %9444 = vmatmul.mubr.msk.f32.gmra.mrb[104].mxu0 %vm235_vm2, %v13365_v5 }
 0xd6d   :  { %9418 = vmatprep.mubr.msk.f32.mxu1 %vm235_vm2, %v13366_v24  ;;  %9446 = vmatprep.mubr.msk.f32.mxu0 %vm235_vm2, %v13367_v43 }
 0xd70   :  { %9419 = vmatmul.mubr.msk.f32.gmra.mrb[94].mxu1 %vm235_vm2, %v13368_v34  ;;  %9447 = vmatmul.mubr.msk.f32.gmra.mrb[106].mxu0 %vm235_vm2, %v13369_v8 }
 0xd71   :  { %9533 = vmatprep.mubr.f32.mxu0 %v11751_v49 }
 0xe27   :  { %v12334_v47 = vpop.f32.mrb[80].mxu1  ;;  %v12336_v54 = vpop.f32.mrb[92].mxu0 }
 0xe28   :  { %v12338_v50 = vpop.f32.mrb[81].mxu1  ;;  %v12340_v52 = vpop.f32.mrb[93].mxu0 }
 0xe29   :  { %9451 = vmatprep.mubr.msk.f32.mxu1 %vm1417_vm3, %v12338_v50 }
 0xe2a   :  { %9452 = vmatmul.mubr.msk.f32.vlgmr.msra.gmra.mrb[96].mxu1 %vm1417_vm3, %v12334_v47 }
 0xe2b   :  { %v12346_v39 = vpop.f32.mrb[82].mxu1  ;;  %9476 = vmatpush3.msra.mxu1 %v10745_v15  ;;  %v12348_v32 = vpop.f32.mrb[94].mxu0 }
 0xe2c   :  { %v12350_v30 = vpop.f32.mrb[83].mxu1  ;;  %v12352_v8 = vpop.f32.mrb[95].mxu0 }
 0xe2d   :  { %9454 = vmatprep.mubr.msk.f32.mxu1 %vm1417_vm3, %v12350_v30 }
 0xe2e   :  { %9455 = vmatmul.mubr.msk.f32.gmra.mrb[98].mxu1 %vm1417_vm3, %v12346_v39 }
 0xe2f   :  { %v12358_v34 = vpop.f32.mrb[84].mxu1  ;;  %v12360_v43 = vpop.f32.mrb[96].mxu0 }
 0xe30   :  { %v12362_v24 = vpop.f32.mrb[85].mxu1  ;;  %v12364_v5 = vpop.f32.mrb[97].mxu0 }
 0xe31   :  { %9457 = vmatprep.mubr.msk.f32.mxu1 %vm1417_vm3, %v12362_v24 }
 0xe32   :  { %9458 = vmatmul.mubr.msk.f32.gmra.mrb[100].mxu1 %vm1417_vm3, %v12358_v34 }
 0xe33   :  { %v12370_v15 = vpop.f32.mrb[86].mxu1  ;;  %v12372_v57 = vpop.f32.mrb[98].mxu0 }
 0xe34   :  { %v12374_v63 = vpop.f32.mrb[87].mxu1  ;;  %v12376_v22 = vpop.f32.mrb[99].mxu0 }
 0xe35   :  { %9460 = vmatprep.mubr.msk.f32.mxu1 %vm1417_vm3, %v12374_v63 }
 0xe36   :  { %9461 = vmatmul.mubr.msk.f32.gmra.mrb[102].mxu1 %vm1417_vm3, %v12370_v15 }
 0xe37   :  { %v12382_v10 = vpop.f32.mrb[88].mxu1  ;;  %v12384_v36 = vpop.f32.mrb[100].mxu0 }
 0xe38   :  { %v12386_v17 = vpop.f32.mrb[89].mxu1  ;;  %v12388_v6 = vpop.f32.mrb[101].mxu0 }
 0xe39   :  { %9463 = vmatprep.mubr.msk.f32.mxu1 %vm1417_vm3, %v12386_v17 }
 0xe3a   :  { %9464 = vmatmul.mubr.msk.f32.gmra.mrb[104].mxu1 %vm1417_vm3, %v12382_v10 }
 0xe3b   :  { %v12394_v61 = vpop.f32.mrb[90].mxu1  ;;  %v12396_v12 = vpop.f32.mrb[102].mxu0 }
 0xe3c   :  { %v12398_v37 = vpop.f32.mrb[91].mxu1  ;;  %v12400_v53 = vpop.f32.mrb[103].mxu0 }
 0xe3d   :  { %9466 = vmatprep.mubr.msk.f32.mxu1 %vm1417_vm3, %v12398_v37 }
 0xe3e   :  { %9467 = vmatmul.mubr.msk.f32.gmra.mrb[106].mxu1 %vm1417_vm3, %v12394_v61 }
 0xe3f   :  { %v12406_v27 = vpop.f32.mrb[92].mxu1  ;;  %v12408_v51 = vpop.f32.mrb[104].mxu0 }
 0xe40   :  { %v12410_v1 = vpop.f32.mrb[93].mxu1  ;;  %v12412_v46 = vpop.f32.mrb[105].mxu0 }
 0xe41   :  { %9469 = vmatprep.mubr.msk.f32.mxu1 %vm1417_vm3, %v12410_v1 }
 0xe42   :  { %9470 = vmatmul.mubr.msk.f32.gmra.mrb[108].mxu1 %vm1417_vm3, %v12406_v27 }
 0xe43   :  { %v12418_v0 = vpop.f32.mrb[94].mxu1  ;;  %v12420_v11 = vpop.f32.mrb[106].mxu0 }
 0xe44   :  { %v12422_v28 = vpop.f32.mrb[95].mxu1  ;;  %v12424_v55 = vpop.f32.mrb[107].mxu0 }
 0xe45   :  { %13370 = vst [vmem:[#allocation78_spill] sm:$0xff] %v12422_v28  ;;  %13371 = vst [vmem:[#allocation92_spill] sm:$0xff] %v12424_v55  ;;  %9472 = vmatprep.mubr.msk.f32.mxu1 %vm1417_vm3, %v12422_v28 }
 0xe46   :  { %9473 = vmatmul.mubr.msk.f32.gmra.mrb[110].mxu1 %vm1417_vm3, %v12418_v0 }
 0xe47   :  { %9477 = vmatprep.mubr.msk.f32.mxu1 %vm1417_vm3, %v12340_v52 }
 0xe4a   :  { %9478 = vmatmul.mubr.msk.f32.vlgmr.msra.gmra.mrb[96].mxu1 %vm1417_vm3, %v12336_v54 }
 0xe4b   :  { %9480 = vmatprep.mubr.msk.f32.mxu1 %vm1417_vm3, %v12352_v8 }
 0xe4e   :  { %9481 = vmatmul.mubr.msk.f32.gmra.mrb[98].mxu1 %vm1417_vm3, %v12348_v32 }
 0xe4f   :  { %9483 = vmatprep.mubr.msk.f32.mxu1 %vm1417_vm3, %v12364_v5 }
 0xe52   :  { %9484 = vmatmul.mubr.msk.f32.gmra.mrb[100].mxu1 %vm1417_vm3, %v12360_v43 }
 0xe53   :  { %9486 = vmatprep.mubr.msk.f32.mxu1 %vm1417_vm3, %v12376_v22 }
 0xe56   :  { %9487 = vmatmul.mubr.msk.f32.gmra.mrb[102].mxu1 %vm1417_vm3, %v12372_v57 }
 0xe57   :  { %9489 = vmatprep.mubr.msk.f32.mxu1 %vm1417_vm3, %v12388_v6 }
 0xe5a   :  { %9490 = vmatmul.mubr.msk.f32.gmra.mrb[104].mxu1 %vm1417_vm3, %v12384_v36 }
 0xe5b   :  { %9492 = vmatprep.mubr.msk.f32.mxu1 %vm1417_vm3, %v12400_v53 }
 0xe5e   :  { %9493 = vmatmul.mubr.msk.f32.gmra.mrb[106].mxu1 %vm1417_vm3, %v12396_v12 }
 0xe5f   :  { %9495 = vmatprep.mubr.msk.f32.mxu1 %vm1417_vm3, %v12412_v46 }
 0xe62   :  { %9496 = vmatmul.mubr.msk.f32.gmra.mrb[108].mxu1 %vm1417_vm3, %v12408_v51 }
 0xe63   :  { %9498 = vmatprep.mubr.msk.f32.mxu1 %vm1417_vm3, %v12424_v55 }
 0xe66   :  { %9499 = vmatmul.mubr.msk.f32.gmra.mrb[110].mxu1 %vm1417_vm3, %v12420_v11 }
 0xe67   :  { %9603 = vmatprep.mubr.f32.mxu1 %v11745_v42 }
 0xf1d   :  { %v9479_v44 = vpop.f32.mrb[96].mxu1 }
 0xf1e   :  { %v5552_v31 = vadd.f32 %v9479_v44, %v13372_v38  ;;  %v5472_v40 = vpop.f32.mrb[97].mxu1 }
 0xf1f   :  { %v5551_v20 = vadd.f32 %v5472_v40, %v13373_v59 }
 0xf20   :  { %10595 = vtanh.f32 %v5552_v31  ;;  %v13378_v31 = vld [vmem:[#allocation110_spill] sm:$0xff] }
 0xf21   :  { %10597 = vtanh.f32 %v5551_v20  ;;  %v9482_v7 = vpop.f32.mrb[98].mxu1 }
 0xf22   :  { %v5554_v41 = vadd.f32 %v9482_v7, %v13374_v56  ;;  %v5482_v13 = vpop.f32.mrb[99].mxu1  ;;  %v13379_v7 = vld [vmem:[#allocation111_spill] sm:$0xff] }
 0xf23   :  { %v5553_v58 = vadd.f32 %v5482_v13, %v13375_v9 }
 0xf24   :  { %10599 = vtanh.f32 %v5554_v41 }
 0xf25   :  { %10601 = vtanh.f32 %v5553_v58  ;;  %v9485_v49 = vpop.f32.mrb[100].mxu1 }
 0xf26   :  { %v5556_v16 = vadd.f32 %v9485_v49, %v13376_v45  ;;  %v5492_v42 = vpop.f32.mrb[101].mxu1  ;;  %v13382_v45 = vld [vmem:[#allocation113_spill] sm:$0xff] }
 0xf27   :  { %v5555_v55 = vadd.f32 %v5492_v42, %v13377_v18 }
 0xf28   :  { %10603 = vtanh.f32 %v5556_v16  ;;  %v13381_v16 = vld [vmem:[#allocation112_spill] sm:$0xff] }
 0xf29   :  { %10605 = vtanh.f32 %v5555_v55  ;;  %v9488_v44 = vpop.f32.mrb[102].mxu1 }
 0xf2a   :  { %v10596_v40 = vpop.eup %10595  ;;  %v5558_v20 = vadd.f32 %v9488_v44, %v13378_v31  ;;  %v5502_v59 = vpop.f32.mrb[103].mxu1 }
 0xf2b   :  { %v10598_v38 = vpop.eup %10597  ;;  %v5557_v56 = vadd.f32 %v5502_v59, %v13379_v7  ;;  %v5584_v13 = vmul.f32 %v13380_v2, %v10596_v40  ;;  %v13384_v7 = vld [vmem:[#allocation115_spill] sm:$0xff] }
 0xf2c   :  { %10607 = vtanh.f32 %v5558_v20  ;;  %v5583_v41 = vmul.f32 %v13380_v2, %v10598_v38 }
 0xf2d   :  { %10609 = vtanh.f32 %v5557_v56  ;;  %v9491_v49 = vpop.f32.mrb[104].mxu1  ;;  %v5602_v58 = vsel %vm1417_vm3, %v5584_v13, 0.0  ;;  %v13383_v13 = vld [vmem:[#allocation114_spill] sm:$0xff] }
 0xf2e   :  { %v10600_v42 = vpop.eup %10599  ;;  %v5560_v55 = vadd.f32 %v9491_v49, %v13381_v16  ;;  %5603 = vadd.xlane.f32.xlu0 %v5602_v58  ;;  %v5512_v18 = vpop.f32.mrb[105].mxu1  ;;  %v5599_v44 = vsel %vm1417_vm3, %v5583_v41, 0.0 }
 0xf2f   :  { %v10602_v31 = vpop.eup %10601  ;;  %v5559_v9 = vadd.f32 %v5512_v18, %v13382_v45  ;;  %5600 = vadd.xlane.f32.xlu1 %v5599_v44  ;;  %v5586_v59 = vmul.f32 %v13380_v2, %v10600_v42  ;;  %v13385_v44 = vld [vmem:[#allocation116_spill] sm:$0xff]  ;;  %v13386_v45 = vld [vmem:[#allocation117_spill] sm:$0xff] }
 0xf30   :  { %10611 = vtanh.f32 %v5560_v55  ;;  %v5585_v38 = vmul.f32 %v13380_v2, %v10602_v31 }
 0xf31   :  { %10613 = vtanh.f32 %v5559_v9  ;;  %v9494_v56 = vpop.f32.mrb[106].mxu1  ;;  %v5608_v40 = vsel %vm1417_vm3, %v5586_v59, 0.0 }
 0xf32   :  { %v10604_v20 = vpop.eup %10603  ;;  %v5562_v49 = vadd.f32 %v9494_v56, %v13383_v13  ;;  %v5522_v58 = vpop.f32.mrb[107].mxu1  ;;  %v5605_v16 = vsel %vm1417_vm3, %v5585_v38, 0.0 }
 0xf33   :  { %v10606_v41 = vpop.eup %10605  ;;  %v5561_v28 = vadd.f32 %v5522_v58, %v13384_v7  ;;  %5609 = vadd.xlane.f32.xlu1 %v5608_v40  ;;  %5606 = vadd.xlane.f32.xlu0 %v5605_v16  ;;  %v5588_v18 = vmul.f32 %v13380_v2, %v10604_v20  ;;  %v13388_v7 = vld [vmem:[#allocation119_spill] sm:$0xff] }
 0xf34   :  { %10615 = vtanh.f32 %v5562_v49  ;;  %v5587_v31 = vmul.f32 %v13380_v2, %v10606_v41  ;;  %v13387_v41 = vld [vmem:[#allocation118_spill] sm:$0xff] }
 0xf35   :  { %10617 = vtanh.f32 %v5561_v28  ;;  %v9497_v9 = vpop.f32.mrb[108].mxu1  ;;  %v5614_v42 = vsel %vm1417_vm3, %v5588_v18, 0.0 }
 0xf36   :  { %v10608_v55 = vpop.eup %10607  ;;  %v5564_v59 = vadd.f32 %v9497_v9, %v13385_v44  ;;  %v5532_v56 = vpop.f32.mrb[109].mxu1  ;;  %v5611_v38 = vsel %vm1417_vm3, %v5587_v31, 0.0 }
 0xf37   :  { %v10610_v13 = vpop.eup %10609  ;;  %v5563_v58 = vadd.f32 %v5532_v56, %v13386_v45  ;;  %5615 = vadd.xlane.f32.xlu1 %v5614_v42  ;;  %5612 = vadd.xlane.f32.xlu0 %v5611_v38  ;;  %v5590_v16 = vmul.f32 %v13380_v2, %v10608_v55 }
 0xf38   :  { %10619 = vtanh.f32 %v5564_v59  ;;  %v5589_v40 = vmul.f32 %v13380_v2, %v10610_v13 }
 0xf39   :  { %10621 = vtanh.f32 %v5563_v58  ;;  %v9500_v28 = vpop.f32.mrb[110].mxu1  ;;  %v5620_v20 = vsel %vm1417_vm3, %v5590_v16, 0.0 }
 0xf3a   :  { %v10612_v49 = vpop.eup %10611  ;;  %v5566_v18 = vadd.f32 %v9500_v28, %v13387_v41  ;;  %v5542_v9 = vpop.f32.mrb[111].mxu1  ;;  %v5617_v31 = vsel %vm1417_vm3, %v5589_v40, 0.0 }
 0xf3b   :  { %v10614_v44 = vpop.eup %10613  ;;  %v5565_v56 = vadd.f32 %v5542_v9, %v13388_v7  ;;  %5621 = vadd.xlane.f32.xlu1 %v5620_v20  ;;  %5618 = vadd.xlane.f32.xlu0 %v5617_v31  ;;  %v5592_v42 = vmul.f32 %v13380_v2, %v10612_v49 }
 0xf3c   :  { %10623 = vtanh.f32 %v5566_v18  ;;  %v5591_v13 = vmul.f32 %v13380_v2, %v10614_v44 }
 0xf3d   :  { %10625 = vtanh.f32 %v5565_v56  ;;  %v5626_v55 = vsel %vm1417_vm3, %v5592_v42, 0.0 }
 0xf3e   :  { %v10616_v59 = vpop.eup %10615  ;;  %v5623_v38 = vsel %vm1417_vm3, %v5591_v13, 0.0 }
 0xf3f   :  { %v10618_v58 = vpop.eup %10617  ;;  %5627 = vadd.xlane.f32.xlu1 %v5626_v55  ;;  %5624 = vadd.xlane.f32.xlu0 %v5623_v38  ;;  %v5594_v16 = vmul.f32 %v13380_v2, %v10616_v59 }
 0xf40   :  { %v5593_v40 = vmul.f32 %v13380_v2, %v10618_v58 }
 0xf41   :  { %v5632_v28 = vsel %vm1417_vm3, %v5594_v16, 0.0 }
 0xf42   :  { %v10620_v20 = vpop.eup %10619  ;;  %v5629_v49 = vsel %vm1417_vm3, %v5593_v40, 0.0  ;;  %v13389_v40 = vld [vmem:[#allocation120_spill] sm:$0xff] }
 0xf43   :  { %v10622_v18 = vpop.eup %10621  ;;  %5633 = vadd.xlane.f32.xlu1 %v5632_v28  ;;  %5630 = vadd.xlane.f32.xlu0 %v5629_v49  ;;  %v5596_v44 = vmul.f32 %v13380_v2, %v10620_v20 }
 0xf44   :  { %v5595_v9 = vmul.f32 %v13380_v2, %v10622_v18 }
 0xf45   :  { %v5638_v31 = vsel %vm1417_vm3, %v5596_v44, 0.0 }
 0xf46   :  { %v10624_v56 = vpop.eup %10623  ;;  %v5635_v42 = vsel %vm1417_vm3, %v5595_v9, 0.0 }
 0xf47   :  { %v10626_v13 = vpop.eup %10625  ;;  %5639 = vadd.xlane.f32.xlu1 %v5638_v31  ;;  %5636 = vadd.xlane.f32.xlu0 %v5635_v42  ;;  %v5598_v55 = vmul.f32 %v13380_v2, %v10624_v56 }
 0xf48   :  { %v5597_v59 = vmul.f32 %v13380_v2, %v10626_v13 }
 0xf49   :  { %v5644_v38 = vsel %vm1417_vm3, %v5598_v55, 0.0 }
 0xf4a   :  { %v5641_v58 = vsel %vm1417_vm3, %v5597_v59, 0.0 }
 0xf4b   :  { %5645 = vadd.xlane.f32.xlu1 %v5644_v38  ;;  %5642 = vadd.xlane.f32.xlu0 %v5641_v58 }
 0xfbb   :  { %v5604_v16 = vpop.xlane.xlu0 %5603 }
 0xfbc   :  { %v5648_v28 = vadd.f32 %v13389_v40, %v5604_v16  ;;  %v5601_v20 = vpop.xlane.xlu1 %5600 }
 0xfbd   :  { %v5647_v49 = vadd.f32 %v13389_v40, %v5601_v20 }
 0xfbe   :  { %v7887_v18 = vmul.f32 -1.442695, %v5648_v28 }
 0xfbf   :  { %v7886_v44 = vmul.f32 -1.442695, %v5647_v49 }
 0xfc0   :  { %10627 = vpow2.f32 %v7887_v18  ;;  %v5610_v9 = vpop.xlane.xlu1 %5609  ;;  %v5607_v31 = vpop.xlane.xlu0 %5606 }
 0xfc1   :  { %10629 = vpow2.f32 %v7886_v44  ;;  %v5650_v2 = vadd.f32 %v13389_v40, %v5610_v9  ;;  %v5649_v56 = vadd.f32 %v13389_v40, %v5607_v31 }
 0xfc3   :  { %v7889_v42 = vmul.f32 -1.442695, %v5650_v2  ;;  %v7888_v13 = vmul.f32 -1.442695, %v5649_v56 }
 0xfc4   :  { %v5616_v55 = vpop.xlane.xlu1 %5615  ;;  %v5613_v59 = vpop.xlane.xlu0 %5612 }
 0xfc5   :  { %10631 = vpow2.f32 %v7889_v42  ;;  %v5652_v38 = vadd.f32 %v13389_v40, %v5616_v55  ;;  %v5651_v58 = vadd.f32 %v13389_v40, %v5613_v59 }
 0xfc6   :  { %10633 = vpow2.f32 %v7888_v13 }
 0xfc7   :  { %v7891_v16 = vmul.f32 -1.442695, %v5652_v38  ;;  %v7890_v28 = vmul.f32 -1.442695, %v5651_v58 }
 0xfc8   :  { %v5622_v20 = vpop.xlane.xlu1 %5621  ;;  %v5619_v49 = vpop.xlane.xlu0 %5618 }
 0xfc9   :  { %10635 = vpow2.f32 %v7891_v16  ;;  %v5654_v18 = vadd.f32 %v13389_v40, %v5622_v20  ;;  %v5653_v44 = vadd.f32 %v13389_v40, %v5619_v49 }
 0xfca   :  { %v10628_v9 = vpop.eup %10627  ;;  %10637 = vpow2.f32 %v7890_v28 }
 0xfcb   :  { %v10630_v31 = vpop.eup %10629  ;;  %v5712_v2 = vadd.f32 1.0, %v10628_v9  ;;  %v7893_v56 = vmul.f32 -1.442695, %v5654_v18  ;;  %v7892_v7 = vmul.f32 -1.442695, %v5653_v44 }
 0xfcc   :  { %v5711_v42 = vadd.f32 1.0, %v10630_v31  ;;  %v5628_v55 = vpop.xlane.xlu1 %5627  ;;  %v5625_v41 = vpop.xlane.xlu0 %5624 }
 0xfcd   :  { %10639 = vrcp.f32 %v5712_v2  ;;  %v5656_v13 = vadd.f32 %v13389_v40, %v5628_v55  ;;  %v5655_v59 = vadd.f32 %v13389_v40, %v5625_v41 }
 0xfce   :  { %10641 = vrcp.f32 %v5711_v42 }
 0xfcf   :  { %v10632_v38 = vpop.eup %10631  ;;  %10643 = vpow2.f32 %v7893_v56  ;;  %v7895_v58 = vmul.f32 -1.442695, %v5656_v13  ;;  %v7894_v28 = vmul.f32 -1.442695, %v5655_v59 }
 0xfd0   :  { %v10634_v16 = vpop.eup %10633  ;;  %v5714_v20 = vadd.f32 1.0, %v10632_v38  ;;  %10645 = vpow2.f32 %v7892_v7  ;;  %v5634_v49 = vpop.xlane.xlu1 %5633 }
 0xfd1   :  { %v5631_v9 = vpop.xlane.xlu0 %5630  ;;  %v5713_v18 = vadd.f32 1.0, %v10634_v16  ;;  %10647 = vpow2.f32 %v7895_v58  ;;  %v5658_v44 = vadd.f32 %v13389_v40, %v5634_v49 }
 0xfd2   :  { %v5657_v31 = vadd.f32 %v13389_v40, %v5631_v9  ;;  %10649 = vrcp.f32 %v5714_v20 }
 0xfd3   :  { %v10636_v2 = vpop.eup %10635  ;;  %10651 = vrcp.f32 %v5713_v18  ;;  %v7897_v41 = vmul.f32 -1.442695, %v5658_v44 }
 0xfd4   :  { %v10638_v42 = vpop.eup %10637  ;;  %v5716_v55 = vadd.f32 1.0, %v10636_v2  ;;  %10653 = vpow2.f32 %v7894_v28  ;;  %v7896_v56 = vmul.f32 -1.442695, %v5657_v31  ;;  %v5640_v13 = vpop.xlane.xlu1 %5639 }
 0xfd5   :  { %v5637_v38 = vpop.xlane.xlu0 %5636  ;;  %v5715_v7 = vadd.f32 1.0, %v10638_v42  ;;  %10655 = vpow2.f32 %v7897_v41  ;;  %v5660_v59 = vadd.f32 %v13389_v40, %v5640_v13 }
 0xfd6   :  { %v5659_v58 = vadd.f32 %v13389_v40, %v5637_v38  ;;  %10657 = vrcp.f32 %v5716_v55 }
 0xfd7   :  { %v10640_v16 = vpop.eup %10639  ;;  %10659 = vrcp.f32 %v5715_v7  ;;  %v7899_v49 = vmul.f32 -1.442695, %v5660_v59 }
 0xfd8   :  { %v7898_v20 = vmul.f32 -1.442695, %v5659_v58  ;;  %v10642_v9 = vpop.eup %10641  ;;  %10661 = vpow2.f32 %v7896_v56  ;;  %5766 = vperm.xlu1 %10382, %v10640_v16   ;;  %v5646_v18 = vpop.xlane.xlu1 %5645 }
 0xfd9   :  { %v5643_v44 = vpop.xlane.xlu0 %5642  ;;  %v10644_v28 = vpop.eup %10643  ;;  %10663 = vpow2.f32 %v7899_v49  ;;  %v5662_v31 = vadd.f32 %v13389_v40, %v5646_v18  ;;  %5761 = vperm.xlu0 %10381, %v10642_v9  }
 0xfda   :  { %v5661_v2 = vadd.f32 %v13389_v40, %v5643_v44  ;;  %v10646_v41 = vpop.eup %10645  ;;  %v5718_v42 = vadd.f32 1.0, %v10644_v28  ;;  %10665 = vpow2.f32 %v7898_v20 }
 0xfdb   :  { %v10648_v55 = vpop.eup %10647  ;;  %v5717_v13 = vadd.f32 1.0, %v10646_v41  ;;  %v7901_v38 = vmul.f32 -1.442695, %v5662_v31 }
 0xfdc   :  { %v10650_v7 = vpop.eup %10649  ;;  %10667 = vrcp.f32 %v5718_v42  ;;  %v5720_v59 = vadd.f32 1.0, %v10648_v55  ;;  %v7900_v56 = vmul.f32 -1.442695, %v5661_v2 }
 0xfdd   :  { %v10652_v58 = vpop.eup %10651  ;;  %10669 = vrcp.f32 %v5717_v13  ;;  %5776 = vperm.xlu0 %10381, %v10650_v7  }
 0xfde   :  { %v10654_v16 = vpop.eup %10653  ;;  %10671 = vrcp.f32 %v5720_v59  ;;  %5771 = vperm.xlu1 %10382, %v10652_v58  }
 0xfdf   :  { %v10656_v49 = vpop.eup %10655  ;;  %v5719_v18 = vadd.f32 1.0, %v10654_v16  ;;  %10673 = vpow2.f32 %v7901_v38 }
 0xfe0   :  { %v10658_v40 = vpop.eup %10657  ;;  %v5722_v9 = vadd.f32 1.0, %v10656_v49  ;;  %10675 = vpow2.f32 %v7900_v56 }
 0xfe1   :  { %v10660_v20 = vpop.eup %10659  ;;  %10677 = vrcp.f32 %v5719_v18  ;;  %5786 = vperm.xlu0 %10381, %v10658_v40  }
 0xfe2   :  { %v10662_v44 = vpop.eup %10661  ;;  %10679 = vrcp.f32 %v5722_v9  ;;  %5781 = vperm.xlu1 %10382, %v10660_v20  }
 0xfe3   :  { %v10664_v28 = vpop.eup %10663  ;;  %v5721_v31 = vadd.f32 1.0, %v10662_v44 }
 0xfe4   :  { %v10666_v2 = vpop.eup %10665  ;;  %v5724_v41 = vadd.f32 1.0, %v10664_v28  ;;  %v10746_v28 = vld [vmem:[#allocation2] sm:$0x1] }
 0xfe5   :  { %10681 = vrcp.f32 %v5721_v31  ;;  %v5723_v42 = vadd.f32 1.0, %v10666_v2 }
 0xfe6   :  { %v10668_v55 = vpop.eup %10667  ;;  %10683 = vrcp.f32 %v5724_v41  ;;  %v13390_v41 = vld [vmem:[#allocation38_spill] sm:$0xff] }
 0xfe7   :  { %v10670_v13 = vpop.eup %10669  ;;  %10685 = vrcp.f32 %v5723_v42  ;;  %5796 = vperm.xlu0 %10381, %v10668_v55  }
 0xfe8   :  { %v10672_v38 = vpop.eup %10671  ;;  %5791 = vperm.xlu1 %10382, %v10670_v13   ;;  %v13391_v13 = vld [vmem:[#allocation40_spill] sm:$0xff] }
 0xfe9   :  { %v10674_v7 = vpop.eup %10673 }
 0xfea   :  { %v10676_v59 = vpop.eup %10675  ;;  %v5726_v56 = vadd.f32 1.0, %v10674_v7 }
 0xfeb   :  { %v10678_v58 = vpop.eup %10677  ;;  %v5725_v16 = vadd.f32 1.0, %v10676_v59  ;;  %5806 = vperm.xlu0 %10381, %v10672_v38  }
 0xfec   :  { %v10680_v49 = vpop.eup %10679  ;;  %10687 = vrcp.f32 %v5726_v56  ;;  %5801 = vperm.xlu1 %10382, %v10678_v58   ;;  %v13392_v56 = vld [vmem:[#allocation39_spill] sm:$0xff] }
 0xfed   :  { %10689 = vrcp.f32 %v5725_v16 }
 0xfef   :  { %v10682_v18 = vpop.eup %10681  ;;  %5816 = vperm.xlu0 %10381, %v10680_v49  }
 0xff0   :  { %v10684_v40 = vpop.eup %10683  ;;  %5811 = vperm.xlu1 %10382, %v10682_v18  }
 0xff1   :  { %v10686_v9 = vpop.eup %10685 }
 0xff3   :  { %5826 = vperm.xlu0 %10381, %v10684_v40  }
 0xff4   :  { %5821 = vperm.xlu1 %10382, %v10686_v9  }
 0xff6   :  { %v10688_v20 = vpop.eup %10687 }
 0xff7   :  { %v10690_v44 = vpop.eup %10689  ;;  %5836 = vperm.xlu0 %10381, %v10688_v20  }
 0xff8   :  { %5831 = vperm.xlu1 %10382, %v10690_v44  }
 0xffc   :  { %7410 = vperm.xlu1 %10382, %v10746_v28   ;;  %v13393_v28 = vld [vmem:[#allocation42_spill] sm:$0xff] }
0x1057   :  { %v5767_v31 = vpop.permute.xlu1 %5766 }
0x1058   :  { %v5840_v2 = vmul.f32 %v12334_v47, %v5767_v31  ;;  %v5931_v42 = vmul.f32 %v13390_v41, %v5767_v31  ;;  %v6022_v55 = vmul.f32 %v12336_v54, %v5767_v31  ;;  %v6113_v38 = vmul.f32 %v13391_v13, %v5767_v31  ;;  %v5762_v7 = vpop.permute.xlu0 %5761  ;;  %v13394_v41 = vld [vmem:[#allocation44_spill] sm:$0xff] }
0x1059   :  { %v5839_v59 = vmul.f32 %v5762_v7, %v12338_v50  ;;  %v5930_v58 = vmul.f32 %v5762_v7, %v13392_v56  ;;  %v6021_v16 = vmul.f32 %v5762_v7, %v12340_v52  ;;  %v6112_v49 = vmul.f32 %v5762_v7, %v13312_v23  ;;  %v13395_v23 = vld [vmem:[#allocation43_spill] sm:$0xff] }
0x105b   :  { %v10102_v18 = vpack.c.bf16 %v5840_v2, %v5839_v59  ;;  %v10166_v40 = vpack.c.bf16 %v6022_v55, %v6021_v16  ;;  %v12535_v9 = vpack.c.bf16 %v5931_v42, %v5930_v58  ;;  %v12537_v47 = vpack.c.bf16 %v6113_v38, %v6112_v49  ;;  %v13396_v55 = vld [vmem:[#allocation45_spill] sm:$0xff] }
0x105c   :  { %v5777_v20 = vpop.permute.xlu0 %5776 }
0x105d   :  { %v5772_v44 = vpop.permute.xlu1 %5771  ;;  %v5842_v54 = vmul.f32 %v12346_v39, %v5777_v20  ;;  %v5933_v31 = vmul.f32 %v13393_v28, %v5777_v20  ;;  %v6024_v50 = vmul.f32 %v12348_v32, %v5777_v20  ;;  %v6115_v13 = vmul.f32 %v13394_v41, %v5777_v20  ;;  %10103 = vmatprep.subr.bf16.mxu0 %v10102_v18  ;;  %v13399_v41 = vld [vmem:[#allocation54_spill] sm:$0xff] }
0x105e   :  { %v5841_v52 = vmul.f32 %v5772_v44, %v12350_v30  ;;  %v5932_v2 = vmul.f32 %v5772_v44, %v13395_v23  ;;  %v6023_v42 = vmul.f32 %v5772_v44, %v12352_v8  ;;  %v6114_v38 = vmul.f32 %v5772_v44, %v13396_v55  ;;  %10167 = vmatprep.subr.bf16.mxu1 %v10166_v40  ;;  %v13397_v44 = vld [vmem:[#allocation51_spill] sm:$0xff]  ;;  %v13400_v23 = vld [vmem:[#allocation53_spill] sm:$0xff] }
0x105f   :  { %10105 = vmatpush3.bf16.msra.mxu0 %v10102_v18  ;;  %10169 = vmatpush3.bf16.msra.mxu1 %v10166_v40  ;;  %v13401_v55 = vld [vmem:[#allocation55_spill] sm:$0xff] }
0x1060   :  { %v5787_v7 = vpop.permute.xlu0 %5786  ;;  %v10106_v39 = vpack.c.bf16 %v5842_v54, %v5841_v52  ;;  %v10170_v59 = vpack.c.bf16 %v6024_v50, %v6023_v42  ;;  %v12547_v56 = vpack.c.bf16 %v5933_v31, %v5932_v2  ;;  %v12549_v32 = vpack.c.bf16 %v6115_v13, %v6114_v38 }
0x1061   :  { %v5782_v58 = vpop.permute.xlu1 %5781  ;;  %v5844_v16 = vmul.f32 %v12358_v34, %v5787_v7  ;;  %v5935_v30 = vmul.f32 %v13319_v35, %v5787_v7  ;;  %v6026_v49 = vmul.f32 %v12360_v43, %v5787_v7  ;;  %v6117_v8 = vmul.f32 %v13320_v26, %v5787_v7 }
0x1062   :  { %v5843_v20 = vmul.f32 %v5782_v58, %v12362_v24  ;;  %v5934_v18 = vmul.f32 %v5782_v58, %v13317_v48  ;;  %v6025_v40 = vmul.f32 %v5782_v58, %v12364_v5  ;;  %v6116_v54 = vmul.f32 %v5782_v58, %v13397_v44  ;;  %10107 = vmatprep.subr.bf16.mxu0 %v10106_v39  ;;  %v13398_v24 = vld [vmem:[#allocation52_spill] sm:$0xff] }
0x1063   :  { %10171 = vmatprep.subr.bf16.mxu1 %v10170_v59  ;;  %10109 = vmatpush3.bf16.msra.mxu0 %v10106_v39 }
0x1064   :  { %10173 = vmatpush3.bf16.msra.mxu1 %v10170_v59  ;;  %v10110_v28 = vpack.c.bf16 %v5844_v16, %v5843_v20  ;;  %v10174_v34 = vpack.c.bf16 %v6026_v49, %v6025_v40  ;;  %v12559_v31 = vpack.c.bf16 %v5935_v30, %v5934_v18  ;;  %v12561_v35 = vpack.c.bf16 %v6117_v8, %v6116_v54  ;;  %v13402_v8 = vld [vmem:[#allocation57_spill] sm:$0xff]  ;;  %v13403_v40 = vld [vmem:[#allocation59_spill] sm:$0xff] }
0x1066   :  { %v5797_v43 = vpop.permute.xlu0 %5796  ;;  %10111 = vmatprep.subr.bf16.mxu0 %v10110_v28  ;;  %10175 = vmatprep.subr.bf16.mxu1 %v10174_v34 }
0x1067   :  { %v5792_v26 = vpop.permute.xlu1 %5791  ;;  %v5846_v48 = vmul.f32 %v12370_v15, %v5797_v43  ;;  %v5937_v5 = vmul.f32 %v13398_v24, %v5797_v43  ;;  %v6028_v50 = vmul.f32 %v12372_v57, %v5797_v43  ;;  %v6119_v13 = vmul.f32 %v13399_v41, %v5797_v43  ;;  %10113 = vmatpush3.bf16.msra.mxu0 %v10110_v28 }
0x1068   :  { %v5845_v52 = vmul.f32 %v5792_v26, %v12374_v63  ;;  %v5936_v2 = vmul.f32 %v5792_v26, %v13400_v23  ;;  %v6027_v42 = vmul.f32 %v5792_v26, %v12376_v22  ;;  %v6118_v38 = vmul.f32 %v5792_v26, %v13401_v55  ;;  %10177 = vmatpush3.bf16.msra.mxu1 %v10174_v34  ;;  %v13404_v34 = vld [vmem:[#allocation60_spill] sm:$0xff]  ;;  %v13405_v55 = vld [vmem:[#allocation71_spill] sm:$0xff] }
0x106a   :  { %v5807_v7 = vpop.permute.xlu0 %5806  ;;  %v10114_v39 = vpack.c.bf16 %v5846_v48, %v5845_v52  ;;  %v10178_v59 = vpack.c.bf16 %v6028_v50, %v6027_v42  ;;  %v12571_v15 = vpack.c.bf16 %v5937_v5, %v5936_v2  ;;  %v12573_v58 = vpack.c.bf16 %v6119_v13, %v6118_v38 }
0x106b   :  { %v5802_v57 = vpop.permute.xlu1 %5801  ;;  %v5848_v16 = vmul.f32 %v12382_v10, %v5807_v7  ;;  %v5939_v30 = vmul.f32 %v13325_v25, %v5807_v7  ;;  %v6030_v63 = vmul.f32 %v12384_v36, %v5807_v7  ;;  %v6121_v49 = vmul.f32 %v13328_v3, %v5807_v7 }
0x106c   :  { %v5847_v22 = vmul.f32 %v5802_v57, %v12386_v17  ;;  %v5938_v20 = vmul.f32 %v5802_v57, %v13402_v8  ;;  %v6029_v18 = vmul.f32 %v5802_v57, %v12388_v6  ;;  %v6120_v44 = vmul.f32 %v5802_v57, %v13403_v40  ;;  %10115 = vmatprep.subr.bf16.mxu0 %v10114_v39  ;;  %v13406_v57 = vld [vmem:[#allocation78_spill] sm:$0xff]  ;;  %v13409_v8 = vld [vmem:[#allocation73_spill] sm:$0xff] }
0x106d   :  { %10179 = vmatprep.subr.bf16.mxu1 %v10178_v59  ;;  %10117 = vmatpush3.bf16.msra.mxu0 %v10114_v39 }
0x106e   :  { %10181 = vmatpush3.bf16.msra.mxu1 %v10178_v59  ;;  %v5817_v54 = vpop.permute.xlu0 %5816  ;;  %v10118_v10 = vpack.c.bf16 %v5848_v16, %v5847_v22  ;;  %v10182_v28 = vpack.c.bf16 %v6030_v63, %v6029_v18  ;;  %v12583_v25 = vpack.c.bf16 %v5939_v30, %v5938_v20  ;;  %v12585_v36 = vpack.c.bf16 %v6121_v49, %v6120_v44  ;;  %v13407_v30 = vld [vmem:[#allocation69_spill] sm:$0xff]  ;;  %v13408_v49 = vld [vmem:[#allocation92_spill] sm:$0xff] }
0x106f   :  { %v5812_v3 = vpop.permute.xlu1 %5811  ;;  %v5850_v17 = vmul.f32 %v12394_v61, %v5817_v54  ;;  %v5941_v43 = vmul.f32 %v13404_v34, %v5817_v54  ;;  %v6032_v6 = vmul.f32 %v12396_v12, %v5817_v54  ;;  %v6123_v26 = vmul.f32 %v13332_v21, %v5817_v54  ;;  %v13411_v44 = vld [vmem:[#allocation88_spill] sm:$0xff]  ;;  %v13412_v54 = vld [vmem:[#allocation75_spill] sm:$0xff] }
0x1070   :  { %v5849_v48 = vmul.f32 %v5812_v3, %v12398_v37  ;;  %v5940_v24 = vmul.f32 %v5812_v3, %v13330_v19  ;;  %v6031_v5 = vmul.f32 %v5812_v3, %v12400_v53  ;;  %v6122_v50 = vmul.f32 %v5812_v3, %v13331_v29  ;;  %10119 = vmatprep.subr.bf16.mxu0 %v10118_v10  ;;  %v13414_v34 = vld [vmem:[#allocation91_spill] sm:$0xff] }
0x1071   :  { %10183 = vmatprep.subr.bf16.mxu1 %v10182_v28  ;;  %10121 = vmatpush3.bf16.msra.mxu0 %v10118_v10  ;;  %v10748_v10 = vld [vmem:[%s12860_s12] sm:$0xff] }
0x1072   :  { %10185 = vmatpush3.bf16.msra.mxu1 %v10182_v28  ;;  %v5827_v41 = vpop.permute.xlu0 %5826  ;;  %v10122_v61 = vpack.c.bf16 %v5850_v17, %v5849_v48  ;;  %v10186_v13 = vpack.c.bf16 %v6032_v6, %v6031_v5  ;;  %v10154_v52 = vpack.c.bf16 %v5941_v43, %v5940_v24  ;;  %v12595_v23 = vpack.c.bf16 %v6123_v26, %v6122_v50  ;;  %v10750_v28 = vld [vmem:[%s12862_s14] sm:$0xff]  ;;  %v13417_v48 = vld [vmem:[#allocation76_spill] sm:$0xff] }
0x1073   :  { %v5822_v12 = vpop.permute.xlu1 %5821  ;;  %v5852_v21 = vmul.f32 %v12406_v27, %v5827_v41  ;;  %v5943_v37 = vmul.f32 %v13333_v33, %v5827_v41  ;;  %v6034_v19 = vmul.f32 %v12408_v51, %v5827_v41  ;;  %v6125_v53 = vmul.f32 %v13335_v14, %v5827_v41  ;;  %v13415_v43 = vld [vmem:[#allocation77_spill] sm:$0xff]  ;;  %v13418_v50 = vld [vmem:[#allocation90_spill] sm:$0xff] }
0x1074   :  { %v5851_v29 = vmul.f32 %v5822_v12, %v12410_v1  ;;  %v5942_v2 = vmul.f32 %v5822_v12, %v13261_v60  ;;  %v6033_v42 = vmul.f32 %v5822_v12, %v12412_v46  ;;  %v6124_v38 = vmul.f32 %v5822_v12, %v13405_v55  ;;  %10123 = vmatprep.subr.bf16.mxu0 %v10122_v61  ;;  %v13416_v6 = vld [vmem:[#allocation9_spill] sm:$0xff]  ;;  %v13420_v55 = vld [vmem:[#allocation7_spill] sm:$0xff] }
0x1075   :  { %10187 = vmatprep.subr.bf16.mxu1 %v10186_v13  ;;  %10125 = vmatpush3.bf16.msra.mxu0 %v10122_v61  ;;  %v10753_v12 = vld [vmem:[%s12868_s20] ss:$0 sm:$0xff] }
0x1076   :  { %10189 = vmatpush3.bf16.msra.mxu1 %v10186_v13  ;;  %v5837_v7 = vpop.permute.xlu0 %5836  ;;  %v10126_v27 = vpack.c.bf16 %v5852_v21, %v5851_v29  ;;  %v10190_v39 = vpack.c.bf16 %v6034_v19, %v6033_v42  ;;  %v10158_v33 = vpack.c.bf16 %v5943_v37, %v5942_v2  ;;  %v10222_v59 = vpack.c.bf16 %v6125_v53, %v6124_v38  ;;  %v10754_v42 = vld [vmem:[%s12855_s7] sm:$0xff] }
0x1077   :  { %v5832_v51 = vpop.permute.xlu1 %5831  ;;  %v5854_v14 = vmul.f32 %v12418_v0, %v5837_v7  ;;  %v5945_v1 = vmul.f32 %v13336_v4, %v5837_v7  ;;  %v6036_v60 = vmul.f32 %v12420_v11, %v5837_v7  ;;  %v6127_v46 = vmul.f32 %v13337_v62, %v5837_v7  ;;  %v10747_v62 = vld [vmem:[%s12861_s13] sm:$0x3]  ;;  %v13421_v38 = vld [vmem:[#allocation10_spill] sm:$0xff]  ;;  %v13422_v7 = vld [vmem:[#allocation8_spill] sm:$0xff] }
0x1078   :  { %v5853_v16 = vmul.f32 %v5832_v51, %v13406_v57  ;;  %v5944_v63 = vmul.f32 %v5832_v51, %v13407_v30  ;;  %v6035_v22 = vmul.f32 %v5832_v51, %v13408_v49  ;;  %v6126_v20 = vmul.f32 %v5832_v51, %v13409_v8  ;;  %10127 = vmatprep.subr.bf16.mxu0 %v10126_v27  ;;  %v13410_v11 = vld [vmem:[#allocation89_spill] sm:$0xff]  ;;  %v13431_v57 = vld [vmem:[#allocation19_spill] sm:$0xff]  ;;  %v13433_v30 = vld [vmem:[#allocation22_spill] sm:$0xff] }
0x1079   :  { %10191 = vmatprep.subr.bf16.mxu1 %v10190_v39  ;;  %10129 = vmatpush3.bf16.msra.mxu0 %v10126_v27  ;;  %v13423_v27 = vld [vmem:[#allocation11_spill] sm:$0xff]  ;;  %v13426_v51 = vld [vmem:[#allocation13_spill] sm:$0xff]  ;;  %v13437_v8 = vld [vmem:[#allocation26_spill] sm:$0xff] }
0x107a   :  { %10193 = vmatpush3.bf16.msra.mxu1 %v10190_v39  ;;  %v10130_v18 = vpack.c.bf16 %v5854_v14, %v5853_v16  ;;  %v10194_v0 = vpack.c.bf16 %v6036_v60, %v6035_v22  ;;  %v10162_v40 = vpack.c.bf16 %v5945_v1, %v5944_v63  ;;  %v10226_v4 = vpack.c.bf16 %v6127_v46, %v6126_v20  ;;  %v10755_v39 = vld [vmem:[%s13162_s0] sm:$0xff]  ;;  %v13427_v14 = vld [vmem:[#allocation15_spill] sm:$0xff]  ;;  %v13428_v1 = vld [vmem:[#allocation16_spill] sm:$0xff] }
0x107b   :  { %v13429_v60 = vld [vmem:[#allocation18_spill] sm:$0xff]  ;;  %v13430_v46 = vld [vmem:[#allocation17_spill] sm:$0xff]  ;;  %v13432_v16 = vld [vmem:[#allocation20_spill] sm:$0xff] }
0x107c   :  { %10131 = vmatprep.subr.bf16.mxu0 %v10130_v18  ;;  %10195 = vmatprep.subr.bf16.mxu1 %v10194_v0  ;;  %v13434_v63 = vld [vmem:[#allocation21_spill] sm:$0xff]  ;;  %v13435_v49 = vld [vmem:[#allocation23_spill] sm:$0xff]  ;;  %v13436_v22 = vld [vmem:[#allocation24_spill] sm:$0xff] }
0x107d   :  { %10133 = vmatpush3.bf16.msra.mxu0 %v10130_v18  ;;  %v13438_v20 = vld [vmem:[#allocation25_spill] sm:$0xff]  ;;  %v13439_v18 = vld [vmem:[#allocation27_spill] sm:$0xff] }
0x107e   :  { %10197 = vmatpush3.bf16.msra.mxu1 %v10194_v0  ;;  %10135 = vmatprep.subr.bf16.mxu0 %v12535_v9  ;;  %v13440_v0 = vld [vmem:[#allocation28_spill] sm:$0xff] }
0x107f   :  { %9641 = vmatprep.subr.msk.mxu1 %vm154_vm0, %v10747_v62 }
0x1080   :  { %9534 = vmatmul.mubr.f32.vlgmr.msra.gmra.mrb[108].mxu0 %v13410_v11 }
0x1081   :  { %9604 = vmatmul.mubr.f32.vlgmr.msra.gmra.mrb[112].mxu1 %v13411_v44  ;;  %10137 = vmatpush3.bf16.msra.mxu0 %v12535_v9  ;;  %v13413_v9 = vld [vmem:[#allocation74_spill] sm:$0xff] }
0x1082   :  { %9568 = vmatprep.mubr.f32.mxu0 %v13412_v54  ;;  %10139 = vmatprep.subr.bf16.mxu0 %v12547_v56  ;;  %v13446_v54 = vld [vmem:[#allocation32_spill] sm:$0xff] }
0x1083   :  { %9642 = vmatpush3.msk.msra.mxu1 %vm154_vm0, %v10747_v62  ;;  %v13443_v62 = vld [vmem:[#allocation34_spill] sm:$0xff] }
0x1084   :  { %9646 = vmatprep.subr.mxu1 %v10748_v10 }
0x1085   :  { %10141 = vmatpush3.bf16.msra.mxu0 %v12547_v56 }
0x1086   :  { %10143 = vmatprep.subr.bf16.mxu0 %v12559_v31 }
0x1089   :  { %10145 = vmatpush3.bf16.msra.mxu0 %v12559_v31 }
0x108a   :  { %10147 = vmatprep.subr.bf16.mxu0 %v12571_v15 }
0x108d   :  { %10149 = vmatpush3.bf16.msra.mxu0 %v12571_v15 }
0x108e   :  { %10151 = vmatprep.subr.bf16.mxu0 %v12583_v25 }
0x1091   :  { %10153 = vmatpush3.bf16.msra.mxu0 %v12583_v25  ;;  %v10751_v25 = vld [vmem:[%s12863_s15] sm:$0x3] }
0x1092   :  { %10155 = vmatprep.subr.bf16.mxu0 %v10154_v52 }
0x1095   :  { %10157 = vmatpush3.bf16.msra.mxu0 %v10154_v52  ;;  %v13419_v52 = vld [vmem:[#allocation6_spill] sm:$0xff] }
0x1096   :  { %10159 = vmatprep.subr.bf16.mxu0 %v10158_v33 }
0x1099   :  { %10161 = vmatpush3.bf16.msra.mxu0 %v10158_v33  ;;  %v13424_v33 = vld [vmem:[#allocation12_spill] sm:$0xff] }
0x109a   :  { %10163 = vmatprep.subr.bf16.mxu0 %v10162_v40 }
0x109d   :  { %10165 = vmatpush3.bf16.msra.mxu0 %v10162_v40  ;;  %v13441_v40 = vld [vmem:[#allocation30_spill] sm:$0xff] }
0x109e   :  { %10199 = vmatprep.subr.bf16.mxu0 %v12537_v47 }
0x10a0   :  { %9569 = vmatmul.mubr.f32.vlgmr.msra.gmra.mrb[110].mxu0 %v13410_v11  ;;  %v13444_v11 = vld [vmem:[#allocation31_spill] sm:$0xff] }
0x10a1   :  { %10201 = vmatpush3.bf16.msra.mxu0 %v12537_v47  ;;  %9638 = vmatprep.mubr.f32.mxu0 %v13413_v9  ;;  %v10749_v47 = vld [vmem:[%s12867_s19] sm:$0xff] }
0x10a2   :  { %10203 = vmatprep.subr.bf16.mxu0 %v12549_v32  ;;  %v13448_v9 = vld [vmem:[#allocation33_spill] sm:$0xff] }
0x10a5   :  { %10205 = vmatpush3.bf16.msra.mxu0 %v12549_v32 }
0x10a6   :  { %10207 = vmatprep.subr.bf16.mxu0 %v12561_v35 }
0x10a9   :  { %10209 = vmatpush3.bf16.msra.mxu0 %v12561_v35 }
0x10aa   :  { %10211 = vmatprep.subr.bf16.mxu0 %v12573_v58 }
0x10ad   :  { %10213 = vmatpush3.bf16.msra.mxu0 %v12573_v58 }
0x10ae   :  { %10215 = vmatprep.subr.bf16.mxu0 %v12585_v36 }
0x10b1   :  { %10217 = vmatpush3.bf16.msra.mxu0 %v12585_v36  ;;  %v10752_v36 = vld [vmem:[%s12864_s16] sm:$0xff] }
0x10b2   :  { %10219 = vmatprep.subr.bf16.mxu0 %v12595_v23 }
0x10b5   :  { %10221 = vmatpush3.bf16.msra.mxu0 %v12595_v23 }
0x10b6   :  { %10223 = vmatprep.subr.bf16.mxu0 %v10222_v59 }
0x10b9   :  { %10225 = vmatpush3.bf16.msra.mxu0 %v10222_v59  ;;  %v13425_v59 = vld [vmem:[#allocation14_spill] sm:$0xff] }
0x10ba   :  { %10227 = vmatprep.subr.bf16.mxu0 %v10226_v4 }
0x10bd   :  { %10229 = vmatpush3.bf16.msra.mxu0 %v10226_v4  ;;  %v13442_v4 = vld [vmem:[#allocation29_spill] sm:$0xff] }
0x10be   :  { %9666 = vmatprep.subr.mxu0 %v10749_v47 }
0x10c0   :  { %9639 = vmatmul.mubr.f32.vlgmr.msra.gmra.mrb[112].mxu0 %v13411_v44  ;;  %v13445_v44 = vld [vmem:[#allocation35_spill] sm:$0xff] }
0x10c1   :  { %9667 = vmatpush3.msra.mxu0 %v10749_v47  ;;  %v13449_v47 = vld [vmem:[#allocation37_spill] sm:$0xff] }
0x1153   :  { %v9535_v56 = vpop.f32.mrb[108].mxu0 }
0x1154   :  { %v9605_v32 = vpop.f32.mrb[112].mxu1  ;;  %v5921_v31 = vpop.f32.mrb[109].mxu0 }
0x1155   :  { %v6103_v35 = vpop.f32.mrb[113].mxu1 }
0x1173   :  { %v9570_v15 = vpop.f32.mrb[110].mxu0 }
0x1174   :  { %v6012_v58 = vpop.f32.mrb[111].mxu0 }
0x1175   :  { %9643 = vmatprep.mubr.msk.f32.mxu1 %vm147_vm1, %v6012_v58 }
0x1176   :  { %9644 = vmatmul.mubr.msk.f32.vlgmr.msra.gmra.mrb[114].mxu1 %vm147_vm1, %v9570_v15 }
0x1177   :  { %9648 = vmatprep.mubr.msk.f32.mxu1 %vm1417_vm3, %v5921_v31  ;;  %9647 = vmatpush3.msra.mxu1 %v10748_v10  ;;  %v13447_v10 = vld [vmem:[#allocation36_spill] sm:$0xff] }
0x1178   :  { %9651 = vmatprep.subr.mxu1 %v10750_v28 }
0x117e   :  { %9649 = vmatmul.mubr.msk.f32.vlgmr.msra.gmra.mrb[114].mxu1 %vm1417_vm3, %v9535_v56 }
0x117f   :  { %9653 = vmatprep.mubr.msk.f32.mxu1 %vm1417_vm3, %v6103_v35  ;;  %9652 = vmatpush3.msra.mxu1 %v10750_v28 }
0x1180   :  { %9656 = vmatprep.subr.msk.mxu1 %vm154_vm0, %v10751_v25 }
0x1186   :  { %9654 = vmatmul.mubr.msk.f32.vlgmr.msra.gmra.mrb[114].mxu1 %vm1417_vm3, %v9605_v32 }
0x1187   :  { %9657 = vmatpush3.msk.msra.mxu1 %vm154_vm0, %v10751_v25 }
0x1188   :  { %9661 = vmatprep.subr.mxu1 %v10752_v36 }
0x1193   :  { %v9640_v3 = vpop.f32.mrb[112].mxu0 }
0x1194   :  { %v6194_v17 = vpop.f32.mrb[113].mxu0 }
0x1195   :  { %9658 = vmatprep.mubr.msk.f32.mxu1 %vm147_vm1, %v6194_v17 }
0x1196   :  { %9659 = vmatmul.mubr.msk.f32.vlgmr.msra.gmra.mrb[114].mxu1 %vm147_vm1, %v9640_v3 }
0x1197   :  { %9662 = vmatpush3.msra.mxu1 %v10752_v36  ;;  %9663 = vmatprep.mubr.msk.f32.mxu1 %vm1417_vm3, %v13414_v34 }
0x119e   :  { %9664 = vmatmul.mubr.msk.f32.vlgmr.msra.gmra.mrb[114].mxu1 %vm1417_vm3, %v13415_v43 }
0x119f   :  { %9703 = vmatprep.mubr.msk.f32.mxu1 %vm235_vm2, %v13416_v6 }
0x1271   :  { %v9665_v26 = vpop.f32.mrb[114].mxu1 }
0x1272   :  { %v6615_v24 = vadd.f32 %v9665_v26, %v13417_v48  ;;  %v6603_v5 = vpop.f32.mrb[115].mxu1 }
0x1273   :  { %v6614_v41 = vadd.f32 %v6603_v5, %v13418_v50 }
0x1275   :  { %10691 = vtanh.f32 %v6614_v41 }
0x1276   :  { %10693 = vtanh.f32 %v6615_v24 }
0x127f   :  { %v10692_v61 = vpop.eup %10691 }
0x1280   :  { %v10694_v13 = vpop.eup %10693  ;;  %9668 = vmatprep.mubr.msk.f32.mxu0 %vm1417_vm3, %v10692_v61 }
0x1281   :  { %9669 = vmatmul.mubr.msk.f32.vlgmr.msra.gmra.mrb[114].mxu0 %vm1417_vm3, %v10694_v13 }
0x1282   :  { %9675 = vmatprep.mubr.msk.f32.mxu0 %vm235_vm2, %v13419_v52 }
0x1354   :  { %v9670_v23 = vpop.f32.mrb[114].mxu0 }
0x1355   :  { %v6696_v21 = vadd.f32 %v10753_v12, %v9670_v23  ;;  %v6690_v37 = vpop.f32.mrb[115].mxu0 }
0x1356   :  { %v6691_v19 = vadd.f32 %v10753_v12, %v6690_v37 }
0x1357   :  { %10695 = vtanh.f32 %v6696_v21 }
0x1358   :  { %10697 = vtanh.f32 %v6691_v19 }
0x1361   :  { %v10696_v53 = vpop.eup %10695 }
0x1362   :  { %v10698_v29 = vpop.eup %10697 }
0x1363   :  { %v10230_v2 = vpack.c.bf16 %v10696_v53, %v10698_v29 }
0x1365   :  { %10231 = vmatprep.subr.bf16.mxu0 %v10230_v2  ;;  %10235 = vmatprep.subr.bf16.mxu1 %v10230_v2 }
0x1366   :  { %10233 = vmatpush3.bf16.msra.mxu0 %v10230_v2  ;;  %10237 = vmatpush3.bf16.msra.mxu1 %v10230_v2 }
0x1367   :  { %9727 = vmatprep.subr.mxu0 %v10754_v42 }
0x1369   :  { %9676 = vmatmul.mubr.msk.f32.vlgmr.msra.gmra.mrb[116].mxu0 %vm235_vm2, %v13420_v55  ;;  %9704 = vmatmul.mubr.msk.f32.vlgmr.msra.gmra.mrb[116].mxu1 %vm235_vm2, %v13421_v38  ;;  %v10784_v55 = vmov 0.0|0.0   ;;  %v10786_v38 = vmov 0.0  }
0x136a   :  { %9678 = vmatprep.mubr.msk.f32.mxu0 %vm235_vm2, %v13422_v7  ;;  %9706 = vmatprep.mubr.msk.f32.mxu1 %vm235_vm2, %v13423_v27  ;;  %v13450_v27 = vld [vmem:[#allocation102_spill] sm:$0xff] }
0x136b   :  { %9728 = vmatpush3.msra.mxu0 %v10754_v42  ;;  %10238 = vmatprep.subr.bf16.mxu1 %v10784_v55 }
0x136c   :  { %9753 = vmatprep.subr.mxu0 %v10755_v39 }
0x136d   :  { %9679 = vmatmul.mubr.msk.f32.gmra.mrb[118].mxu0 %vm235_vm2, %v13424_v33  ;;  %9707 = vmatmul.mubr.msk.f32.gmra.mrb[118].mxu1 %vm235_vm2, %v13425_v59  ;;  %v13451_v59 = vld [vmem:[#allocation103_spill] sm:$0xff] }
0x136e   :  { %9681 = vmatprep.mubr.msk.f32.mxu0 %vm235_vm2, %v13426_v51  ;;  %9709 = vmatprep.mubr.msk.f32.mxu1 %vm235_vm2, %v13427_v14 }
0x1371   :  { %9682 = vmatmul.mubr.msk.f32.gmra.mrb[120].mxu0 %vm235_vm2, %v13428_v1  ;;  %9710 = vmatmul.mubr.msk.f32.gmra.mrb[120].mxu1 %vm235_vm2, %v13429_v60  ;;  %v13452_v1 = vld [vmem:[#allocation104_spill] sm:$0xff] }
0x1372   :  { %9684 = vmatprep.mubr.msk.f32.mxu0 %vm235_vm2, %v13430_v46  ;;  %9712 = vmatprep.mubr.msk.f32.mxu1 %vm235_vm2, %v13431_v57  ;;  %v13453_v57 = vld [vmem:[#allocation106_spill] sm:$0xff] }
0x1375   :  { %9685 = vmatmul.mubr.msk.f32.gmra.mrb[122].mxu0 %vm235_vm2, %v13432_v16  ;;  %9713 = vmatmul.mubr.msk.f32.gmra.mrb[122].mxu1 %vm235_vm2, %v13433_v30 }
0x1376   :  { %9687 = vmatprep.mubr.msk.f32.mxu0 %vm235_vm2, %v13434_v63  ;;  %9715 = vmatprep.mubr.msk.f32.mxu1 %vm235_vm2, %v13435_v49  ;;  %v13454_v63 = vld [vmem:[#allocation107_spill] sm:$0xff] }
0x1379   :  { %9688 = vmatmul.mubr.msk.f32.gmra.mrb[124].mxu0 %vm235_vm2, %v13436_v22  ;;  %9716 = vmatmul.mubr.msk.f32.gmra.mrb[124].mxu1 %vm235_vm2, %v13437_v8  ;;  %v13455_v8 = vld [vmem:[#allocation108_spill] sm:$0xff] }
0x137a   :  { %9690 = vmatprep.mubr.msk.f32.mxu0 %vm235_vm2, %v13438_v20  ;;  %9718 = vmatprep.mubr.msk.f32.mxu1 %vm235_vm2, %v13439_v18 }
0x137d   :  { %9691 = vmatmul.mubr.msk.f32.gmra.mrb[126].mxu0 %vm235_vm2, %v13440_v0  ;;  %9719 = vmatmul.mubr.msk.f32.gmra.mrb[126].mxu1 %vm235_vm2, %v13441_v40  ;;  %v13456_v40 = vld [vmem:[#allocation110_spill] sm:$0xff] }
0x137e   :  { %9693 = vmatprep.mubr.msk.f32.mxu0 %vm235_vm2, %v13442_v4  ;;  %9721 = vmatprep.mubr.msk.f32.mxu1 %vm235_vm2, %v13443_v62 }
0x1381   :  { %9694 = vmatmul.mubr.msk.f32.gmra.mrb[128].mxu0 %vm235_vm2, %v13444_v11  ;;  %9722 = vmatmul.mubr.msk.f32.gmra.mrb[128].mxu1 %vm235_vm2, %v13445_v44  ;;  %v13457_v44 = vld [vmem:[#allocation111_spill] sm:$0xff] }
0x1382   :  { %9696 = vmatprep.mubr.msk.f32.mxu0 %vm235_vm2, %v13446_v54  ;;  %9724 = vmatprep.mubr.msk.f32.mxu1 %vm235_vm2, %v13447_v10 }
0x1385   :  { %9697 = vmatmul.mubr.msk.f32.gmra.mrb[130].mxu0 %vm235_vm2, %v13448_v9  ;;  %9725 = vmatmul.mubr.msk.f32.gmra.mrb[130].mxu1 %vm235_vm2, %v13449_v47 }
0x1386   :  { %9811 = vmatprep.mubr.msk.f32.mxu1 %vm10785_vm4, %v10786_v38 }
0x143c   :  { %v9677_v56 = vpop.f32.mrb[116].mxu0  ;;  %v9705_v32 = vpop.f32.mrb[116].mxu1 }
0x143d   :  { %v6767_v31 = vpop.f32.mrb[117].mxu0  ;;  %v6912_v35 = vpop.f32.mrb[117].mxu1 }
0x143e   :  { %9729 = vmatprep.mubr.msk.f32.mxu0 %vm1417_vm3, %v6767_v31 }
0x143f   :  { %9730 = vmatmul.mubr.msk.f32.vlgmr.msra.gmra.mrb[132].mxu0 %vm1417_vm3, %v9677_v56 }
0x1440   :  { %v9680_v15 = vpop.f32.mrb[118].mxu0  ;;  %9754 = vmatpush3.msra.mxu0 %v10755_v39  ;;  %v9708_v58 = vpop.f32.mrb[118].mxu1 }
0x1441   :  { %v6777_v28 = vpop.f32.mrb[119].mxu0  ;;  %v6922_v25 = vpop.f32.mrb[119].mxu1 }
0x1442   :  { %9732 = vmatprep.mubr.msk.f32.mxu0 %vm1417_vm3, %v6777_v28 }
0x1443   :  { %9733 = vmatmul.mubr.msk.f32.gmra.mrb[134].mxu0 %vm1417_vm3, %v9680_v15 }
0x1444   :  { %v9683_v36 = vpop.f32.mrb[120].mxu0  ;;  %v9711_v3 = vpop.f32.mrb[120].mxu1 }
0x1445   :  { %v6787_v17 = vpop.f32.mrb[121].mxu0  ;;  %v6932_v34 = vpop.f32.mrb[121].mxu1 }
0x1446   :  { %9735 = vmatprep.mubr.msk.f32.mxu0 %vm1417_vm3, %v6787_v17  ;;  %v13462_v17 = vld [vmem:[#allocation114_spill] sm:$0xff] }
0x1447   :  { %9736 = vmatmul.mubr.msk.f32.gmra.mrb[136].mxu0 %vm1417_vm3, %v9683_v36 }
0x1448   :  { %v9686_v43 = vpop.f32.mrb[122].mxu0  ;;  %v9714_v6 = vpop.f32.mrb[122].mxu1 }
0x1449   :  { %v6797_v26 = vpop.f32.mrb[123].mxu0  ;;  %v6942_v48 = vpop.f32.mrb[123].mxu1 }
0x144a   :  { %9738 = vmatprep.mubr.msk.f32.mxu0 %vm1417_vm3, %v6797_v26  ;;  %v13463_v26 = vld [vmem:[#allocation115_spill] sm:$0xff] }
0x144b   :  { %9739 = vmatmul.mubr.msk.f32.gmra.mrb[138].mxu0 %vm1417_vm3, %v9686_v43 }
0x144c   :  { %v9689_v24 = vpop.f32.mrb[124].mxu0  ;;  %v9717_v5 = vpop.f32.mrb[124].mxu1 }
0x144d   :  { %v6807_v50 = vpop.f32.mrb[125].mxu0  ;;  %v6952_v41 = vpop.f32.mrb[125].mxu1 }
0x144e   :  { %9741 = vmatprep.mubr.msk.f32.mxu0 %vm1417_vm3, %v6807_v50 }
0x144f   :  { %9742 = vmatmul.mubr.msk.f32.gmra.mrb[140].mxu0 %vm1417_vm3, %v9689_v24 }
0x1450   :  { %v9692_v61 = vpop.f32.mrb[126].mxu0  ;;  %v9720_v13 = vpop.f32.mrb[126].mxu1 }
0x1451   :  { %v6817_v52 = vpop.f32.mrb[127].mxu0  ;;  %v6962_v23 = vpop.f32.mrb[127].mxu1 }
0x1452   :  { %9744 = vmatprep.mubr.msk.f32.mxu0 %vm1417_vm3, %v6817_v52 }
0x1453   :  { %9745 = vmatmul.mubr.msk.f32.gmra.mrb[142].mxu0 %vm1417_vm3, %v9692_v61 }
0x1454   :  { %v9695_v12 = vpop.f32.mrb[128].mxu0  ;;  %v9723_v21 = vpop.f32.mrb[128].mxu1 }
0x1455   :  { %v6827_v37 = vpop.f32.mrb[129].mxu0  ;;  %v6972_v19 = vpop.f32.mrb[129].mxu1 }
0x1456   :  { %9747 = vmatprep.mubr.msk.f32.mxu0 %vm1417_vm3, %v6827_v37 }
0x1457   :  { %9748 = vmatmul.mubr.msk.f32.gmra.mrb[144].mxu0 %vm1417_vm3, %v9695_v12 }
0x1458   :  { %v9698_v53 = vpop.f32.mrb[130].mxu0  ;;  %v9726_v29 = vpop.f32.mrb[130].mxu1 }
0x1459   :  { %v6837_v2 = vpop.f32.mrb[131].mxu0  ;;  %v6982_v42 = vpop.f32.mrb[131].mxu1 }
0x145a   :  { %9750 = vmatprep.mubr.msk.f32.mxu0 %vm1417_vm3, %v6837_v2 }
0x145b   :  { %9751 = vmatmul.mubr.msk.f32.gmra.mrb[146].mxu0 %vm1417_vm3, %v9698_v53 }
0x145c   :  { %9755 = vmatprep.mubr.msk.f32.mxu0 %vm1417_vm3, %v6912_v35 }
0x145f   :  { %9756 = vmatmul.mubr.msk.f32.vlgmr.msra.gmra.mrb[132].mxu0 %vm1417_vm3, %v9705_v32  ;;  %v13460_v32 = vld [vmem:[#allocation112_spill] sm:$0xff] }
0x1460   :  { %9758 = vmatprep.mubr.msk.f32.mxu0 %vm1417_vm3, %v6922_v25 }
0x1463   :  { %9759 = vmatmul.mubr.msk.f32.gmra.mrb[134].mxu0 %vm1417_vm3, %v9708_v58  ;;  %v13461_v58 = vld [vmem:[#allocation113_spill] sm:$0xff] }
0x1464   :  { %9761 = vmatprep.mubr.msk.f32.mxu0 %vm1417_vm3, %v6932_v34 }
0x1467   :  { %9762 = vmatmul.mubr.msk.f32.gmra.mrb[136].mxu0 %vm1417_vm3, %v9711_v3 }
0x1468   :  { %9764 = vmatprep.mubr.msk.f32.mxu0 %vm1417_vm3, %v6942_v48 }
0x146b   :  { %9765 = vmatmul.mubr.msk.f32.gmra.mrb[138].mxu0 %vm1417_vm3, %v9714_v6 }
0x146c   :  { %9767 = vmatprep.mubr.msk.f32.mxu0 %vm1417_vm3, %v6952_v41  ;;  %v13464_v41 = vld [vmem:[#allocation116_spill] sm:$0xff] }
0x146f   :  { %9768 = vmatmul.mubr.msk.f32.gmra.mrb[140].mxu0 %vm1417_vm3, %v9717_v5 }
0x1470   :  { %9770 = vmatprep.mubr.msk.f32.mxu0 %vm1417_vm3, %v6962_v23 }
0x1473   :  { %9771 = vmatmul.mubr.msk.f32.gmra.mrb[142].mxu0 %vm1417_vm3, %v9720_v13 }
0x1474   :  { %9773 = vmatprep.mubr.msk.f32.mxu0 %vm1417_vm3, %v6972_v19  ;;  %v13465_v19 = vld [vmem:[#allocation118_spill] sm:$0xff] }
0x1477   :  { %9774 = vmatmul.mubr.msk.f32.gmra.mrb[144].mxu0 %vm1417_vm3, %v9723_v21 }
0x1478   :  { %9776 = vmatprep.mubr.msk.f32.mxu0 %vm1417_vm3, %v6982_v42  ;;  %v13466_v42 = vld [vmem:[#allocation119_spill] sm:$0xff] }
0x147b   :  { %9777 = vmatmul.mubr.msk.f32.gmra.mrb[146].mxu0 %vm1417_vm3, %v9726_v29 }
0x1532   :  { %v9757_v7 = vpop.f32.mrb[132].mxu0 }
0x1533   :  { %v7378_v39 = vadd.f32 %v9757_v7, %v13450_v27  ;;  %v7298_v33 = vpop.f32.mrb[133].mxu0 }
0x1534   :  { %v7377_v51 = vadd.f32 %v7298_v33, %v13451_v59 }
0x1535   :  { %10699 = vtanh.f32 %v7378_v39 }
0x1536   :  { %10701 = vtanh.f32 %v7377_v51  ;;  %v9760_v14 = vpop.f32.mrb[134].mxu0 }
0x1537   :  { %v7380_v60 = vadd.f32 %v9760_v14, %v13452_v1  ;;  %v7308_v46 = vpop.f32.mrb[135].mxu0 }
0x1538   :  { %v7379_v16 = vadd.f32 %v7308_v46, %v13453_v57  ;;  %v10756_v46 = vld [vmem:[%s12858_s10] sm:$0x1]  ;;  %v7411_v57 = vpop.permute.xlu1 %7410  ;;  %s10759_s10 = scalar_lea.vmem %s7551_s3, 16 }
0x1539   :  { %10703 = vtanh.f32 %v7380_v60  ;;  %p10760_p0 = scmp.ne.s32.totalorder %s7551_s3, %s10759_s10  ;;  %p10765_p2 = scmp.lt.s32.totalorder %s10763_s6, %s10759_s10 }
0x153a   :  { %10705 = vtanh.f32 %v7379_v16  ;;  %v9763_v30 = vpop.f32.mrb[136].mxu0  ;;  %v13467_v16 = vld [vmem:[#allocation105_spill] sm:$0xff] }
0x153b   :  { %v7382_v49 = vadd.f32 %v9763_v30, %v13454_v63  ;;  %v7318_v22 = vpop.f32.mrb[137].mxu0  ;;  %v13468_v30 = vsub.s32 0, %v13467_v16  ;;  %p10766_p3 = por %p10765_p2, %p10764_p1 }
0x153c   :  { %v7381_v20 = vadd.f32 %v7318_v22, %v13455_v8 }
0x153d   :  { %10707 = vtanh.f32 %v7382_v49  ;;  %v7416_v63 = vrot.slane %v7411_v57, %v13468_v30  ;;  %p10767_p4 = pnand %p10766_p3, %p10760_p0 }
0x153e   :  { %10709 = vtanh.f32 %v7381_v20  ;;  %v9766_v18 = vpop.f32.mrb[138].mxu0 }
0x153f   :  { %v10700_v0 = vpop.eup %10699  ;;  %v7384_v4 = vadd.f32 %v9766_v18, %v13456_v40  ;;  %v7328_v62 = vpop.f32.mrb[139].mxu0 }
0x1540   :  { %v10702_v11 = vpop.eup %10701  ;;  %v7383_v54 = vadd.f32 %v7328_v62, %v13457_v44 }
0x1541   :  { %10711 = vtanh.f32 %v7384_v4  ;;  %v10239_v9 = vpack.c.bf16 %v10700_v0, %v10702_v11 }
0x1542   :  { %10713 = vtanh.f32 %v7383_v54  ;;  %v9769_v47 = vpop.f32.mrb[140].mxu0 }
0x1543   :  { %v10704_v56 = vpop.eup %10703  ;;  %v7386_v31 = vadd.f32 %v9769_v47, %v13460_v32  ;;  %v7338_v35 = vpop.f32.mrb[141].mxu0  ;;  %10241 = vmatpush3.bf16.xpose.msk.msra.mxu1 %vm12795_vm5, %v10239_v9 }
0x1544   :  { %v10706_v15 = vpop.eup %10705  ;;  %v7385_v28 = vadd.f32 %v7338_v35, %v13461_v58  ;;  %10242 = vmatprep.subr.bf16.mxu1 %v10784_v55 }
0x1545   :  { %10715 = vtanh.f32 %v7386_v31  ;;  %v10243_v25 = vpack.c.bf16 %v10704_v56, %v10706_v15 }
0x1546   :  { %10717 = vtanh.f32 %v7385_v28  ;;  %v9772_v36 = vpop.f32.mrb[142].mxu0 }
0x1547   :  { %v10708_v3 = vpop.eup %10707  ;;  %v7388_v34 = vadd.f32 %v9772_v36, %v13462_v17  ;;  %v7348_v43 = vpop.f32.mrb[143].mxu0 }
0x1548   :  { %v10710_v6 = vpop.eup %10709  ;;  %v7387_v48 = vadd.f32 %v7348_v43, %v13463_v26 }
0x1549   :  { %10719 = vtanh.f32 %v7388_v34  ;;  %v10247_v24 = vpack.c.bf16 %v10708_v3, %v10710_v6 }
0x154a   :  { %10721 = vtanh.f32 %v7387_v48  ;;  %v9775_v5 = vpop.f32.mrb[144].mxu0 }
0x154b   :  { %v10712_v50 = vpop.eup %10711  ;;  %v7390_v61 = vadd.f32 %v9775_v5, %v13464_v41  ;;  %v7358_v13 = vpop.f32.mrb[145].mxu0  ;;  %10245 = vmatpush3.bf16.xpose.msk.msra.mxu1 %vm12795_vm5, %v10243_v25 }
0x154c   :  { %v10714_v52 = vpop.eup %10713  ;;  %v7389_v23 = vadd.f32 %v7358_v13, %v13386_v45  ;;  %10246 = vmatprep.subr.bf16.mxu1 %v10784_v55 }
0x154d   :  { %10723 = vtanh.f32 %v7390_v61  ;;  %v10251_v12 = vpack.c.bf16 %v10712_v50, %v10714_v52 }
0x154e   :  { %10725 = vtanh.f32 %v7389_v23  ;;  %v9778_v21 = vpop.f32.mrb[146].mxu0 }
0x154f   :  { %v10716_v37 = vpop.eup %10715  ;;  %v7392_v53 = vadd.f32 %v9778_v21, %v13465_v19  ;;  %v7368_v29 = vpop.f32.mrb[147].mxu0 }
0x1550   :  { %v10718_v2 = vpop.eup %10717  ;;  %v7391_v38 = vadd.f32 %v7368_v29, %v13466_v42 }
0x1551   :  { %10727 = vtanh.f32 %v7392_v53  ;;  %v10255_v7 = vpack.c.bf16 %v10716_v37, %v10718_v2 }
0x1552   :  { %10729 = vtanh.f32 %v7391_v38 }
0x1553   :  { %v10720_v27 = vpop.eup %10719  ;;  %10249 = vmatpush3.bf16.xpose.msk.msra.mxu1 %vm12795_vm5, %v10247_v24 }
0x1554   :  { %v10722_v45 = vpop.eup %10721  ;;  %10250 = vmatprep.subr.bf16.mxu1 %v10784_v55 }
0x1555   :  { %v10259_v39 = vpack.c.bf16 %v10720_v27, %v10722_v45 }
0x1557   :  { %v10724_v33 = vpop.eup %10723 }
0x1558   :  { %v10726_v59 = vpop.eup %10725 }
0x1559   :  { %v10263_v51 = vpack.c.bf16 %v10724_v33, %v10726_v59 }
0x155b   :  { %v10728_v14 = vpop.eup %10727  ;;  %10253 = vmatpush3.bf16.xpose.msk.msra.mxu1 %vm12795_vm5, %v10251_v12 }
0x155c   :  { %v10730_v1 = vpop.eup %10729  ;;  %10254 = vmatprep.subr.bf16.mxu1 %v10784_v55 }
0x155d   :  { %v10267_v60 = vpack.c.bf16 %v10728_v14, %v10730_v1 }
0x1563   :  { %10257 = vmatpush3.bf16.xpose.msk.msra.mxu1 %vm12795_vm5, %v10255_v7 }
0x1564   :  { %10258 = vmatprep.subr.bf16.mxu1 %v10784_v55 }
0x156b   :  { %10261 = vmatpush3.bf16.xpose.msk.msra.mxu1 %vm12795_vm5, %v10259_v39 }
0x156c   :  { %10262 = vmatprep.subr.bf16.mxu1 %v10784_v55 }
0x1573   :  { %10265 = vmatpush3.bf16.xpose.msk.msra.mxu1 %vm12795_vm5, %v10263_v51 }
0x1574   :  { %10266 = vmatprep.subr.bf16.mxu1 %v10784_v55 }
0x157b   :  { %10269 = vmatpush3.bf16.xpose.msk.msra.mxu1 %vm12795_vm5, %v10267_v60 }
0x1582   :  { %9812 = vmatmul.mubr.msk.f32.vlgmr.msra.gmra.mrb[132].mxu1 %vm1417_vm3, %v10756_v46 }
0x1655   :  { %v7533_v49 = vpop.f32.mrb[132].mxu1 }
0x1656   :  { %v7534_v22 = vadd.f32 %v7533_v49, %v7416_v63  ;;  %v9813_v8 = vpop.f32.mrb[133].mxu1 }
0x1658   :  { %v7997_v20 = vmul.f32 -1.442695, %v7534_v22 }
0x165a   :  { %10731 = vpow2.f32 %v7997_v20 }
0x1664   :  { %v10732_v18 = vpop.eup %10731 }
0x1665   :  { %v7540_v55 = vadd.f32 1.0, %v10732_v18 }
0x1667   :  { %10733 = vrcp.f32 %v7540_v55 }
0x1671   :  { %v10734_v0 = vpop.eup %10733 }
0x1672   :  { %7543 = vst [vmem:[#allocation3] sm:$0x1] %v10734_v0 }
0x1673   :  { %10770 = shalt.err (!%p10767_p4)
}
0x1674   :  { %s10771_s18 = scalar_lea.hbm %s12869_s21, 16 }
0x1675   :  { %p10772_p5 = scmp.ne.s32.totalorder %s12869_s21, %s10771_s18  ;;  %p10775_p6 = scmp.lt.u32.totalorder %s10771_s18, %s12869_s21 }
0x1677   :  { %p10777_p7 = pnand %p10775_p6, %p10772_p5 }
0x1679   :  { %10780 = shalt.err (!%p10777_p7)
}
0x167a   :  { %7553 = dma.vmem_to_hbm [thread:$0]  %s7551_s3, 16, %s12869_s21, [#allocation4]  }
0x167b   :  { %10781 = dma.done.wait [#allocation4], 16  }
0x167c   :  { %10782 = vsyncadd [#allocation4], 4294967280 }
0x167d   :  { %7557 = vsyncpa [#allocation4], 1 }

</bundles_post_ra>
